<compile_context>
chip_gen: v5e
topology: v5e:2x2
jax: 0.10.0
libtpu: 0.0.40
codegen_flags: <defaults>
</compile_context>

<pallas_src>
import jax
import jax.numpy as jnp
from jax import lax
from jax.experimental import pallas as pl
from jax.experimental.pallas import tpu as pltpu

_LANE = 128      # lane tile
_SUBLANE = 8     # f32 sublane tile
_MAX_B_BLK = 128  # max batch rows per grid step


def _round_up(n, m):
    return ((n + m - 1) // m) * m


def _sigmoid_via_tanh(x):
    # sigmoid(x) == 0.5 * tanh(0.5*x) + 0.5 : one EUP op instead of exp+recip.
    return 0.5 * jnp.tanh(0.5 * x) + 0.5


def _make_stock_rnn_kernel(num_layers, seq_len, hidden_pad, out_size):
    T, Hp = seq_len, hidden_pad

    def kernel(*refs):
        x_ref = refs[0]                               # (T, Bb, D)    f32
        layer_refs = refs[1:1 + 3 * num_layers]       # per layer: w_ih, w_hh, b
        idx = 1 + 3 * num_layers
        fc_w_ref = refs[idx]                          # (O, Hp)       f32
        fc_b_ref = refs[idx + 1]                      # (1, O)        f32
        out_ref = refs[idx + 2]                       # (Bb, O)       f32
        proj_ref = refs[idx + 3]                      # (T*Bb, 4*Hp)  f32 scratch
        hseq_ref = refs[idx + 4] if num_layers > 1 else None  # (T*Bb, Hp) bf16

        Bb = x_ref.shape[1]

        h_top = None
        for l in range(num_layers):
            w_ih = layer_refs[3 * l + 0][...]         # (D_l, 4*Hp) bf16
            w_hh = layer_refs[3 * l + 1][...]         # (Hp, 4*Hp)  bf16
            b = layer_refs[3 * l + 2][...]            # (1, 4*Hp)   f32

            # ---- hoisted input projection: one big MXU matmul for all T ----
            if l == 0:
                # (T, Bb, D) -> (T*Bb, D): Bb % 8 == 0, layout-free merge.
                inp2d = x_ref[...].reshape(T * Bb, -1).astype(jnp.bfloat16)
            else:
                inp2d = hseq_ref[...]                 # already bf16
            proj_ref[...] = (
                jnp.dot(inp2d, w_ih, preferred_element_type=jnp.float32) + b)

            # ---- recurrence: only h @ W_hh remains on the serial path ----
            # TODO(synk): for tiny Bb, pltpu.matmul_push_rhs/acc_lhs/pop could
            # keep W_hh resident in the MXU staging registers across the loop.
            h = jnp.zeros((Bb, Hp), jnp.float32)
            c = jnp.zeros((Bb, Hp), jnp.float32)
            for t in range(T):                        # short static T: unroll
                r0 = t * Bb
                gates = proj_ref[r0:r0 + Bb, :] + jnp.dot(
                    h.astype(jnp.bfloat16), w_hh,
                    preferred_element_type=jnp.float32)
                # gate order after wrapper permute is i|f|o|g: one wide
                # sigmoid over the first 3*Hp lanes (128-aligned slices).
                sig = _sigmoid_via_tanh(gates[:, 0:3 * Hp])
                i_g = sig[:, 0 * Hp:1 * Hp]
                f_g = sig[:, 1 * Hp:2 * Hp]
                o_g = sig[:, 2 * Hp:3 * Hp]
                g_g = jnp.tanh(gates[:, 3 * Hp:4 * Hp])
                c = f_g * c + i_g * g_g
                h = o_g * jnp.tanh(c)
                if l < num_layers - 1:                # top-layer hseq never read
                    hseq_ref[r0:r0 + Bb, :] = h.astype(jnp.bfloat16)
            h_top = h

        # ---- fc head on the last step of the top layer ----
        fc_w = fc_w_ref[...]
        fc_b = fc_b_ref[...]
        if out_size == 1:
            # VPU lane reduction instead of an N=1 MXU matmul.
            out_ref[...] = jnp.sum(h_top * fc_w, axis=-1, keepdims=True) + fc_b
        else:
            out_ref[...] = lax.dot_general(
                h_top, fc_w, (((1,), (1,)), ((), ())),
                preferred_element_type=jnp.float32) + fc_b

    return kernel


def _prep_gates(w, hidden, hidden_pad):
    """Permute PyTorch gate order i|f|g|o -> i|f|o|g (sigmoid gates contiguous)
    and zero-pad each gate block from hidden to hidden_pad along the last dim."""
    lead = w.shape[:-1]
    w = w.reshape(lead + (4, hidden))
    w = jnp.take(w, jnp.array([0, 1, 3, 2]), axis=-2)
    w = jnp.pad(w, [(0, 0)] * len(lead) + [(0, 0), (0, hidden_pad - hidden)])
    return w.reshape(lead + (4 * hidden_pad,))


def init_stock_rnn_params(key, input_size, hidden_size, num_layers, output_size):
    """U(-1/sqrt(H), 1/sqrt(H)) init (PyTorch default).  Weights stored
    pre-transposed: w_ih (d_in, 4H), w_hh (H, 4H), combined bias (1, 4H),
    all in PyTorch gate order i|f|g|o (kernel wrapper permutes/pads)."""
    bound = 1.0 / float(hidden_size) ** 0.5
    params = {"layers": []}
    for l in range(num_layers):
        d_in = input_size if l == 0 else hidden_size
        key, k1, k2, k3, k4 = jax.random.split(key, 5)
        w_ih = jax.random.uniform(k1, (d_in, 4 * hidden_size), jnp.float32, -bound, bound)
        w_hh = jax.random.uniform(k2, (hidden_size, 4 * hidden_size), jnp.float32, -bound, bound)
        b_ih = jax.random.uniform(k3, (1, 4 * hidden_size), jnp.float32, -bound, bound)
        b_hh = jax.random.uniform(k4, (1, 4 * hidden_size), jnp.float32, -bound, bound)
        params["layers"].append((w_ih, w_hh, b_ih + b_hh))
    key, k1, k2 = jax.random.split(key, 3)
    params["fc_w"] = jax.random.uniform(k1, (hidden_size, output_size), jnp.float32, -bound, bound)
    params["fc_b"] = jax.random.uniform(k2, (1, output_size), jnp.float32, -bound, bound)
    return params


@jax.jit
def stock_rnn_forward(x, params):
    """x: (B, T, input_size) f32, batch-first (PyTorch) -> (B, output_size)."""
    B, T, D = x.shape
    num_layers = len(params["layers"])
    H = params["layers"][0][1].shape[0]          # w_hh is (H, 4H)
    O = params["fc_w"].shape[1]

    Hp = _round_up(H, _LANE)                     # lane-aligned gate blocks
    B_blk = min(_round_up(B, _SUBLANE), _MAX_B_BLK)   # as many MXU rows as B allows
    Bp = _round_up(B, B_blk)                     # padded batch
    n_blk = Bp // B_blk

    # time-major; zero-pad batch to a block multiple (extra rows discarded).
    x_tm = jnp.transpose(x, (1, 0, 2)).astype(jnp.float32)
    x_tm = jnp.pad(x_tm, ((0, 0), (0, Bp - B), (0, 0)))

    flat = []
    for l, (w_ih, w_hh, b) in enumerate(params["layers"]):
        if l > 0:                                # layers>0 consume the padded hidden
            w_ih = jnp.pad(w_ih, ((0, Hp - H), (0, 0)))
        w_ih = _prep_gates(w_ih, H, Hp).astype(jnp.bfloat16)
        w_hh = _prep_gates(jnp.pad(w_hh, ((0, Hp - H), (0, 0))), H, Hp).astype(jnp.bfloat16)
        b = _prep_gates(b, H, Hp).astype(jnp.float32)
        flat += [w_ih, w_hh, b]
    fc_w_t = jnp.pad(params["fc_w"], ((0, Hp - H), (0, 0))).T.astype(jnp.float32)  # (O, Hp)
    fc_b = params["fc_b"].astype(jnp.float32)                                      # (1, O)
    flat += [fc_w_t, fc_b]

    kernel = _make_stock_rnn_kernel(num_layers, T, Hp, O)

    # Scratch: f32 projection slab; bf16 inter-layer hidden sequence (only if read).
    scratch = [pltpu.VMEM((T * B_blk, 4 * Hp), jnp.float32)]
    if num_layers > 1:
        scratch.append(pltpu.VMEM((T * B_blk, Hp), jnp.bfloat16))

    # Explicit VMEM budget (v5e default scoped limit is 16 MiB; cap at 64 MiB
    # so the same config also fits v7x's physical VMEM).
    weight_bytes = sum(int(w.size) * w.dtype.itemsize for w in flat)
    vmem_bytes = (2 * T * B_blk * D * 4                      # x block, double-buffered
                  + weight_bytes                             # resident weights
                  + T * B_blk * 4 * Hp * 4                   # proj scratch (f32)
                  + (T * B_blk * Hp * 2 if num_layers > 1 else 0)  # hseq (bf16)
                  + 2 * B_blk * O * 4)                       # out block
    vmem_limit = int(min(64 * 1024 * 1024, max(vmem_bytes + (4 << 20), 32 << 20)))
    # TODO(synk): if the proj scratch alone approaches the 64 MiB v7x budget
    # (large T * B_blk * Hp), chunk the hoisted input projection over time.

    # Cost hint so XLA schedules surrounding ops sensibly.
    flops, d_in = 0, D
    for _ in range(num_layers):
        flops += 2 * T * Bp * d_in * 4 * Hp      # hoisted input projections
        flops += 2 * T * Bp * Hp * 4 * Hp        # recurrent matmuls
        d_in = Hp
    flops += 2 * Bp * Hp * O
    transcendentals = 5 * T * num_layers * Bp * Hp
    bytes_accessed = x_tm.size * 4 + weight_bytes + Bp * O * 4

    weight_spec = pl.BlockSpec(memory_space=pltpu.MemorySpace.VMEM)  # resident, no pipelining

    out_pad = pl.pallas_call(
        kernel,
        out_shape=jax.ShapeDtypeStruct((Bp, O), jnp.float32),
        grid=(n_blk,),
        in_specs=([pl.BlockSpec((T, B_blk, D), lambda i: (0, i, 0))]
                  + [weight_spec] * len(flat)),
        out_specs=pl.BlockSpec((B_blk, O), lambda i: (i, 0)),
        scratch_shapes=scratch,
        compiler_params=pltpu.CompilerParams(
            dimension_semantics=("parallel",),
            vmem_limit_bytes=vmem_limit),
        cost_estimate=pl.CostEstimate(flops=flops,
                                      transcendentals=transcendentals,
                                      bytes_accessed=bytes_accessed),
    )(x_tm, *flat)
    return out_pad[:B]


def _reference_forward(x, params, quantize_matmul_weights=False):
    """Pure-JAX LSTM+fc reference of the same semantics (optionally with the
    kernel's bf16 rounding applied to the matmul weights)."""
    B, T, _ = x.shape
    num_layers = len(params["layers"])
    H = params["layers"][0][1].shape[0]

    def q(w):
        if quantize_matmul_weights:
            return w.astype(jnp.bfloat16).astype(jnp.float32)
        return w

    hs = [jnp.zeros((B, H), jnp.float32) for _ in range(num_layers)]
    cs = [jnp.zeros((B, H), jnp.float32) for _ in range(num_layers)]
    for t in range(T):
        inp = x[:, t, :]
        for l in range(num_layers):
            w_ih, w_hh, b = params["layers"][l]
            gates = inp @ q(w_ih) + hs[l] @ q(w_hh) + b
            i = jax.nn.sigmoid(gates[:, 0 * H:1 * H])
            f = jax.nn.sigmoid(gates[:, 1 * H:2 * H])
            g = jnp.tanh(gates[:, 2 * H:3 * H])
            o = jax.nn.sigmoid(gates[:, 3 * H:4 * H])
            cs[l] = f * cs[l] + i * g
            hs[l] = o * jnp.tanh(cs[l])
            inp = hs[l]
    return hs[-1] @ params["fc_w"] + params["fc_b"]


if __name__ == "__main__":
    B, T = 2, 8
    INPUT_SIZE, HIDDEN_SIZE, NUM_LAYERS, OUTPUT_SIZE = 4, 32, 2, 1

    key = jax.random.PRNGKey(0)
    key, xk = jax.random.split(key)
    x = jax.random.normal(xk, (B, T, INPUT_SIZE), jnp.float32)
    params = init_stock_rnn_params(key, INPUT_SIZE, HIDDEN_SIZE,
                                   NUM_LAYERS, OUTPUT_SIZE)

    out = jax.block_until_ready(stock_rnn_forward(x, params))
    assert out.shape == (B, OUTPUT_SIZE), out.shape

    # Kernel runs the matmuls with bf16 operands + f32 accumulation: compare
    # tightly against a reference with the same weight rounding, and loosely
    # against the pure-f32 module semantics.
    ref_bf16w = _reference_forward(x, params, quantize_matmul_weights=True)
    ref_f32 = _reference_forward(x, params)
    assert jnp.allclose(out, ref_bf16w, atol=3e-2, rtol=3e-2), (out, ref_bf16w)
    assert jnp.allclose(out, ref_f32, atol=1e-1, rtol=1e-1), (out, ref_f32)

    print("KERNEL_OK")
</pallas_src>

<mosaic_0001>
module attributes {stable_mosaic.version = 11 : i64} {
  func.func @kernel(%arg0: i32, %arg1: memref<8x8x4xf32, #tpu.memory_space<vmem>>, %arg2: memref<4x512xbf16, #tpu.memory_space<vmem>>, %arg3: memref<128x512xbf16, #tpu.memory_space<vmem>>, %arg4: memref<1x512xf32, #tpu.memory_space<vmem>>, %arg5: memref<128x512xbf16, #tpu.memory_space<vmem>>, %arg6: memref<128x512xbf16, #tpu.memory_space<vmem>>, %arg7: memref<1x512xf32, #tpu.memory_space<vmem>>, %arg8: memref<1x128xf32, #tpu.memory_space<vmem>>, %arg9: memref<1x1xf32, #tpu.memory_space<vmem>>, %arg10: memref<8x1xf32, #tpu.memory_space<vmem>>, %arg11: memref<64x512xf32, #tpu.memory_space<vmem>>, %arg12: memref<64x128xbf16, #tpu.memory_space<vmem>>) attributes {dimension_semantics = [#tpu.dimension_semantics<parallel>], iteration_bounds = array<i64: 1>, scalar_prefetch = 0 : i64, scratch_operands = 2 : i64, tpu.core_type = #tpu.core_type<tc>, window_params = [{transform_indices = @transform_0, window_bounds = array<i64: 8, 8, 4>}, {pipeline_mode = #tpu.pipeline_mode<synchronous>, transform_indices = @transform_1, window_bounds = array<i64: 4, 512>}, {pipeline_mode = #tpu.pipeline_mode<synchronous>, transform_indices = @transform_2, window_bounds = array<i64: 128, 512>}, {pipeline_mode = #tpu.pipeline_mode<synchronous>, transform_indices = @transform_3, window_bounds = array<i64: 1, 512>}, {pipeline_mode = #tpu.pipeline_mode<synchronous>, transform_indices = @transform_4, window_bounds = array<i64: 128, 512>}, {pipeline_mode = #tpu.pipeline_mode<synchronous>, transform_indices = @transform_5, window_bounds = array<i64: 128, 512>}, {pipeline_mode = #tpu.pipeline_mode<synchronous>, transform_indices = @transform_6, window_bounds = array<i64: 1, 512>}, {pipeline_mode = #tpu.pipeline_mode<synchronous>, transform_indices = @transform_7, window_bounds = array<i64: 1, 128>}, {pipeline_mode = #tpu.pipeline_mode<synchronous>, transform_indices = @transform_8, window_bounds = array<i64: 1, 1>}, {transform_indices = @transform_9, window_bounds = array<i64: 8, 1>}]} {
    %c0 = arith.constant 0 : index
    %c0_0 = arith.constant 0 : index
    %0 = vector.load %arg2[%c0, %c0_0] : memref<4x512xbf16, #tpu.memory_space<vmem>>, vector<4x512xbf16>
    %c0_1 = arith.constant 0 : index
    %c0_2 = arith.constant 0 : index
    %1 = vector.load %arg3[%c0_1, %c0_2] : memref<128x512xbf16, #tpu.memory_space<vmem>>, vector<128x512xbf16>
    %c0_3 = arith.constant 0 : index
    %c0_4 = arith.constant 0 : index
    %2 = vector.load %arg4[%c0_3, %c0_4] : memref<1x512xf32, #tpu.memory_space<vmem>>, vector<1x512xf32>
    %c0_5 = arith.constant 0 : index
    %c0_6 = arith.constant 0 : index
    %c0_7 = arith.constant 0 : index
    %3 = vector.load %arg1[%c0_5, %c0_6, %c0_7] : memref<8x8x4xf32, #tpu.memory_space<vmem>>, vector<8x8x4xf32>
    %4 = vector.shape_cast %3 : vector<8x8x4xf32> to vector<64x4xf32>
    %5 = arith.truncf %4 : vector<64x4xf32> to vector<64x4xbf16>
    %cst = arith.constant dense<0.000000e+00> : vector<64x512xf32>
    %6 = tpu.matmul %5, %0, %cst {dimension_numbers = #tpu.dot_dimension_numbers<[1], [0], [0], [1], [0, 0, 1, 1], [], []>} : vector<64x4xbf16>, vector<4x512xbf16>, vector<64x512xf32> -> vector<64x512xf32>
    %7 = vector.broadcast %2 : vector<1x512xf32> to vector<64x512xf32>
    %8 = arith.addf %6, %7 : vector<64x512xf32>
    %c0_8 = arith.constant 0 : index
    %c0_9 = arith.constant 0 : index
    %9 = vector.load %arg11[%c0_8, %c0_9] : memref<64x512xf32, #tpu.memory_space<vmem>>, vector<64x512xf32>
    tpu.vector_store %arg11[%c0_8, %c0_9], %8 {strides = array<i32>} : memref<64x512xf32, #tpu.memory_space<vmem>>, vector<64x512xf32>,
    %cst_10 = arith.constant 0.000000e+00 : f32
    %10 = vector.broadcast %cst_10 : f32 to vector<8x128xf32>
    %cst_11 = arith.constant 0.000000e+00 : f32
    %11 = vector.broadcast %cst_11 : f32 to vector<8x128xf32>
    %c0_12 = arith.constant 0 : index
    %c0_13 = arith.constant 0 : index
    %12 = vector.load %arg11[%c0_12, %c0_13] : memref<64x512xf32, #tpu.memory_space<vmem>>, vector<8x512xf32>
    %13 = arith.truncf %10 : vector<8x128xf32> to vector<8x128xbf16>
    %cst_14 = arith.constant dense<0.000000e+00> : vector<8x512xf32>
    %14 = tpu.matmul %13, %1, %cst_14 {dimension_numbers = #tpu.dot_dimension_numbers<[1], [0], [0], [1], [0, 0, 1, 1], [], []>} : vector<8x128xbf16>, vector<128x512xbf16>, vector<8x512xf32> -> vector<8x512xf32>
    %15 = arith.addf %12, %14 : vector<8x512xf32>
    %16 = vector.extract_strided_slice %15 {offsets = [0, 0], sizes = [8, 384], strides = [1, 1]} : vector<8x512xf32> to vector<8x384xf32>
    %cst_15 = arith.constant 5.000000e-01 : f32
    %17 = vector.broadcast %cst_15 : f32 to vector<8x384xf32>
    %18 = arith.mulf %17, %16 : vector<8x384xf32>
    %19 = math.tanh %18 : vector<8x384xf32>
    %cst_16 = arith.constant 5.000000e-01 : f32
    %20 = vector.broadcast %cst_16 : f32 to vector<8x384xf32>
    %21 = arith.mulf %20, %19 : vector<8x384xf32>
    %cst_17 = arith.constant 5.000000e-01 : f32
    %22 = vector.broadcast %cst_17 : f32 to vector<8x384xf32>
    %23 = arith.addf %21, %22 : vector<8x384xf32>
    %24 = vector.extract_strided_slice %23 {offsets = [0, 0], sizes = [8, 128], strides = [1, 1]} : vector<8x384xf32> to vector<8x128xf32>
    %25 = vector.extract_strided_slice %23 {offsets = [0, 128], sizes = [8, 128], strides = [1, 1]} : vector<8x384xf32> to vector<8x128xf32>
    %26 = vector.extract_strided_slice %23 {offsets = [0, 256], sizes = [8, 128], strides = [1, 1]} : vector<8x384xf32> to vector<8x128xf32>
    %27 = vector.extract_strided_slice %15 {offsets = [0, 384], sizes = [8, 128], strides = [1, 1]} : vector<8x512xf32> to vector<8x128xf32>
    %28 = math.tanh %27 : vector<8x128xf32>
    %29 = arith.mulf %25, %11 : vector<8x128xf32>
    %30 = arith.mulf %24, %28 : vector<8x128xf32>
    %31 = arith.addf %29, %30 : vector<8x128xf32>
    %32 = math.tanh %31 : vector<8x128xf32>
    %33 = arith.mulf %26, %32 : vector<8x128xf32>
    %34 = arith.truncf %33 : vector<8x128xf32> to vector<8x128xbf16>
    %c0_18 = arith.constant 0 : index
    %c0_19 = arith.constant 0 : index
    %35 = vector.load %arg12[%c0_18, %c0_19] : memref<64x128xbf16, #tpu.memory_space<vmem>>, vector<8x128xbf16>
    tpu.vector_store %arg12[%c0_18, %c0_19], %34 {strides = array<i32>} : memref<64x128xbf16, #tpu.memory_space<vmem>>, vector<8x128xbf16>,
    %c8 = arith.constant 8 : index
    %c0_20 = arith.constant 0 : index
    %36 = vector.load %arg11[%c8, %c0_20] : memref<64x512xf32, #tpu.memory_space<vmem>>, vector<8x512xf32>
    %37 = arith.truncf %33 : vector<8x128xf32> to vector<8x128xbf16>
    %cst_21 = arith.constant dense<0.000000e+00> : vector<8x512xf32>
    %38 = tpu.matmul %37, %1, %cst_21 {dimension_numbers = #tpu.dot_dimension_numbers<[1], [0], [0], [1], [0, 0, 1, 1], [], []>} : vector<8x128xbf16>, vector<128x512xbf16>, vector<8x512xf32> -> vector<8x512xf32>
    %39 = arith.addf %36, %38 : vector<8x512xf32>
    %40 = vector.extract_strided_slice %39 {offsets = [0, 0], sizes = [8, 384], strides = [1, 1]} : vector<8x512xf32> to vector<8x384xf32>
    %cst_22 = arith.constant 5.000000e-01 : f32
    %41 = vector.broadcast %cst_22 : f32 to vector<8x384xf32>
    %42 = arith.mulf %41, %40 : vector<8x384xf32>
    %43 = math.tanh %42 : vector<8x384xf32>
    %cst_23 = arith.constant 5.000000e-01 : f32
    %44 = vector.broadcast %cst_23 : f32 to vector<8x384xf32>
    %45 = arith.mulf %44, %43 : vector<8x384xf32>
    %cst_24 = arith.constant 5.000000e-01 : f32
    %46 = vector.broadcast %cst_24 : f32 to vector<8x384xf32>
    %47 = arith.addf %45, %46 : vector<8x384xf32>
    %48 = vector.extract_strided_slice %47 {offsets = [0, 0], sizes = [8, 128], strides = [1, 1]} : vector<8x384xf32> to vector<8x128xf32>
    %49 = vector.extract_strided_slice %47 {offsets = [0, 128], sizes = [8, 128], strides = [1, 1]} : vector<8x384xf32> to vector<8x128xf32>
    %50 = vector.extract_strided_slice %47 {offsets = [0, 256], sizes = [8, 128], strides = [1, 1]} : vector<8x384xf32> to vector<8x128xf32>
    %51 = vector.extract_strided_slice %39 {offsets = [0, 384], sizes = [8, 128], strides = [1, 1]} : vector<8x512xf32> to vector<8x128xf32>
    %52 = math.tanh %51 : vector<8x128xf32>
    %53 = arith.mulf %49, %31 : vector<8x128xf32>
    %54 = arith.mulf %48, %52 : vector<8x128xf32>
    %55 = arith.addf %53, %54 : vector<8x128xf32>
    %56 = math.tanh %55 : vector<8x128xf32>
    %57 = arith.mulf %50, %56 : vector<8x128xf32>
    %58 = arith.truncf %57 : vector<8x128xf32> to vector<8x128xbf16>
    %c8_25 = arith.constant 8 : index
    %c0_26 = arith.constant 0 : index
    %59 = vector.load %arg12[%c8_25, %c0_26] : memref<64x128xbf16, #tpu.memory_space<vmem>>, vector<8x128xbf16>
    tpu.vector_store %arg12[%c8_25, %c0_26], %58 {strides = array<i32>} : memref<64x128xbf16, #tpu.memory_space<vmem>>, vector<8x128xbf16>,
    %c16 = arith.constant 16 : index
    %c0_27 = arith.constant 0 : index
    %60 = vector.load %arg11[%c16, %c0_27] : memref<64x512xf32, #tpu.memory_space<vmem>>, vector<8x512xf32>
    %61 = arith.truncf %57 : vector<8x128xf32> to vector<8x128xbf16>
    %cst_28 = arith.constant dense<0.000000e+00> : vector<8x512xf32>
    %62 = tpu.matmul %61, %1, %cst_28 {dimension_numbers = #tpu.dot_dimension_numbers<[1], [0], [0], [1], [0, 0, 1, 1], [], []>} : vector<8x128xbf16>, vector<128x512xbf16>, vector<8x512xf32> -> vector<8x512xf32>
    %63 = arith.addf %60, %62 : vector<8x512xf32>
    %64 = vector.extract_strided_slice %63 {offsets = [0, 0], sizes = [8, 384], strides = [1, 1]} : vector<8x512xf32> to vector<8x384xf32>
    %cst_29 = arith.constant 5.000000e-01 : f32
    %65 = vector.broadcast %cst_29 : f32 to vector<8x384xf32>
    %66 = arith.mulf %65, %64 : vector<8x384xf32>
    %67 = math.tanh %66 : vector<8x384xf32>
    %cst_30 = arith.constant 5.000000e-01 : f32
    %68 = vector.broadcast %cst_30 : f32 to vector<8x384xf32>
    %69 = arith.mulf %68, %67 : vector<8x384xf32>
    %cst_31 = arith.constant 5.000000e-01 : f32
    %70 = vector.broadcast %cst_31 : f32 to vector<8x384xf32>
    %71 = arith.addf %69, %70 : vector<8x384xf32>
    %72 = vector.extract_strided_slice %71 {offsets = [0, 0], sizes = [8, 128], strides = [1, 1]} : vector<8x384xf32> to vector<8x128xf32>
    %73 = vector.extract_strided_slice %71 {offsets = [0, 128], sizes = [8, 128], strides = [1, 1]} : vector<8x384xf32> to vector<8x128xf32>
    %74 = vector.extract_strided_slice %71 {offsets = [0, 256], sizes = [8, 128], strides = [1, 1]} : vector<8x384xf32> to vector<8x128xf32>
    %75 = vector.extract_strided_slice %63 {offsets = [0, 384], sizes = [8, 128], strides = [1, 1]} : vector<8x512xf32> to vector<8x128xf32>
    %76 = math.tanh %75 : vector<8x128xf32>
    %77 = arith.mulf %73, %55 : vector<8x128xf32>
    %78 = arith.mulf %72, %76 : vector<8x128xf32>
    %79 = arith.addf %77, %78 : vector<8x128xf32>
    %80 = math.tanh %79 : vector<8x128xf32>
    %81 = arith.mulf %74, %80 : vector<8x128xf32>
    %82 = arith.truncf %81 : vector<8x128xf32> to vector<8x128xbf16>
    %c16_32 = arith.constant 16 : index
    %c0_33 = arith.constant 0 : index
    %83 = vector.load %arg12[%c16_32, %c0_33] : memref<64x128xbf16, #tpu.memory_space<vmem>>, vector<8x128xbf16>
    tpu.vector_store %arg12[%c16_32, %c0_33], %82 {strides = array<i32>} : memref<64x128xbf16, #tpu.memory_space<vmem>>, vector<8x128xbf16>,
    %c24 = arith.constant 24 : index
    %c0_34 = arith.constant 0 : index
    %84 = vector.load %arg11[%c24, %c0_34] : memref<64x512xf32, #tpu.memory_space<vmem>>, vector<8x512xf32>
    %85 = arith.truncf %81 : vector<8x128xf32> to vector<8x128xbf16>
    %cst_35 = arith.constant dense<0.000000e+00> : vector<8x512xf32>
    %86 = tpu.matmul %85, %1, %cst_35 {dimension_numbers = #tpu.dot_dimension_numbers<[1], [0], [0], [1], [0, 0, 1, 1], [], []>} : vector<8x128xbf16>, vector<128x512xbf16>, vector<8x512xf32> -> vector<8x512xf32>
    %87 = arith.addf %84, %86 : vector<8x512xf32>
    %88 = vector.extract_strided_slice %87 {offsets = [0, 0], sizes = [8, 384], strides = [1, 1]} : vector<8x512xf32> to vector<8x384xf32>
    %cst_36 = arith.constant 5.000000e-01 : f32
    %89 = vector.broadcast %cst_36 : f32 to vector<8x384xf32>
    %90 = arith.mulf %89, %88 : vector<8x384xf32>
    %91 = math.tanh %90 : vector<8x384xf32>
    %cst_37 = arith.constant 5.000000e-01 : f32
    %92 = vector.broadcast %cst_37 : f32 to vector<8x384xf32>
    %93 = arith.mulf %92, %91 : vector<8x384xf32>
    %cst_38 = arith.constant 5.000000e-01 : f32
    %94 = vector.broadcast %cst_38 : f32 to vector<8x384xf32>
    %95 = arith.addf %93, %94 : vector<8x384xf32>
    %96 = vector.extract_strided_slice %95 {offsets = [0, 0], sizes = [8, 128], strides = [1, 1]} : vector<8x384xf32> to vector<8x128xf32>
    %97 = vector.extract_strided_slice %95 {offsets = [0, 128], sizes = [8, 128], strides = [1, 1]} : vector<8x384xf32> to vector<8x128xf32>
    %98 = vector.extract_strided_slice %95 {offsets = [0, 256], sizes = [8, 128], strides = [1, 1]} : vector<8x384xf32> to vector<8x128xf32>
    %99 = vector.extract_strided_slice %87 {offsets = [0, 384], sizes = [8, 128], strides = [1, 1]} : vector<8x512xf32> to vector<8x128xf32>
    %100 = math.tanh %99 : vector<8x128xf32>
    %101 = arith.mulf %97, %79 : vector<8x128xf32>
    %102 = arith.mulf %96, %100 : vector<8x128xf32>
    %103 = arith.addf %101, %102 : vector<8x128xf32>
    %104 = math.tanh %103 : vector<8x128xf32>
    %105 = arith.mulf %98, %104 : vector<8x128xf32>
    %106 = arith.truncf %105 : vector<8x128xf32> to vector<8x128xbf16>
    %c24_39 = arith.constant 24 : index
    %c0_40 = arith.constant 0 : index
    %107 = vector.load %arg12[%c24_39, %c0_40] : memref<64x128xbf16, #tpu.memory_space<vmem>>, vector<8x128xbf16>
    tpu.vector_store %arg12[%c24_39, %c0_40], %106 {strides = array<i32>} : memref<64x128xbf16, #tpu.memory_space<vmem>>, vector<8x128xbf16>,
    %c32 = arith.constant 32 : index
    %c0_41 = arith.constant 0 : index
    %108 = vector.load %arg11[%c32, %c0_41] : memref<64x512xf32, #tpu.memory_space<vmem>>, vector<8x512xf32>
    %109 = arith.truncf %105 : vector<8x128xf32> to vector<8x128xbf16>
    %cst_42 = arith.constant dense<0.000000e+00> : vector<8x512xf32>
    %110 = tpu.matmul %109, %1, %cst_42 {dimension_numbers = #tpu.dot_dimension_numbers<[1], [0], [0], [1], [0, 0, 1, 1], [], []>} : vector<8x128xbf16>, vector<128x512xbf16>, vector<8x512xf32> -> vector<8x512xf32>
    %111 = arith.addf %108, %110 : vector<8x512xf32>
    %112 = vector.extract_strided_slice %111 {offsets = [0, 0], sizes = [8, 384], strides = [1, 1]} : vector<8x512xf32> to vector<8x384xf32>
    %cst_43 = arith.constant 5.000000e-01 : f32
    %113 = vector.broadcast %cst_43 : f32 to vector<8x384xf32>
    %114 = arith.mulf %113, %112 : vector<8x384xf32>
    %115 = math.tanh %114 : vector<8x384xf32>
    %cst_44 = arith.constant 5.000000e-01 : f32
    %116 = vector.broadcast %cst_44 : f32 to vector<8x384xf32>
    %117 = arith.mulf %116, %115 : vector<8x384xf32>
    %cst_45 = arith.constant 5.000000e-01 : f32
    %118 = vector.broadcast %cst_45 : f32 to vector<8x384xf32>
    %119 = arith.addf %117, %118 : vector<8x384xf32>
    %120 = vector.extract_strided_slice %119 {offsets = [0, 0], sizes = [8, 128], strides = [1, 1]} : vector<8x384xf32> to vector<8x128xf32>
    %121 = vector.extract_strided_slice %119 {offsets = [0, 128], sizes = [8, 128], strides = [1, 1]} : vector<8x384xf32> to vector<8x128xf32>
    %122 = vector.extract_strided_slice %119 {offsets = [0, 256], sizes = [8, 128], strides = [1, 1]} : vector<8x384xf32> to vector<8x128xf32>
    %123 = vector.extract_strided_slice %111 {offsets = [0, 384], sizes = [8, 128], strides = [1, 1]} : vector<8x512xf32> to vector<8x128xf32>
    %124 = math.tanh %123 : vector<8x128xf32>
    %125 = arith.mulf %121, %103 : vector<8x128xf32>
    %126 = arith.mulf %120, %124 : vector<8x128xf32>
    %127 = arith.addf %125, %126 : vector<8x128xf32>
    %128 = math.tanh %127 : vector<8x128xf32>
    %129 = arith.mulf %122, %128 : vector<8x128xf32>
    %130 = arith.truncf %129 : vector<8x128xf32> to vector<8x128xbf16>
    %c32_46 = arith.constant 32 : index
    %c0_47 = arith.constant 0 : index
    %131 = vector.load %arg12[%c32_46, %c0_47] : memref<64x128xbf16, #tpu.memory_space<vmem>>, vector<8x128xbf16>
    tpu.vector_store %arg12[%c32_46, %c0_47], %130 {strides = array<i32>} : memref<64x128xbf16, #tpu.memory_space<vmem>>, vector<8x128xbf16>,
    %c40 = arith.constant 40 : index
    %c0_48 = arith.constant 0 : index
    %132 = vector.load %arg11[%c40, %c0_48] : memref<64x512xf32, #tpu.memory_space<vmem>>, vector<8x512xf32>
    %133 = arith.truncf %129 : vector<8x128xf32> to vector<8x128xbf16>
    %cst_49 = arith.constant dense<0.000000e+00> : vector<8x512xf32>
    %134 = tpu.matmul %133, %1, %cst_49 {dimension_numbers = #tpu.dot_dimension_numbers<[1], [0], [0], [1], [0, 0, 1, 1], [], []>} : vector<8x128xbf16>, vector<128x512xbf16>, vector<8x512xf32> -> vector<8x512xf32>
    %135 = arith.addf %132, %134 : vector<8x512xf32>
    %136 = vector.extract_strided_slice %135 {offsets = [0, 0], sizes = [8, 384], strides = [1, 1]} : vector<8x512xf32> to vector<8x384xf32>
    %cst_50 = arith.constant 5.000000e-01 : f32
    %137 = vector.broadcast %cst_50 : f32 to vector<8x384xf32>
    %138 = arith.mulf %137, %136 : vector<8x384xf32>
    %139 = math.tanh %138 : vector<8x384xf32>
    %cst_51 = arith.constant 5.000000e-01 : f32
    %140 = vector.broadcast %cst_51 : f32 to vector<8x384xf32>
    %141 = arith.mulf %140, %139 : vector<8x384xf32>
    %cst_52 = arith.constant 5.000000e-01 : f32
    %142 = vector.broadcast %cst_52 : f32 to vector<8x384xf32>
    %143 = arith.addf %141, %142 : vector<8x384xf32>
    %144 = vector.extract_strided_slice %143 {offsets = [0, 0], sizes = [8, 128], strides = [1, 1]} : vector<8x384xf32> to vector<8x128xf32>
    %145 = vector.extract_strided_slice %143 {offsets = [0, 128], sizes = [8, 128], strides = [1, 1]} : vector<8x384xf32> to vector<8x128xf32>
    %146 = vector.extract_strided_slice %143 {offsets = [0, 256], sizes = [8, 128], strides = [1, 1]} : vector<8x384xf32> to vector<8x128xf32>
    %147 = vector.extract_strided_slice %135 {offsets = [0, 384], sizes = [8, 128], strides = [1, 1]} : vector<8x512xf32> to vector<8x128xf32>
    %148 = math.tanh %147 : vector<8x128xf32>
    %149 = arith.mulf %145, %127 : vector<8x128xf32>
    %150 = arith.mulf %144, %148 : vector<8x128xf32>
    %151 = arith.addf %149, %150 : vector<8x128xf32>
    %152 = math.tanh %151 : vector<8x128xf32>
    %153 = arith.mulf %146, %152 : vector<8x128xf32>
    %154 = arith.truncf %153 : vector<8x128xf32> to vector<8x128xbf16>
    %c40_53 = arith.constant 40 : index
    %c0_54 = arith.constant 0 : index
    %155 = vector.load %arg12[%c40_53, %c0_54] : memref<64x128xbf16, #tpu.memory_space<vmem>>, vector<8x128xbf16>
    tpu.vector_store %arg12[%c40_53, %c0_54], %154 {strides = array<i32>} : memref<64x128xbf16, #tpu.memory_space<vmem>>, vector<8x128xbf16>,
    %c48 = arith.constant 48 : index
    %c0_55 = arith.constant 0 : index
    %156 = vector.load %arg11[%c48, %c0_55] : memref<64x512xf32, #tpu.memory_space<vmem>>, vector<8x512xf32>
    %157 = arith.truncf %153 : vector<8x128xf32> to vector<8x128xbf16>
    %cst_56 = arith.constant dense<0.000000e+00> : vector<8x512xf32>
    %158 = tpu.matmul %157, %1, %cst_56 {dimension_numbers = #tpu.dot_dimension_numbers<[1], [0], [0], [1], [0, 0, 1, 1], [], []>} : vector<8x128xbf16>, vector<128x512xbf16>, vector<8x512xf32> -> vector<8x512xf32>
    %159 = arith.addf %156, %158 : vector<8x512xf32>
    %160 = vector.extract_strided_slice %159 {offsets = [0, 0], sizes = [8, 384], strides = [1, 1]} : vector<8x512xf32> to vector<8x384xf32>
    %cst_57 = arith.constant 5.000000e-01 : f32
    %161 = vector.broadcast %cst_57 : f32 to vector<8x384xf32>
    %162 = arith.mulf %161, %160 : vector<8x384xf32>
    %163 = math.tanh %162 : vector<8x384xf32>
    %cst_58 = arith.constant 5.000000e-01 : f32
    %164 = vector.broadcast %cst_58 : f32 to vector<8x384xf32>
    %165 = arith.mulf %164, %163 : vector<8x384xf32>
    %cst_59 = arith.constant 5.000000e-01 : f32
    %166 = vector.broadcast %cst_59 : f32 to vector<8x384xf32>
    %167 = arith.addf %165, %166 : vector<8x384xf32>
    %168 = vector.extract_strided_slice %167 {offsets = [0, 0], sizes = [8, 128], strides = [1, 1]} : vector<8x384xf32> to vector<8x128xf32>
    %169 = vector.extract_strided_slice %167 {offsets = [0, 128], sizes = [8, 128], strides = [1, 1]} : vector<8x384xf32> to vector<8x128xf32>
    %170 = vector.extract_strided_slice %167 {offsets = [0, 256], sizes = [8, 128], strides = [1, 1]} : vector<8x384xf32> to vector<8x128xf32>
    %171 = vector.extract_strided_slice %159 {offsets = [0, 384], sizes = [8, 128], strides = [1, 1]} : vector<8x512xf32> to vector<8x128xf32>
    %172 = math.tanh %171 : vector<8x128xf32>
    %173 = arith.mulf %169, %151 : vector<8x128xf32>
    %174 = arith.mulf %168, %172 : vector<8x128xf32>
    %175 = arith.addf %173, %174 : vector<8x128xf32>
    %176 = math.tanh %175 : vector<8x128xf32>
    %177 = arith.mulf %170, %176 : vector<8x128xf32>
    %178 = arith.truncf %177 : vector<8x128xf32> to vector<8x128xbf16>
    %c48_60 = arith.constant 48 : index
    %c0_61 = arith.constant 0 : index
    %179 = vector.load %arg12[%c48_60, %c0_61] : memref<64x128xbf16, #tpu.memory_space<vmem>>, vector<8x128xbf16>
    tpu.vector_store %arg12[%c48_60, %c0_61], %178 {strides = array<i32>} : memref<64x128xbf16, #tpu.memory_space<vmem>>, vector<8x128xbf16>,
    %c56 = arith.constant 56 : index
    %c0_62 = arith.constant 0 : index
    %180 = vector.load %arg11[%c56, %c0_62] : memref<64x512xf32, #tpu.memory_space<vmem>>, vector<8x512xf32>
    %181 = arith.truncf %177 : vector<8x128xf32> to vector<8x128xbf16>
    %cst_63 = arith.constant dense<0.000000e+00> : vector<8x512xf32>
    %182 = tpu.matmul %181, %1, %cst_63 {dimension_numbers = #tpu.dot_dimension_numbers<[1], [0], [0], [1], [0, 0, 1, 1], [], []>} : vector<8x128xbf16>, vector<128x512xbf16>, vector<8x512xf32> -> vector<8x512xf32>
    %183 = arith.addf %180, %182 : vector<8x512xf32>
    %184 = vector.extract_strided_slice %183 {offsets = [0, 0], sizes = [8, 384], strides = [1, 1]} : vector<8x512xf32> to vector<8x384xf32>
    %cst_64 = arith.constant 5.000000e-01 : f32
    %185 = vector.broadcast %cst_64 : f32 to vector<8x384xf32>
    %186 = arith.mulf %185, %184 : vector<8x384xf32>
    %187 = math.tanh %186 : vector<8x384xf32>
    %cst_65 = arith.constant 5.000000e-01 : f32
    %188 = vector.broadcast %cst_65 : f32 to vector<8x384xf32>
    %189 = arith.mulf %188, %187 : vector<8x384xf32>
    %cst_66 = arith.constant 5.000000e-01 : f32
    %190 = vector.broadcast %cst_66 : f32 to vector<8x384xf32>
    %191 = arith.addf %189, %190 : vector<8x384xf32>
    %192 = vector.extract_strided_slice %191 {offsets = [0, 0], sizes = [8, 128], strides = [1, 1]} : vector<8x384xf32> to vector<8x128xf32>
    %193 = vector.extract_strided_slice %191 {offsets = [0, 128], sizes = [8, 128], strides = [1, 1]} : vector<8x384xf32> to vector<8x128xf32>
    %194 = vector.extract_strided_slice %191 {offsets = [0, 256], sizes = [8, 128], strides = [1, 1]} : vector<8x384xf32> to vector<8x128xf32>
    %195 = vector.extract_strided_slice %183 {offsets = [0, 384], sizes = [8, 128], strides = [1, 1]} : vector<8x512xf32> to vector<8x128xf32>
    %196 = math.tanh %195 : vector<8x128xf32>
    %197 = arith.mulf %193, %175 : vector<8x128xf32>
    %198 = arith.mulf %192, %196 : vector<8x128xf32>
    %199 = arith.addf %197, %198 : vector<8x128xf32>
    %200 = math.tanh %199 : vector<8x128xf32>
    %201 = arith.mulf %194, %200 : vector<8x128xf32>
    %202 = arith.truncf %201 : vector<8x128xf32> to vector<8x128xbf16>
    %c56_67 = arith.constant 56 : index
    %c0_68 = arith.constant 0 : index
    %203 = vector.load %arg12[%c56_67, %c0_68] : memref<64x128xbf16, #tpu.memory_space<vmem>>, vector<8x128xbf16>
    tpu.vector_store %arg12[%c56_67, %c0_68], %202 {strides = array<i32>} : memref<64x128xbf16, #tpu.memory_space<vmem>>, vector<8x128xbf16>,
    %c0_69 = arith.constant 0 : index
    %c0_70 = arith.constant 0 : index
    %204 = vector.load %arg5[%c0_69, %c0_70] : memref<128x512xbf16, #tpu.memory_space<vmem>>, vector<128x512xbf16>
    %c0_71 = arith.constant 0 : index
    %c0_72 = arith.constant 0 : index
    %205 = vector.load %arg6[%c0_71, %c0_72] : memref<128x512xbf16, #tpu.memory_space<vmem>>, vector<128x512xbf16>
    %c0_73 = arith.constant 0 : index
    %c0_74 = arith.constant 0 : index
    %206 = vector.load %arg7[%c0_73, %c0_74] : memref<1x512xf32, #tpu.memory_space<vmem>>, vector<1x512xf32>
    %c0_75 = arith.constant 0 : index
    %c0_76 = arith.constant 0 : index
    %207 = vector.load %arg12[%c0_75, %c0_76] : memref<64x128xbf16, #tpu.memory_space<vmem>>, vector<64x128xbf16>
    %cst_77 = arith.constant dense<0.000000e+00> : vector<64x512xf32>
    %208 = tpu.matmul %207, %204, %cst_77 {dimension_numbers = #tpu.dot_dimension_numbers<[1], [0], [0], [1], [0, 0, 1, 1], [], []>} : vector<64x128xbf16>, vector<128x512xbf16>, vector<64x512xf32> -> vector<64x512xf32>
    %209 = vector.broadcast %206 : vector<1x512xf32> to vector<64x512xf32>
    %210 = arith.addf %208, %209 : vector<64x512xf32>
    %c0_78 = arith.constant 0 : index
    %c0_79 = arith.constant 0 : index
    %211 = vector.load %arg11[%c0_78, %c0_79] : memref<64x512xf32, #tpu.memory_space<vmem>>, vector<64x512xf32>
    tpu.vector_store %arg11[%c0_78, %c0_79], %210 {strides = array<i32>} : memref<64x512xf32, #tpu.memory_space<vmem>>, vector<64x512xf32>,
    %cst_80 = arith.constant 0.000000e+00 : f32
    %212 = vector.broadcast %cst_80 : f32 to vector<8x128xf32>
    %cst_81 = arith.constant 0.000000e+00 : f32
    %213 = vector.broadcast %cst_81 : f32 to vector<8x128xf32>
    %c0_82 = arith.constant 0 : index
    %c0_83 = arith.constant 0 : index
    %214 = vector.load %arg11[%c0_82, %c0_83] : memref<64x512xf32, #tpu.memory_space<vmem>>, vector<8x512xf32>
    %215 = arith.truncf %212 : vector<8x128xf32> to vector<8x128xbf16>
    %cst_84 = arith.constant dense<0.000000e+00> : vector<8x512xf32>
    %216 = tpu.matmul %215, %205, %cst_84 {dimension_numbers = #tpu.dot_dimension_numbers<[1], [0], [0], [1], [0, 0, 1, 1], [], []>} : vector<8x128xbf16>, vector<128x512xbf16>, vector<8x512xf32> -> vector<8x512xf32>
    %217 = arith.addf %214, %216 : vector<8x512xf32>
    %218 = vector.extract_strided_slice %217 {offsets = [0, 0], sizes = [8, 384], strides = [1, 1]} : vector<8x512xf32> to vector<8x384xf32>
    %cst_85 = arith.constant 5.000000e-01 : f32
    %219 = vector.broadcast %cst_85 : f32 to vector<8x384xf32>
    %220 = arith.mulf %219, %218 : vector<8x384xf32>
    %221 = math.tanh %220 : vector<8x384xf32>
    %cst_86 = arith.constant 5.000000e-01 : f32
    %222 = vector.broadcast %cst_86 : f32 to vector<8x384xf32>
    %223 = arith.mulf %222, %221 : vector<8x384xf32>
    %cst_87 = arith.constant 5.000000e-01 : f32
    %224 = vector.broadcast %cst_87 : f32 to vector<8x384xf32>
    %225 = arith.addf %223, %224 : vector<8x384xf32>
    %226 = vector.extract_strided_slice %225 {offsets = [0, 0], sizes = [8, 128], strides = [1, 1]} : vector<8x384xf32> to vector<8x128xf32>
    %227 = vector.extract_strided_slice %225 {offsets = [0, 128], sizes = [8, 128], strides = [1, 1]} : vector<8x384xf32> to vector<8x128xf32>
    %228 = vector.extract_strided_slice %225 {offsets = [0, 256], sizes = [8, 128], strides = [1, 1]} : vector<8x384xf32> to vector<8x128xf32>
    %229 = vector.extract_strided_slice %217 {offsets = [0, 384], sizes = [8, 128], strides = [1, 1]} : vector<8x512xf32> to vector<8x128xf32>
    %230 = math.tanh %229 : vector<8x128xf32>
    %231 = arith.mulf %227, %213 : vector<8x128xf32>
    %232 = arith.mulf %226, %230 : vector<8x128xf32>
    %233 = arith.addf %231, %232 : vector<8x128xf32>
    %234 = math.tanh %233 : vector<8x128xf32>
    %235 = arith.mulf %228, %234 : vector<8x128xf32>
    %c8_88 = arith.constant 8 : index
    %c0_89 = arith.constant 0 : index
    %236 = vector.load %arg11[%c8_88, %c0_89] : memref<64x512xf32, #tpu.memory_space<vmem>>, vector<8x512xf32>
    %237 = arith.truncf %235 : vector<8x128xf32> to vector<8x128xbf16>
    %cst_90 = arith.constant dense<0.000000e+00> : vector<8x512xf32>
    %238 = tpu.matmul %237, %205, %cst_90 {dimension_numbers = #tpu.dot_dimension_numbers<[1], [0], [0], [1], [0, 0, 1, 1], [], []>} : vector<8x128xbf16>, vector<128x512xbf16>, vector<8x512xf32> -> vector<8x512xf32>
    %239 = arith.addf %236, %238 : vector<8x512xf32>
    %240 = vector.extract_strided_slice %239 {offsets = [0, 0], sizes = [8, 384], strides = [1, 1]} : vector<8x512xf32> to vector<8x384xf32>
    %cst_91 = arith.constant 5.000000e-01 : f32
    %241 = vector.broadcast %cst_91 : f32 to vector<8x384xf32>
    %242 = arith.mulf %241, %240 : vector<8x384xf32>
    %243 = math.tanh %242 : vector<8x384xf32>
    %cst_92 = arith.constant 5.000000e-01 : f32
    %244 = vector.broadcast %cst_92 : f32 to vector<8x384xf32>
    %245 = arith.mulf %244, %243 : vector<8x384xf32>
    %cst_93 = arith.constant 5.000000e-01 : f32
    %246 = vector.broadcast %cst_93 : f32 to vector<8x384xf32>
    %247 = arith.addf %245, %246 : vector<8x384xf32>
    %248 = vector.extract_strided_slice %247 {offsets = [0, 0], sizes = [8, 128], strides = [1, 1]} : vector<8x384xf32> to vector<8x128xf32>
    %249 = vector.extract_strided_slice %247 {offsets = [0, 128], sizes = [8, 128], strides = [1, 1]} : vector<8x384xf32> to vector<8x128xf32>
    %250 = vector.extract_strided_slice %247 {offsets = [0, 256], sizes = [8, 128], strides = [1, 1]} : vector<8x384xf32> to vector<8x128xf32>
    %251 = vector.extract_strided_slice %239 {offsets = [0, 384], sizes = [8, 128], strides = [1, 1]} : vector<8x512xf32> to vector<8x128xf32>
    %252 = math.tanh %251 : vector<8x128xf32>
    %253 = arith.mulf %249, %233 : vector<8x128xf32>
    %254 = arith.mulf %248, %252 : vector<8x128xf32>
    %255 = arith.addf %253, %254 : vector<8x128xf32>
    %256 = math.tanh %255 : vector<8x128xf32>
    %257 = arith.mulf %250, %256 : vector<8x128xf32>
    %c16_94 = arith.constant 16 : index
    %c0_95 = arith.constant 0 : index
    %258 = vector.load %arg11[%c16_94, %c0_95] : memref<64x512xf32, #tpu.memory_space<vmem>>, vector<8x512xf32>
    %259 = arith.truncf %257 : vector<8x128xf32> to vector<8x128xbf16>
    %cst_96 = arith.constant dense<0.000000e+00> : vector<8x512xf32>
    %260 = tpu.matmul %259, %205, %cst_96 {dimension_numbers = #tpu.dot_dimension_numbers<[1], [0], [0], [1], [0, 0, 1, 1], [], []>} : vector<8x128xbf16>, vector<128x512xbf16>, vector<8x512xf32> -> vector<8x512xf32>
    %261 = arith.addf %258, %260 : vector<8x512xf32>
    %262 = vector.extract_strided_slice %261 {offsets = [0, 0], sizes = [8, 384], strides = [1, 1]} : vector<8x512xf32> to vector<8x384xf32>
    %cst_97 = arith.constant 5.000000e-01 : f32
    %263 = vector.broadcast %cst_97 : f32 to vector<8x384xf32>
    %264 = arith.mulf %263, %262 : vector<8x384xf32>
    %265 = math.tanh %264 : vector<8x384xf32>
    %cst_98 = arith.constant 5.000000e-01 : f32
    %266 = vector.broadcast %cst_98 : f32 to vector<8x384xf32>
    %267 = arith.mulf %266, %265 : vector<8x384xf32>
    %cst_99 = arith.constant 5.000000e-01 : f32
    %268 = vector.broadcast %cst_99 : f32 to vector<8x384xf32>
    %269 = arith.addf %267, %268 : vector<8x384xf32>
    %270 = vector.extract_strided_slice %269 {offsets = [0, 0], sizes = [8, 128], strides = [1, 1]} : vector<8x384xf32> to vector<8x128xf32>
    %271 = vector.extract_strided_slice %269 {offsets = [0, 128], sizes = [8, 128], strides = [1, 1]} : vector<8x384xf32> to vector<8x128xf32>
    %272 = vector.extract_strided_slice %269 {offsets = [0, 256], sizes = [8, 128], strides = [1, 1]} : vector<8x384xf32> to vector<8x128xf32>
    %273 = vector.extract_strided_slice %261 {offsets = [0, 384], sizes = [8, 128], strides = [1, 1]} : vector<8x512xf32> to vector<8x128xf32>
    %274 = math.tanh %273 : vector<8x128xf32>
    %275 = arith.mulf %271, %255 : vector<8x128xf32>
    %276 = arith.mulf %270, %274 : vector<8x128xf32>
    %277 = arith.addf %275, %276 : vector<8x128xf32>
    %278 = math.tanh %277 : vector<8x128xf32>
    %279 = arith.mulf %272, %278 : vector<8x128xf32>
    %c24_100 = arith.constant 24 : index
    %c0_101 = arith.constant 0 : index
    %280 = vector.load %arg11[%c24_100, %c0_101] : memref<64x512xf32, #tpu.memory_space<vmem>>, vector<8x512xf32>
    %281 = arith.truncf %279 : vector<8x128xf32> to vector<8x128xbf16>
    %cst_102 = arith.constant dense<0.000000e+00> : vector<8x512xf32>
    %282 = tpu.matmul %281, %205, %cst_102 {dimension_numbers = #tpu.dot_dimension_numbers<[1], [0], [0], [1], [0, 0, 1, 1], [], []>} : vector<8x128xbf16>, vector<128x512xbf16>, vector<8x512xf32> -> vector<8x512xf32>
    %283 = arith.addf %280, %282 : vector<8x512xf32>
    %284 = vector.extract_strided_slice %283 {offsets = [0, 0], sizes = [8, 384], strides = [1, 1]} : vector<8x512xf32> to vector<8x384xf32>
    %cst_103 = arith.constant 5.000000e-01 : f32
    %285 = vector.broadcast %cst_103 : f32 to vector<8x384xf32>
    %286 = arith.mulf %285, %284 : vector<8x384xf32>
    %287 = math.tanh %286 : vector<8x384xf32>
    %cst_104 = arith.constant 5.000000e-01 : f32
    %288 = vector.broadcast %cst_104 : f32 to vector<8x384xf32>
    %289 = arith.mulf %288, %287 : vector<8x384xf32>
    %cst_105 = arith.constant 5.000000e-01 : f32
    %290 = vector.broadcast %cst_105 : f32 to vector<8x384xf32>
    %291 = arith.addf %289, %290 : vector<8x384xf32>
    %292 = vector.extract_strided_slice %291 {offsets = [0, 0], sizes = [8, 128], strides = [1, 1]} : vector<8x384xf32> to vector<8x128xf32>
    %293 = vector.extract_strided_slice %291 {offsets = [0, 128], sizes = [8, 128], strides = [1, 1]} : vector<8x384xf32> to vector<8x128xf32>
    %294 = vector.extract_strided_slice %291 {offsets = [0, 256], sizes = [8, 128], strides = [1, 1]} : vector<8x384xf32> to vector<8x128xf32>
    %295 = vector.extract_strided_slice %283 {offsets = [0, 384], sizes = [8, 128], strides = [1, 1]} : vector<8x512xf32> to vector<8x128xf32>
    %296 = math.tanh %295 : vector<8x128xf32>
    %297 = arith.mulf %293, %277 : vector<8x128xf32>
    %298 = arith.mulf %292, %296 : vector<8x128xf32>
    %299 = arith.addf %297, %298 : vector<8x128xf32>
    %300 = math.tanh %299 : vector<8x128xf32>
    %301 = arith.mulf %294, %300 : vector<8x128xf32>
    %c32_106 = arith.constant 32 : index
    %c0_107 = arith.constant 0 : index
    %302 = vector.load %arg11[%c32_106, %c0_107] : memref<64x512xf32, #tpu.memory_space<vmem>>, vector<8x512xf32>
    %303 = arith.truncf %301 : vector<8x128xf32> to vector<8x128xbf16>
    %cst_108 = arith.constant dense<0.000000e+00> : vector<8x512xf32>
    %304 = tpu.matmul %303, %205, %cst_108 {dimension_numbers = #tpu.dot_dimension_numbers<[1], [0], [0], [1], [0, 0, 1, 1], [], []>} : vector<8x128xbf16>, vector<128x512xbf16>, vector<8x512xf32> -> vector<8x512xf32>
    %305 = arith.addf %302, %304 : vector<8x512xf32>
    %306 = vector.extract_strided_slice %305 {offsets = [0, 0], sizes = [8, 384], strides = [1, 1]} : vector<8x512xf32> to vector<8x384xf32>
    %cst_109 = arith.constant 5.000000e-01 : f32
    %307 = vector.broadcast %cst_109 : f32 to vector<8x384xf32>
    %308 = arith.mulf %307, %306 : vector<8x384xf32>
    %309 = math.tanh %308 : vector<8x384xf32>
    %cst_110 = arith.constant 5.000000e-01 : f32
    %310 = vector.broadcast %cst_110 : f32 to vector<8x384xf32>
    %311 = arith.mulf %310, %309 : vector<8x384xf32>
    %cst_111 = arith.constant 5.000000e-01 : f32
    %312 = vector.broadcast %cst_111 : f32 to vector<8x384xf32>
    %313 = arith.addf %311, %312 : vector<8x384xf32>
    %314 = vector.extract_strided_slice %313 {offsets = [0, 0], sizes = [8, 128], strides = [1, 1]} : vector<8x384xf32> to vector<8x128xf32>
    %315 = vector.extract_strided_slice %313 {offsets = [0, 128], sizes = [8, 128], strides = [1, 1]} : vector<8x384xf32> to vector<8x128xf32>
    %316 = vector.extract_strided_slice %313 {offsets = [0, 256], sizes = [8, 128], strides = [1, 1]} : vector<8x384xf32> to vector<8x128xf32>
    %317 = vector.extract_strided_slice %305 {offsets = [0, 384], sizes = [8, 128], strides = [1, 1]} : vector<8x512xf32> to vector<8x128xf32>
    %318 = math.tanh %317 : vector<8x128xf32>
    %319 = arith.mulf %315, %299 : vector<8x128xf32>
    %320 = arith.mulf %314, %318 : vector<8x128xf32>
    %321 = arith.addf %319, %320 : vector<8x128xf32>
    %322 = math.tanh %321 : vector<8x128xf32>
    %323 = arith.mulf %316, %322 : vector<8x128xf32>
    %c40_112 = arith.constant 40 : index
    %c0_113 = arith.constant 0 : index
    %324 = vector.load %arg11[%c40_112, %c0_113] : memref<64x512xf32, #tpu.memory_space<vmem>>, vector<8x512xf32>
    %325 = arith.truncf %323 : vector<8x128xf32> to vector<8x128xbf16>
    %cst_114 = arith.constant dense<0.000000e+00> : vector<8x512xf32>
    %326 = tpu.matmul %325, %205, %cst_114 {dimension_numbers = #tpu.dot_dimension_numbers<[1], [0], [0], [1], [0, 0, 1, 1], [], []>} : vector<8x128xbf16>, vector<128x512xbf16>, vector<8x512xf32> -> vector<8x512xf32>
    %327 = arith.addf %324, %326 : vector<8x512xf32>
    %328 = vector.extract_strided_slice %327 {offsets = [0, 0], sizes = [8, 384], strides = [1, 1]} : vector<8x512xf32> to vector<8x384xf32>
    %cst_115 = arith.constant 5.000000e-01 : f32
    %329 = vector.broadcast %cst_115 : f32 to vector<8x384xf32>
    %330 = arith.mulf %329, %328 : vector<8x384xf32>
    %331 = math.tanh %330 : vector<8x384xf32>
    %cst_116 = arith.constant 5.000000e-01 : f32
    %332 = vector.broadcast %cst_116 : f32 to vector<8x384xf32>
    %333 = arith.mulf %332, %331 : vector<8x384xf32>
    %cst_117 = arith.constant 5.000000e-01 : f32
    %334 = vector.broadcast %cst_117 : f32 to vector<8x384xf32>
    %335 = arith.addf %333, %334 : vector<8x384xf32>
    %336 = vector.extract_strided_slice %335 {offsets = [0, 0], sizes = [8, 128], strides = [1, 1]} : vector<8x384xf32> to vector<8x128xf32>
    %337 = vector.extract_strided_slice %335 {offsets = [0, 128], sizes = [8, 128], strides = [1, 1]} : vector<8x384xf32> to vector<8x128xf32>
    %338 = vector.extract_strided_slice %335 {offsets = [0, 256], sizes = [8, 128], strides = [1, 1]} : vector<8x384xf32> to vector<8x128xf32>
    %339 = vector.extract_strided_slice %327 {offsets = [0, 384], sizes = [8, 128], strides = [1, 1]} : vector<8x512xf32> to vector<8x128xf32>
    %340 = math.tanh %339 : vector<8x128xf32>
    %341 = arith.mulf %337, %321 : vector<8x128xf32>
    %342 = arith.mulf %336, %340 : vector<8x128xf32>
    %343 = arith.addf %341, %342 : vector<8x128xf32>
    %344 = math.tanh %343 : vector<8x128xf32>
    %345 = arith.mulf %338, %344 : vector<8x128xf32>
    %c48_118 = arith.constant 48 : index
    %c0_119 = arith.constant 0 : index
    %346 = vector.load %arg11[%c48_118, %c0_119] : memref<64x512xf32, #tpu.memory_space<vmem>>, vector<8x512xf32>
    %347 = arith.truncf %345 : vector<8x128xf32> to vector<8x128xbf16>
    %cst_120 = arith.constant dense<0.000000e+00> : vector<8x512xf32>
    %348 = tpu.matmul %347, %205, %cst_120 {dimension_numbers = #tpu.dot_dimension_numbers<[1], [0], [0], [1], [0, 0, 1, 1], [], []>} : vector<8x128xbf16>, vector<128x512xbf16>, vector<8x512xf32> -> vector<8x512xf32>
    %349 = arith.addf %346, %348 : vector<8x512xf32>
    %350 = vector.extract_strided_slice %349 {offsets = [0, 0], sizes = [8, 384], strides = [1, 1]} : vector<8x512xf32> to vector<8x384xf32>
    %cst_121 = arith.constant 5.000000e-01 : f32
    %351 = vector.broadcast %cst_121 : f32 to vector<8x384xf32>
    %352 = arith.mulf %351, %350 : vector<8x384xf32>
    %353 = math.tanh %352 : vector<8x384xf32>
    %cst_122 = arith.constant 5.000000e-01 : f32
    %354 = vector.broadcast %cst_122 : f32 to vector<8x384xf32>
    %355 = arith.mulf %354, %353 : vector<8x384xf32>
    %cst_123 = arith.constant 5.000000e-01 : f32
    %356 = vector.broadcast %cst_123 : f32 to vector<8x384xf32>
    %357 = arith.addf %355, %356 : vector<8x384xf32>
    %358 = vector.extract_strided_slice %357 {offsets = [0, 0], sizes = [8, 128], strides = [1, 1]} : vector<8x384xf32> to vector<8x128xf32>
    %359 = vector.extract_strided_slice %357 {offsets = [0, 128], sizes = [8, 128], strides = [1, 1]} : vector<8x384xf32> to vector<8x128xf32>
    %360 = vector.extract_strided_slice %357 {offsets = [0, 256], sizes = [8, 128], strides = [1, 1]} : vector<8x384xf32> to vector<8x128xf32>
    %361 = vector.extract_strided_slice %349 {offsets = [0, 384], sizes = [8, 128], strides = [1, 1]} : vector<8x512xf32> to vector<8x128xf32>
    %362 = math.tanh %361 : vector<8x128xf32>
    %363 = arith.mulf %359, %343 : vector<8x128xf32>
    %364 = arith.mulf %358, %362 : vector<8x128xf32>
    %365 = arith.addf %363, %364 : vector<8x128xf32>
    %366 = math.tanh %365 : vector<8x128xf32>
    %367 = arith.mulf %360, %366 : vector<8x128xf32>
    %c56_124 = arith.constant 56 : index
    %c0_125 = arith.constant 0 : index
    %368 = vector.load %arg11[%c56_124, %c0_125] : memref<64x512xf32, #tpu.memory_space<vmem>>, vector<8x512xf32>
    %369 = arith.truncf %367 : vector<8x128xf32> to vector<8x128xbf16>
    %cst_126 = arith.constant dense<0.000000e+00> : vector<8x512xf32>
    %370 = tpu.matmul %369, %205, %cst_126 {dimension_numbers = #tpu.dot_dimension_numbers<[1], [0], [0], [1], [0, 0, 1, 1], [], []>} : vector<8x128xbf16>, vector<128x512xbf16>, vector<8x512xf32> -> vector<8x512xf32>
    %371 = arith.addf %368, %370 : vector<8x512xf32>
    %372 = vector.extract_strided_slice %371 {offsets = [0, 0], sizes = [8, 384], strides = [1, 1]} : vector<8x512xf32> to vector<8x384xf32>
    %cst_127 = arith.constant 5.000000e-01 : f32
    %373 = vector.broadcast %cst_127 : f32 to vector<8x384xf32>
    %374 = arith.mulf %373, %372 : vector<8x384xf32>
    %375 = math.tanh %374 : vector<8x384xf32>
    %cst_128 = arith.constant 5.000000e-01 : f32
    %376 = vector.broadcast %cst_128 : f32 to vector<8x384xf32>
    %377 = arith.mulf %376, %375 : vector<8x384xf32>
    %cst_129 = arith.constant 5.000000e-01 : f32
    %378 = vector.broadcast %cst_129 : f32 to vector<8x384xf32>
    %379 = arith.addf %377, %378 : vector<8x384xf32>
    %380 = vector.extract_strided_slice %379 {offsets = [0, 0], sizes = [8, 128], strides = [1, 1]} : vector<8x384xf32> to vector<8x128xf32>
    %381 = vector.extract_strided_slice %379 {offsets = [0, 128], sizes = [8, 128], strides = [1, 1]} : vector<8x384xf32> to vector<8x128xf32>
    %382 = vector.extract_strided_slice %379 {offsets = [0, 256], sizes = [8, 128], strides = [1, 1]} : vector<8x384xf32> to vector<8x128xf32>
    %383 = vector.extract_strided_slice %371 {offsets = [0, 384], sizes = [8, 128], strides = [1, 1]} : vector<8x512xf32> to vector<8x128xf32>
    %384 = math.tanh %383 : vector<8x128xf32>
    %385 = arith.mulf %381, %365 : vector<8x128xf32>
    %386 = arith.mulf %380, %384 : vector<8x128xf32>
    %387 = arith.addf %385, %386 : vector<8x128xf32>
    %388 = math.tanh %387 : vector<8x128xf32>
    %389 = arith.mulf %382, %388 : vector<8x128xf32>
    %c0_130 = arith.constant 0 : index
    %c0_131 = arith.constant 0 : index
    %390 = vector.load %arg8[%c0_130, %c0_131] : memref<1x128xf32, #tpu.memory_space<vmem>>, vector<1x128xf32>
    %c0_132 = arith.constant 0 : index
    %c0_133 = arith.constant 0 : index
    %391 = vector.load %arg9[%c0_132, %c0_133] : memref<1x1xf32, #tpu.memory_space<vmem>>, vector<1x1xf32>
    %392 = vector.broadcast %390 : vector<1x128xf32> to vector<8x128xf32>
    %393 = arith.mulf %389, %392 : vector<8x128xf32>
    %cst_134 = arith.constant dense<0.000000e+00> : vector<8xf32>
    %394 = vector.multi_reduction <add>, %393, %cst_134 [1] : vector<8x128xf32> to vector<8xf32>
    %395 = vector.shape_cast %394 : vector<8xf32> to vector<8x1xf32>
    %396 = vector.broadcast %391 : vector<1x1xf32> to vector<8x1xf32>
    %397 = arith.addf %395, %396 : vector<8x1xf32>
    %c0_135 = arith.constant 0 : index
    %c0_136 = arith.constant 0 : index
    %398 = vector.load %arg10[%c0_135, %c0_136] : memref<8x1xf32, #tpu.memory_space<vmem>>, vector<8x1xf32>
    tpu.vector_store %arg10[%c0_135, %c0_136], %397 {strides = array<i32>} : memref<8x1xf32, #tpu.memory_space<vmem>>, vector<8x1xf32>,
    return
  }
  func.func @transform_0(%arg0: i32) -> (i32, i32, i32) {
    %c0_i32 = arith.constant 0 : i32
    %c0_i32_0 = arith.constant 0 : i32
    %c0_i32_1 = arith.constant 0 : i32
    return %c0_i32, %arg0, %c0_i32_0 : i32, i32, i32
  }
  func.func @transform_1(%arg0: i32) -> (i32, i32) {
    %c0_i32 = arith.constant 0 : i32
    %c0_i32_0 = arith.constant 0 : i32
    %c0_i32_1 = arith.constant 0 : i32
    return %c0_i32, %c0_i32_0 : i32, i32
  }
  func.func @transform_2(%arg0: i32) -> (i32, i32) {
    %c0_i32 = arith.constant 0 : i32
    %c0_i32_0 = arith.constant 0 : i32
    %c0_i32_1 = arith.constant 0 : i32
    return %c0_i32, %c0_i32_0 : i32, i32
  }
  func.func @transform_3(%arg0: i32) -> (i32, i32) {
    %c0_i32 = arith.constant 0 : i32
    %c0_i32_0 = arith.constant 0 : i32
    %c0_i32_1 = arith.constant 0 : i32
    return %c0_i32, %c0_i32_0 : i32, i32
  }
  func.func @transform_4(%arg0: i32) -> (i32, i32) {
    %c0_i32 = arith.constant 0 : i32
    %c0_i32_0 = arith.constant 0 : i32
    %c0_i32_1 = arith.constant 0 : i32
    return %c0_i32, %c0_i32_0 : i32, i32
  }
  func.func @transform_5(%arg0: i32) -> (i32, i32) {
    %c0_i32 = arith.constant 0 : i32
    %c0_i32_0 = arith.constant 0 : i32
    %c0_i32_1 = arith.constant 0 : i32
    return %c0_i32, %c0_i32_0 : i32, i32
  }
  func.func @transform_6(%arg0: i32) -> (i32, i32) {
    %c0_i32 = arith.constant 0 : i32
    %c0_i32_0 = arith.constant 0 : i32
    %c0_i32_1 = arith.constant 0 : i32
    return %c0_i32, %c0_i32_0 : i32, i32
  }
  func.func @transform_7(%arg0: i32) -> (i32, i32) {
    %c0_i32 = arith.constant 0 : i32
    %c0_i32_0 = arith.constant 0 : i32
    %c0_i32_1 = arith.constant 0 : i32
    return %c0_i32, %c0_i32_0 : i32, i32
  }
  func.func @transform_8(%arg0: i32) -> (i32, i32) {
    %c0_i32 = arith.constant 0 : i32
    %c0_i32_0 = arith.constant 0 : i32
    %c0_i32_1 = arith.constant 0 : i32
    return %c0_i32, %c0_i32_0 : i32, i32
  }
  func.func @transform_9(%arg0: i32) -> (i32, i32) {
    %c0_i32 = arith.constant 0 : i32
    %c0_i32_0 = arith.constant 0 : i32
    return %arg0, %c0_i32 : i32, i32
  }
}

</mosaic_0001>

<bundles_post_ra>
// kernel: stock_rnn_forward.1
= control target key start
LH: loop header
LB: loop body
LE: loop exit
PB: predicated region body
PF: predicated region fallthrough
CT: control target
= control target key end

     0   :  { %vm109_vm0 = vcmask 1041408   ;;  %vm96_vm1 = vcmask 31744   ;;  %vm2283_vm2 = vcmask 7168   ;;  %s4601_s1 = inlined_call_operand.vmem [shape: bf16[4,512], index: 1, kind: input, shape index: {}]   ;;  %s4602_s0 = inlined_call_operand.vmem [shape: f32[8,8,4], index: 0, kind: input, shape index: {}]   ;;  %s4603_s2 = inlined_call_operand.vmem [shape: bf16[128,512], index: 2, kind: input, shape index: {}]   ;;  %s4604_s3 = inlined_call_operand.vmem [shape: f32[1,512], index: 3, kind: input, shape index: {}]   ;;  %s4605_s4 = inlined_call_operand.vmem [shape: bf16[128,512], index: 4, kind: input, shape index: {}]   ;;  %s4606_s5 = inlined_call_operand.vmem [shape: bf16[128,512], index: 5, kind: input, shape index: {}]   ;;  %s4607_s6 = inlined_call_operand.vmem [shape: f32[1,512], index: 6, kind: input, shape index: {}]   ;;  %s4608_s7 = inlined_call_operand.vmem [shape: f32[1,128], index: 7, kind: input, shape index: {}]   ;;  %s4609_s8 = inlined_call_operand.<no memory space> [shape: f32[1,1], index: 8, kind: input, shape index: {}]   ;;  %s4610_s9 = inlined_call_operand.vmem [shape: f32[8,1], index: 9, kind: output, shape index: {}]  }
   0x1   :  { %v35_v0 = vld [vmem:[%s4601_s1] sm:$0xff]  ;;  %v70_v2 = vld [vmem:[%s4602_s0 + $0x8] sm:$0xff]  ;;  %v2735_v4 = vld [vmem:[%s4603_s2 + $0xec] sm:$0xf0] }
   0x2   :  { %91 = vst [vmem:[#allocation1] ss:$4 sm:$0xff] %v35_v0  ;;  %v69_v1 = vld [vmem:[%s4602_s0] sm:$0xff]  ;;  %v2421_v6 = vld [vmem:[%s4603_s2 + $0xf0] sm:$0xf0]  ;;  %v72_v63 = vld [vmem:[%s4602_s0 + $0x18] sm:$0xff] }
   0x3   :  { %v2419_v3 = vld [vmem:[%s4603_s2 + $0xe0] sm:$0xf]  ;;  %v2733_v5 = vld [vmem:[%s4603_s2 + $0xe4] sm:$0xf]  ;;  %v2734_v7 = vld [vmem:[%s4603_s2 + $0xec] sm:$0xf]  ;;  %v77_v22 = vpack.c.bf16 %v70_v2, %v69_v1 }
   0x4   :  { %v2429_v8 = vld [vmem:[%s4603_s2 + $0xf8] sm:$0xf0]  ;;  %v2427_v9 = vld [vmem:[%s4603_s2 + $0xe8] sm:$0xf]  ;;  %v2736_v10 = vld [vmem:[%s4603_s2 + $0xf4] sm:$0xf0]  ;;  %v3052_v11 = vor.u32 %v2735_v4, %v2419_v3  ;;  %v3066_v18 = vor.u32 %v2733_v5, %v2421_v6 }
   0x5   :  { %v2403_v12 = vld [vmem:[%s4603_s2 + $0xc0] sm:$0xf]  ;;  %v2731_v13 = vld [vmem:[%s4603_s2 + $0xcc] sm:$0xf0]  ;;  %v2729_v14 = vld [vmem:[%s4603_s2 + $0xc4] sm:$0xf]  ;;  %v3071_v25 = vor.u32 %v2734_v7, %v2429_v8  ;;  %v3075_v27 = vor.u32 %v2736_v10, %v2427_v9 }
   0x6   :  { %v2405_v15 = vld [vmem:[%s4603_s2 + $0xd0] sm:$0xf0]  ;;  %v2730_v28 = vld [vmem:[%s4603_s2 + $0xcc] sm:$0xf]  ;;  %v2413_v29 = vld [vmem:[%s4603_s2 + $0xd8] sm:$0xf0]  ;;  %v3084_v30 = vor.u32 %v2731_v13, %v2403_v12 }
   0x7   :  { %v3086_v31 = vor.u32 %v2729_v14, %v2405_v15  ;;  %v2411_v32 = vld [vmem:[%s4603_s2 + $0xc8] sm:$0xf]  ;;  %v2732_v33 = vld [vmem:[%s4603_s2 + $0xd4] sm:$0xf0]  ;;  %v2387_v34 = vld [vmem:[%s4603_s2 + $0xa0] sm:$0xf]  ;;  %v3110_v38 = vor.u32 %v2730_v28, %v2413_v29 }
   0x8   :  { %v2727_v35 = vld [vmem:[%s4603_s2 + $0xac] sm:$0xf0]  ;;  %v2725_v36 = vld [vmem:[%s4603_s2 + $0xa4] sm:$0xf]  ;;  %v2389_v37 = vld [vmem:[%s4603_s2 + $0xb0] sm:$0xf0]  ;;  %v3114_v39 = vor.u32 %v2732_v33, %v2411_v32 }
   0x9   :  { %v92_v16 = vld.sshfl [vmem:[#allocation1] sm:$0xff pattern:$0x73625140]  ;;  %v93_v17 = vld.sshfl [vmem:[#allocation1 + $0x8] sm:$0xff pattern:$0x73625140]  ;;  %v3124_v42 = vor.u32 %v2727_v35, %v2387_v34  ;;  %v3126_v43 = vor.u32 %v2725_v36, %v2389_v37 }
   0xa   :  { %v110_v19 = vsel %vm109_vm0, %v92_v16, 0  ;;  %v112_v20 = vsel %vm109_vm0, %v93_v17, 0  ;;  %v94_v21 = vld.sshfl [vmem:[#allocation1 + $0x10] sm:$0xff pattern:$0x73625140] }
   0xb   :  { %125 = vmatpush.bf16.msra.mxu0 %v110_v19  ;;  %154 = vmatpush.bf16.msra.mxu1 %v112_v20  ;;  %v114_v23 = vsel %vm109_vm0, %v94_v21, 0  ;;  %v95_v24 = vld.sshfl [vmem:[#allocation1 + $0x18] sm:$0xff pattern:$0x73625140]  ;;  %v2726_v40 = vld [vmem:[%s4603_s2 + $0xac] sm:$0xf] }
   0xc   :  { %183 = vmatpush.bf16.msra.mxu2 %v114_v23  ;;  %v116_v26 = vsel %vm109_vm0, %v95_v24, 0  ;;  %v2397_v41 = vld [vmem:[%s4603_s2 + $0xb8] sm:$0xf0]  ;;  %v2395_v44 = vld [vmem:[%s4603_s2 + $0xa8] sm:$0xf]  ;;  %v71_v62 = vld [vmem:[%s4602_s0 + $0x10] sm:$0xff] }
   0xd   :  { %212 = vmatpush.bf16.msra.mxu3 %v116_v26  ;;  %v2728_v45 = vld [vmem:[%s4603_s2 + $0xb4] sm:$0xf0]  ;;  %v2371_v46 = vld [vmem:[%s4603_s2 + $0x80] sm:$0xf]  ;;  %v2723_v47 = vld [vmem:[%s4603_s2 + $0x8c] sm:$0xf0]  ;;  %v3147_v50 = vor.u32 %v2726_v40, %v2397_v41  ;;  %v78_v9 = vpack.c.bf16 %v72_v63, %v71_v62 }
   0xe   :  { %2289 = vmatmul.msk.bf16.vlgmr.msra.gmra.mxu0 %vm96_vm1, %v77_v22  ;;  %2293 = vmatmul.msk.bf16.vlgmr.msra.gmra.mxu1 %vm96_vm1, %v77_v22  ;;  %v2721_v48 = vld [vmem:[%s4603_s2 + $0x84] sm:$0xf]  ;;  %v2373_v49 = vld [vmem:[%s4603_s2 + $0x90] sm:$0xf0]  ;;  %v3150_v51 = vor.u32 %v2728_v45, %v2395_v44  ;;  %v2722_v52 = vld [vmem:[%s4603_s2 + $0x8c] sm:$0xf]  ;;  %v3160_v54 = vor.u32 %v2723_v47, %v2371_v46 }
   0xf   :  { %430 = vmatpush.bf16.msrb.mxu0 %v3052_v11  ;;  %443 = vmatpush.bf16.msrb.mxu1 %v3066_v18  ;;  %v2381_v53 = vld [vmem:[%s4603_s2 + $0x98] sm:$0xf0]  ;;  %v3162_v55 = vor.u32 %v2721_v48, %v2373_v49  ;;  %v2379_v56 = vld [vmem:[%s4603_s2 + $0x88] sm:$0xf]  ;;  %v2724_v57 = vld [vmem:[%s4603_s2 + $0x94] sm:$0xf0] }
  0x10   :  { %2297 = vmatmul.msk.bf16.vlgmr.msra.gmra.mxu2 %vm96_vm1, %v77_v22  ;;  %2301 = vmatmul.msk.bf16.vlgmr.msra.gmra.mxu3 %vm96_vm1, %v77_v22  ;;  %v2355_v58 = vld [vmem:[%s4603_s2 + $0x60] sm:$0xf]  ;;  %v2719_v59 = vld [vmem:[%s4603_s2 + $0x6c] sm:$0xf0]  ;;  %v2717_v60 = vld [vmem:[%s4603_s2 + $0x64] sm:$0xf]  ;;  %v3189_v0 = vor.u32 %v2722_v52, %v2381_v53  ;;  %v3192_v1 = vor.u32 %v2724_v57, %v2379_v56 }
  0x11   :  { %469 = vmatpush.bf16.msrb.mxu3 %v3071_v25  ;;  %456 = vmatpush.bf16.msrb.mxu2 %v3075_v27  ;;  %v2357_v61 = vld [vmem:[%s4603_s2 + $0x70] sm:$0xf0]  ;;  %v2718_v2 = vld [vmem:[%s4603_s2 + $0x6c] sm:$0xf]  ;;  %v2365_v3 = vld [vmem:[%s4603_s2 + $0x78] sm:$0xf0]  ;;  %v3202_v4 = vor.u32 %v2719_v59, %v2355_v58 }
  0x12   :  { %v3204_v5 = vor.u32 %v2717_v60, %v2357_v61  ;;  %v2363_v6 = vld [vmem:[%s4603_s2 + $0x68] sm:$0xf]  ;;  %v2720_v7 = vld [vmem:[%s4603_s2 + $0x74] sm:$0xf0]  ;;  %v2339_v8 = vld [vmem:[%s4603_s2 + $0x40] sm:$0xf]  ;;  %v3225_v14 = vor.u32 %v2718_v2, %v2365_v3 }
  0x13   :  { %431 = vmatpush.bf16.msrb.mxu0 %v3084_v30  ;;  %444 = vmatpush.bf16.msrb.mxu1 %v3086_v31  ;;  %v2715_v10 = vld [vmem:[%s4603_s2 + $0x4c] sm:$0xf0]  ;;  %v2713_v12 = vld [vmem:[%s4603_s2 + $0x44] sm:$0xf]  ;;  %v2341_v13 = vld [vmem:[%s4603_s2 + $0x50] sm:$0xf0]  ;;  %v3228_v15 = vor.u32 %v2720_v7, %v2363_v6 }
  0x14   :  { %v2714_v16 = vld [vmem:[%s4603_s2 + $0x4c] sm:$0xf]  ;;  %v2349_v17 = vld [vmem:[%s4603_s2 + $0x58] sm:$0xf0]  ;;  %v3238_v19 = vor.u32 %v2715_v10, %v2339_v8  ;;  %v3240_v20 = vor.u32 %v2713_v12, %v2341_v13  ;;  %v2347_v21 = vld [vmem:[%s4603_s2 + $0x48] sm:$0xf] }
  0x15   :  { %470 = vmatpush.bf16.msrb.mxu3 %v3110_v38  ;;  %457 = vmatpush.bf16.msrb.mxu2 %v3114_v39  ;;  %v2716_v22 = vld [vmem:[%s4603_s2 + $0x54] sm:$0xf0]  ;;  %v3252_v23 = vor.u32 %v2714_v16, %v2349_v17  ;;  %v2323_v26 = vld [vmem:[%s4603_s2 + $0x20] sm:$0xf]  ;;  %v2711_v28 = vld [vmem:[%s4603_s2 + $0x2c] sm:$0xf0] }
  0x16   :  { %v3256_v24 = vor.u32 %v2716_v22, %v2347_v21  ;;  %v2709_v29 = vld [vmem:[%s4603_s2 + $0x24] sm:$0xf]  ;;  %v3269_v32 = vor.u32 %v2711_v28, %v2323_v26  ;;  %v2325_v33 = vld [vmem:[%s4603_s2 + $0x30] sm:$0xf0]  ;;  %v2710_v34 = vld [vmem:[%s4603_s2 + $0x2c] sm:$0xf] }
  0x17   :  { %432 = vmatpush.bf16.msrb.mxu0 %v3124_v42  ;;  %445 = vmatpush.bf16.msrb.mxu1 %v3126_v43  ;;  %v2333_v35 = vld [vmem:[%s4603_s2 + $0x38] sm:$0xf0]  ;;  %v3280_v36 = vor.u32 %v2709_v29, %v2325_v33  ;;  %v2331_v37 = vld [vmem:[%s4603_s2 + $0x28] sm:$0xf]  ;;  %v2712_v40 = vld [vmem:[%s4603_s2 + $0x34] sm:$0xf0] }
  0x18   :  { %v2307_v41 = vld [vmem:[%s4603_s2] sm:$0xf]  ;;  %v3292_v44 = vor.u32 %v2710_v34, %v2333_v35  ;;  %v2707_v45 = vld [vmem:[%s4603_s2 + $0xc] sm:$0xf0]  ;;  %v2705_v46 = vld [vmem:[%s4603_s2 + $0x4] sm:$0xf]  ;;  %v3304_v48 = vor.u32 %v2712_v40, %v2331_v37 }
  0x19   :  { %471 = vmatpush.bf16.msrb.mxu3 %v3147_v50  ;;  %458 = vmatpush.bf16.msrb.mxu2 %v3150_v51  ;;  %v2309_v47 = vld [vmem:[%s4603_s2 + $0x10] sm:$0xf0]  ;;  %v2706_v49 = vld [vmem:[%s4603_s2 + $0xc] sm:$0xf]  ;;  %v2317_v52 = vld [vmem:[%s4603_s2 + $0x18] sm:$0xf0]  ;;  %v3314_v53 = vor.u32 %v2707_v45, %v2307_v41 }
  0x1a   :  { %v3316_v56 = vor.u32 %v2705_v46, %v2309_v47  ;;  %v2315_v57 = vld [vmem:[%s4603_s2 + $0x8] sm:$0xf]  ;;  %v2708_v58 = vld [vmem:[%s4603_s2 + $0x14] sm:$0xf0]  ;;  %v73_v59 = vld [vmem:[%s4602_s0 + $0x20] sm:$0xff]  ;;  %v3331_v61 = vor.u32 %v2706_v49, %v2317_v52  ;;  %v4611_v7 = vmov 0  }
  0x1b   :  { %433 = vmatpush.bf16.msrb.mxu0 %v3160_v54  ;;  %446 = vmatpush.bf16.msrb.mxu1 %v3162_v55  ;;  %v74_v60 = vld [vmem:[%s4602_s0 + $0x28] sm:$0xff]  ;;  %v3334_v62 = vor.u32 %v2708_v58, %v2315_v57  ;;  %v75_v2 = vld [vmem:[%s4602_s0 + $0x30] sm:$0xff]  ;;  %v76_v3 = vld [vmem:[%s4602_s0 + $0x38] sm:$0xff] }
  0x1c   :  { %v79_v63 = vpack.c.bf16 %v74_v60, %v73_v59  ;;  %v80_v6 = vpack.c.bf16 %v76_v3, %v75_v2  ;;  %v68_v17 = vld [vmem:[%s4604_s3] sm:$0xf] }
  0x1d   :  { %472 = vmatpush.bf16.msrb.mxu3 %v3189_v0  ;;  %459 = vmatpush.bf16.msrb.mxu2 %v3192_v1  ;;  %v3429_v21 = vperm.slane %v68_v17, 0  ;;  %v3433_v26 = vperm.slane %v68_v17, 1  ;;  %v3443_v37 = vperm.slane %v68_v17, 2  ;;  %v3445_v40 = vperm.slane %v68_v17, 3 }
  0x1e   :  { %2290 = vmatmul.msk.bf16.gmra.mxu0 %vm96_vm1, %v78_v9  ;;  %2294 = vmatmul.msk.bf16.gmra.mxu1 %vm96_vm1, %v78_v9 }
  0x1f   :  { %434 = vmatpush.bf16.msrb.mxu0 %v3202_v4  ;;  %447 = vmatpush.bf16.msrb.mxu1 %v3204_v5 }
  0x20   :  { %2298 = vmatmul.msk.bf16.gmra.mxu2 %vm96_vm1, %v78_v9  ;;  %2302 = vmatmul.msk.bf16.gmra.mxu3 %vm96_vm1, %v78_v9 }
  0x21   :  { %473 = vmatpush.bf16.msrb.mxu3 %v3225_v14  ;;  %460 = vmatpush.bf16.msrb.mxu2 %v3228_v15 }
  0x23   :  { %435 = vmatpush.bf16.msrb.mxu0 %v3238_v19  ;;  %448 = vmatpush.bf16.msrb.mxu1 %v3240_v20 }
  0x25   :  { %474 = vmatpush.bf16.msrb.mxu3 %v3252_v23  ;;  %461 = vmatpush.bf16.msrb.mxu2 %v3256_v24 }
  0x27   :  { %436 = vmatpush.bf16.msrb.mxu0 %v3269_v32  ;;  %449 = vmatpush.bf16.msrb.mxu1 %v3280_v36 }
  0x29   :  { %475 = vmatpush.bf16.msrb.mxu3 %v3292_v44  ;;  %462 = vmatpush.bf16.msrb.mxu2 %v3304_v48 }
  0x2b   :  { %437 = vmatpush.bf16.msrb.mxu0 %v3314_v53  ;;  %450 = vmatpush.bf16.msrb.mxu1 %v3316_v56 }
  0x2d   :  { %476 = vmatpush.bf16.msrb.mxu3 %v3331_v61  ;;  %463 = vmatpush.bf16.msrb.mxu2 %v3334_v62 }
  0x2e   :  { %2291 = vmatmul.msk.bf16.gmra.mxu0 %vm96_vm1, %v79_v63  ;;  %2295 = vmatmul.msk.bf16.gmra.mxu1 %vm96_vm1, %v79_v63 }
  0x2f   :  { %510 = vmatpush.bf16.msra.mxu0 %v3052_v11  ;;  %523 = vmatpush.bf16.msra.mxu1 %v3066_v18 }
  0x30   :  { %2299 = vmatmul.msk.bf16.gmra.mxu2 %vm96_vm1, %v79_v63  ;;  %2303 = vmatmul.msk.bf16.gmra.mxu3 %vm96_vm1, %v79_v63 }
  0x31   :  { %549 = vmatpush.bf16.msra.mxu3 %v3071_v25  ;;  %536 = vmatpush.bf16.msra.mxu2 %v3075_v27 }
  0x33   :  { %511 = vmatpush.bf16.msra.mxu0 %v3084_v30  ;;  %524 = vmatpush.bf16.msra.mxu1 %v3086_v31 }
  0x35   :  { %537 = vmatpush.bf16.msra.mxu2 %v3114_v39  ;;  %550 = vmatpush.bf16.msra.mxu3 %v3110_v38 }
  0x37   :  { %512 = vmatpush.bf16.msra.mxu0 %v3124_v42  ;;  %525 = vmatpush.bf16.msra.mxu1 %v3126_v43 }
  0x39   :  { %538 = vmatpush.bf16.msra.mxu2 %v3150_v51  ;;  %551 = vmatpush.bf16.msra.mxu3 %v3147_v50 }
  0x3b   :  { %513 = vmatpush.bf16.msra.mxu0 %v3160_v54  ;;  %526 = vmatpush.bf16.msra.mxu1 %v3162_v55 }
  0x3d   :  { %539 = vmatpush.bf16.msra.mxu2 %v3192_v1  ;;  %552 = vmatpush.bf16.msra.mxu3 %v3189_v0 }
  0x3e   :  { %2292 = vmatmul.msk.bf16.gmra.mxu0 %vm96_vm1, %v80_v6  ;;  %2296 = vmatmul.msk.bf16.gmra.mxu1 %vm96_vm1, %v80_v6 }
  0x3f   :  { %514 = vmatpush.bf16.msra.mxu0 %v3202_v4  ;;  %527 = vmatpush.bf16.msra.mxu1 %v3204_v5 }
  0x40   :  { %2300 = vmatmul.msk.bf16.gmra.mxu2 %vm96_vm1, %v80_v6  ;;  %2304 = vmatmul.msk.bf16.gmra.mxu3 %vm96_vm1, %v80_v6 }
  0x41   :  { %540 = vmatpush.bf16.msra.mxu2 %v3228_v15  ;;  %553 = vmatpush.bf16.msra.mxu3 %v3225_v14 }
  0x43   :  { %515 = vmatpush.bf16.msra.mxu0 %v3238_v19  ;;  %528 = vmatpush.bf16.msra.mxu1 %v3240_v20 }
  0x45   :  { %541 = vmatpush.bf16.msra.mxu2 %v3256_v24  ;;  %554 = vmatpush.bf16.msra.mxu3 %v3252_v23 }
  0x47   :  { %516 = vmatpush.bf16.msra.mxu0 %v3269_v32  ;;  %529 = vmatpush.bf16.msra.mxu1 %v3280_v36 }
  0x49   :  { %542 = vmatpush.bf16.msra.mxu2 %v3304_v48  ;;  %555 = vmatpush.bf16.msra.mxu3 %v3292_v44 }
  0x4b   :  { %517 = vmatpush.bf16.msra.mxu0 %v3314_v53  ;;  %530 = vmatpush.bf16.msra.mxu1 %v3316_v56 }
  0x4d   :  { %543 = vmatpush.bf16.msra.mxu2 %v3334_v62  ;;  %556 = vmatpush.bf16.msra.mxu3 %v3331_v61 }
  0x4e   :  { %438 = vmatmul.bf16.vlgmr.msrb.gmra.mxu0 %v4611_v7  ;;  %451 = vmatmul.bf16.vlgmr.msrb.gmra.mxu1 %v4611_v7 }
  0x4f   :  { %590 = vmatpush.bf16.msrb.mxu0 %v3052_v11  ;;  %603 = vmatpush.bf16.msrb.mxu1 %v3066_v18 }
  0x50   :  { %464 = vmatmul.bf16.vlgmr.msrb.gmra.mxu2 %v4611_v7  ;;  %477 = vmatmul.bf16.vlgmr.msrb.gmra.mxu3 %v4611_v7 }
  0x51   :  { %616 = vmatpush.bf16.msrb.mxu2 %v3075_v27  ;;  %629 = vmatpush.bf16.msrb.mxu3 %v3071_v25 }
  0x53   :  { %591 = vmatpush.bf16.msrb.mxu0 %v3084_v30  ;;  %604 = vmatpush.bf16.msrb.mxu1 %v3086_v31 }
  0x55   :  { %617 = vmatpush.bf16.msrb.mxu2 %v3114_v39  ;;  %630 = vmatpush.bf16.msrb.mxu3 %v3110_v38 }
  0x57   :  { %592 = vmatpush.bf16.msrb.mxu0 %v3124_v42  ;;  %605 = vmatpush.bf16.msrb.mxu1 %v3126_v43 }
  0x59   :  { %618 = vmatpush.bf16.msrb.mxu2 %v3150_v51  ;;  %631 = vmatpush.bf16.msrb.mxu3 %v3147_v50 }
  0x5b   :  { %593 = vmatpush.bf16.msrb.mxu0 %v3160_v54  ;;  %606 = vmatpush.bf16.msrb.mxu1 %v3162_v55 }
  0x5d   :  { %619 = vmatpush.bf16.msrb.mxu2 %v3192_v1  ;;  %632 = vmatpush.bf16.msrb.mxu3 %v3189_v0 }
  0x5f   :  { %594 = vmatpush.bf16.msrb.mxu0 %v3202_v4  ;;  %607 = vmatpush.bf16.msrb.mxu1 %v3204_v5 }
  0x61   :  { %620 = vmatpush.bf16.msrb.mxu2 %v3228_v15  ;;  %633 = vmatpush.bf16.msrb.mxu3 %v3225_v14 }
  0x63   :  { %595 = vmatpush.bf16.msrb.mxu0 %v3238_v19  ;;  %608 = vmatpush.bf16.msrb.mxu1 %v3240_v20 }
  0x65   :  { %621 = vmatpush.bf16.msrb.mxu2 %v3256_v24  ;;  %634 = vmatpush.bf16.msrb.mxu3 %v3252_v23 }
  0x67   :  { %596 = vmatpush.bf16.msrb.mxu0 %v3269_v32  ;;  %609 = vmatpush.bf16.msrb.mxu1 %v3280_v36 }
  0x69   :  { %622 = vmatpush.bf16.msrb.mxu2 %v3304_v48  ;;  %635 = vmatpush.bf16.msrb.mxu3 %v3292_v44 }
  0x6b   :  { %597 = vmatpush.bf16.msrb.mxu0 %v3314_v53  ;;  %610 = vmatpush.bf16.msrb.mxu1 %v3316_v56 }
  0x6d   :  { %623 = vmatpush.bf16.msrb.mxu2 %v3334_v62  ;;  %636 = vmatpush.bf16.msrb.mxu3 %v3331_v61 }
  0x8b   :  { %v127_v8 = vpop.f32.mrf.mxu0  ;;  %v156_v9 = vpop.f32.mrf.mxu1 }
  0x93   :  { %v185_v10 = vpop.f32.mrf.mxu2  ;;  %v214_v12 = vpop.f32.mrf.mxu3 }
  0x94   :  { %v3422_v13 = vpop.f32.mrf.mxu0  ;;  %v3424_v16 = vpop.f32.mrf.mxu1 }
  0x9b   :  { %v3431_v22 = vpop.f32.mrf.mxu2  ;;  %v3435_v28 = vpop.f32.mrf.mxu3 }
  0x9c   :  { %v132_v29 = vpop.f32.mrf.mxu0  ;;  %v161_v34 = vpop.f32.mrf.mxu1 }
  0x9d   :  { %v3438_v33 = vadd.f32 %v132_v29, %v3429_v21  ;;  %v3441_v35 = vadd.f32 %v161_v34, %v3433_v26 }
  0xa3   :  { %v190_v41 = vpop.f32.mrf.mxu2  ;;  %v219_v46 = vpop.f32.mrf.mxu3 }
  0xa4   :  { %v3448_v45 = vadd.f32 %v190_v41, %v3443_v37  ;;  %v3450_v47 = vpop.f32.mrf.mxu0  ;;  %v3453_v49 = vadd.f32 %v219_v46, %v3445_v40  ;;  %v3455_v52 = vpop.f32.mrf.mxu1 }
  0xa5   :  { %4613 = vst [vmem:[#allocation5_spill] sm:$0xff] %v3450_v47 }
  0xa6   :  { %4614 = vst [vmem:[#allocation6_spill] sm:$0xff] %v3453_v49 }
  0xa7   :  { %4615 = vst [vmem:[#allocation7_spill] sm:$0xff] %v3455_v52 }
  0xab   :  { %v3457_v57 = vpop.f32.mrf.mxu2  ;;  %v3459_v58 = vpop.f32.mrf.mxu3 }
  0xac   :  { %4616 = vst [vmem:[#allocation8_spill] sm:$0xff] %v3457_v57  ;;  %v137_v59 = vpop.f32.mrf.mxu0  ;;  %v166_v63 = vpop.f32.mrf.mxu1 }
  0xad   :  { %4617 = vst [vmem:[#allocation9_spill] sm:$0xff] %v3459_v58  ;;  %v3462_v60 = vadd.f32 %v137_v59, %v3429_v21  ;;  %v3465_v2 = vadd.f32 %v166_v63, %v3433_v26 }
  0xaf   :  { %4618 = vst [vmem:[#allocation10_spill] sm:$0xff] %v3462_v60 }
  0xb0   :  { %4619 = vst [vmem:[#allocation11_spill] sm:$0xff] %v3465_v2 }
  0xb3   :  { %v195_v3 = vpop.f32.mrf.mxu2  ;;  %v224_v17 = vpop.f32.mrf.mxu3 }
  0xb4   :  { %v3468_v6 = vadd.f32 %v195_v3, %v3443_v37  ;;  %v3470_v29 = vpop.f32.mrf.mxu0  ;;  %v3473_v34 = vadd.f32 %v224_v17, %v3445_v40  ;;  %v3475_v41 = vpop.f32.mrf.mxu1 }
  0xb5   :  { %4621 = vst [vmem:[#allocation13_spill] sm:$0xff] %v3470_v29 }
  0xb6   :  { %4620 = vst [vmem:[#allocation12_spill] sm:$0xff] %v3468_v6 }
  0xb7   :  { %4622 = vst [vmem:[#allocation14_spill] sm:$0xff] %v3473_v34 }
  0xb8   :  { %4623 = vst [vmem:[#allocation15_spill] sm:$0xff] %v3475_v41 }
  0xbb   :  { %v3477_v46 = vpop.f32.mrf.mxu2  ;;  %v3479_v59 = vpop.f32.mrf.mxu3 }
  0xbc   :  { %4624 = vst [vmem:[#allocation16_spill] sm:$0xff] %v3477_v46  ;;  %v142_v7 = vpop.f32.mrf.mxu0  ;;  %v171_v2 = vpop.f32.mrf.mxu1 }
  0xbd   :  { %4625 = vst [vmem:[#allocation17_spill] sm:$0xff] %v3479_v59  ;;  %v3482_v63 = vadd.f32 %v142_v7, %v3429_v21  ;;  %v3485_v3 = vadd.f32 %v171_v2, %v3433_v26  ;;  %v128_v59 = vadd.f32 %v127_v8, %v3429_v21 }
  0xbf   :  { %4626 = vst [vmem:[#allocation18_spill] sm:$0xff] %v3482_v63  ;;  %v157_v63 = vadd.f32 %v156_v9, %v3433_v26 }
  0xc0   :  { %4627 = vst [vmem:[#allocation19_spill] sm:$0xff] %v3485_v3 }
  0xc3   :  { %v200_v6 = vpop.f32.mrf.mxu2  ;;  %v229_v17 = vpop.f32.mrf.mxu3 }
  0xc4   :  { %v3488_v29 = vadd.f32 %v200_v6, %v3443_v37  ;;  %v3490_v34 = vpop.f32.mrf.mxu0  ;;  %v3493_v41 = vadd.f32 %v229_v17, %v3445_v40  ;;  %v3495_v46 = vpop.f32.mrf.mxu1  ;;  %v186_v17 = vadd.f32 %v185_v10, %v3443_v37 }
  0xc5   :  { %4629 = vst [vmem:[#allocation21_spill] sm:$0xff] %v3490_v34 }
  0xc6   :  { %4628 = vst [vmem:[#allocation20_spill] sm:$0xff] %v3488_v29 }
  0xc7   :  { %4630 = vst [vmem:[#allocation22_spill] sm:$0xff] %v3493_v41 }
  0xc8   :  { %4631 = vst [vmem:[#allocation23_spill] sm:$0xff] %v3495_v46  ;;  %v215_v46 = vadd.f32 %v214_v12, %v3445_v40 }
  0xcb   :  { %v3498_v7 = vpop.f32.mrf.mxu2  ;;  %v3501_v2 = vpop.f32.mrf.mxu3 }
  0xcc   :  { %4632 = vst [vmem:[#allocation24_spill] sm:$0xff] %v3498_v7  ;;  %v439_v3 = vpop.f32.mrf.mxu0  ;;  %v452_v6 = vpop.f32.mrf.mxu1 }
  0xcd   :  { %4633 = vst [vmem:[#allocation25_spill] sm:$0xff] %v3501_v2  ;;  %v482_v60 = vadd.f32 %v439_v3, %v128_v59  ;;  %v483_v29 = vadd.f32 %v452_v6, %v157_v63 }
  0xcf   :  { %v486_v58 = vmul.f32 0.5, %v482_v60  ;;  %v487_v57 = vmul.f32 0.5, %v483_v29 }
  0xd1   :  { %2808 = vtanh.f32 %v486_v58 }
  0xd2   :  { %2810 = vtanh.f32 %v487_v57 }
  0xd3   :  { %v465_v34 = vpop.f32.mrf.mxu2  ;;  %v478_v41 = vpop.f32.mrf.mxu3 }
  0xd4   :  { %v484_v8 = vadd.f32 %v465_v34, %v186_v17  ;;  %v441_v7 = vpop.f32.mrf.mxu0  ;;  %v485_v52 = vadd.f32 %v478_v41, %v215_v46  ;;  %v454_v9 = vpop.f32.mrf.mxu1 }
  0xd6   :  { %v488_v47 = vmul.f32 0.5, %v484_v8  ;;  %2812 = vtanh.f32 %v485_v52 }
  0xd7   :  { %v2809_v2 = vpop.eup %2808 }
  0xd8   :  { %v2811_v59 = vpop.eup %2810  ;;  %v492_v3 = vmul.f32 0.5, %v2809_v2  ;;  %2814 = vtanh.f32 %v488_v47  ;;  %v130_v47 = vadd.f32 %v3422_v13, %v3429_v21 }
  0xd9   :  { %v493_v63 = vmul.f32 0.5, %v2811_v59 }
  0xda   :  { %v495_v60 = vadd.f32 0.5, %v492_v3 }
  0xdb   :  { %v496_v58 = vadd.f32 0.5, %v493_v63  ;;  %v467_v29 = vpop.f32.mrf.mxu2  ;;  %v480_v10 = vpop.f32.mrf.mxu3 }
  0xdc   :  { %v2813_v57 = vpop.eup %2812 }
  0xdd   :  { %v499_v6 = vmul.f32 0.0, %v496_v58  ;;  %v500_v12 = vmul.f32 %v2813_v57, %v495_v60  ;;  %v188_v60 = vadd.f32 %v3431_v22, %v3443_v37  ;;  %v217_v58 = vadd.f32 %v3435_v28, %v3445_v40 }
  0xde   :  { %v2815_v49 = vpop.eup %2814 }
  0xdf   :  { %v3505_v34 = vadd.f32 %v500_v12, %v499_v6  ;;  %v494_v41 = vmul.f32 0.5, %v2815_v49  ;;  %v159_v49 = vadd.f32 %v3424_v16, %v3433_v26 }
  0xe1   :  { %2816 = vtanh.f32 %v3505_v34  ;;  %v497_v46 = vadd.f32 0.5, %v494_v41 }
  0xe7   :  { %v2817_v7 = vpop.eup %2816 }
  0xe8   :  { %v503_v52 = vmul.f32 %v2817_v7, %v497_v46 }
  0xea   :  { %v504_v17 = vpack.c.bf16 %v503_v52, %v503_v52 }
  0xec   :  { %505 = vst [vmem:[#allocation3] sm:$0xf] %v504_v17  ;;  %518 = vmatmul.bf16.vlgmr.msra.gmra.mxu0 %v504_v17  ;;  %531 = vmatmul.bf16.vlgmr.msra.gmra.mxu1 %v504_v17 }
  0xed   :  { %544 = vmatmul.bf16.vlgmr.msra.gmra.mxu2 %v504_v17  ;;  %557 = vmatmul.bf16.vlgmr.msra.gmra.mxu3 %v504_v17 }
  0xee   :  { %670 = vmatpush.bf16.msra.mxu0 %v3052_v11  ;;  %683 = vmatpush.bf16.msra.mxu1 %v3066_v18 }
  0xef   :  { %696 = vmatpush.bf16.msra.mxu2 %v3075_v27  ;;  %709 = vmatpush.bf16.msra.mxu3 %v3071_v25 }
  0xf2   :  { %671 = vmatpush.bf16.msra.mxu0 %v3084_v30  ;;  %684 = vmatpush.bf16.msra.mxu1 %v3086_v31 }
  0xf3   :  { %697 = vmatpush.bf16.msra.mxu2 %v3114_v39  ;;  %710 = vmatpush.bf16.msra.mxu3 %v3110_v38 }
  0xf6   :  { %672 = vmatpush.bf16.msra.mxu0 %v3124_v42  ;;  %685 = vmatpush.bf16.msra.mxu1 %v3126_v43 }
  0xf7   :  { %698 = vmatpush.bf16.msra.mxu2 %v3150_v51  ;;  %711 = vmatpush.bf16.msra.mxu3 %v3147_v50 }
  0xfa   :  { %673 = vmatpush.bf16.msra.mxu0 %v3160_v54  ;;  %686 = vmatpush.bf16.msra.mxu1 %v3162_v55 }
  0xfb   :  { %699 = vmatpush.bf16.msra.mxu2 %v3192_v1  ;;  %712 = vmatpush.bf16.msra.mxu3 %v3189_v0 }
  0xfe   :  { %674 = vmatpush.bf16.msra.mxu0 %v3202_v4  ;;  %687 = vmatpush.bf16.msra.mxu1 %v3204_v5 }
  0xff   :  { %700 = vmatpush.bf16.msra.mxu2 %v3228_v15  ;;  %713 = vmatpush.bf16.msra.mxu3 %v3225_v14 }
 0x102   :  { %675 = vmatpush.bf16.msra.mxu0 %v3238_v19  ;;  %688 = vmatpush.bf16.msra.mxu1 %v3240_v20 }
 0x103   :  { %701 = vmatpush.bf16.msra.mxu2 %v3256_v24  ;;  %714 = vmatpush.bf16.msra.mxu3 %v3252_v23 }
 0x106   :  { %676 = vmatpush.bf16.msra.mxu0 %v3269_v32  ;;  %689 = vmatpush.bf16.msra.mxu1 %v3280_v36 }
 0x107   :  { %702 = vmatpush.bf16.msra.mxu2 %v3304_v48  ;;  %715 = vmatpush.bf16.msra.mxu3 %v3292_v44 }
 0x10a   :  { %677 = vmatpush.bf16.msra.mxu0 %v3314_v53  ;;  %690 = vmatpush.bf16.msra.mxu1 %v3316_v56 }
 0x10b   :  { %703 = vmatpush.bf16.msra.mxu2 %v3334_v62  ;;  %716 = vmatpush.bf16.msra.mxu3 %v3331_v61 }
 0x169   :  { %v519_v2 = vpop.f32.mrf.mxu0  ;;  %v532_v8 = vpop.f32.mrf.mxu1 }
 0x16a   :  { %v562_v9 = vadd.f32 %v519_v2, %v130_v47  ;;  %v563_v59 = vadd.f32 %v532_v8, %v159_v49 }
 0x16c   :  { %v566_v3 = vmul.f32 0.5, %v562_v9  ;;  %v567_v63 = vmul.f32 0.5, %v563_v59 }
 0x16e   :  { %2818 = vtanh.f32 %v566_v3 }
 0x16f   :  { %2820 = vtanh.f32 %v567_v63 }
 0x170   :  { %v545_v29 = vpop.f32.mrf.mxu2  ;;  %v558_v10 = vpop.f32.mrf.mxu3 }
 0x171   :  { %v564_v13 = vadd.f32 %v545_v29, %v188_v60  ;;  %v565_v57 = vadd.f32 %v558_v10, %v217_v58  ;;  %v521_v6 = vpop.f32.mrf.mxu0  ;;  %v534_v16 = vpop.f32.mrf.mxu1 }
 0x173   :  { %v568_v12 = vmul.f32 0.5, %v564_v13  ;;  %2822 = vtanh.f32 %v565_v57 }
 0x174   :  { %v2819_v41 = vpop.eup %2818 }
 0x175   :  { %v2821_v46 = vpop.eup %2820  ;;  %v572_v7 = vmul.f32 0.5, %v2819_v41  ;;  %2824 = vtanh.f32 %v568_v12 }
 0x176   :  { %v573_v52 = vmul.f32 0.5, %v2821_v46 }
 0x177   :  { %v575_v17 = vadd.f32 0.5, %v572_v7  ;;  %v4634_v7 = vld [vmem:[#allocation6_spill] sm:$0xff] }
 0x178   :  { %v576_v47 = vadd.f32 0.5, %v573_v52  ;;  %v547_v22 = vpop.f32.mrf.mxu2  ;;  %v560_v49 = vpop.f32.mrf.mxu3 }
 0x179   :  { %v2823_v2 = vpop.eup %2822 }
 0x17a   :  { %v579_v28 = vmul.f32 %v576_v47, %v3505_v34  ;;  %v580_v8 = vmul.f32 %v2823_v2, %v575_v17 }
 0x17b   :  { %v2825_v9 = vpop.eup %2824 }
 0x17c   :  { %v3549_v59 = vadd.f32 %v580_v8, %v579_v28  ;;  %v574_v3 = vmul.f32 0.5, %v2825_v9 }
 0x17e   :  { %2826 = vtanh.f32 %v3549_v59  ;;  %v577_v63 = vadd.f32 0.5, %v574_v3 }
 0x184   :  { %v2827_v60 = vpop.eup %2826 }
 0x185   :  { %v583_v58 = vmul.f32 %v2827_v60, %v577_v63 }
 0x187   :  { %v584_v29 = vpack.c.bf16 %v583_v58, %v583_v58 }
 0x189   :  { %585 = vst [vmem:[#allocation3 + $0x4] sm:$0xf] %v584_v29  ;;  %598 = vmatmul.bf16.vlgmr.msrb.gmra.mxu0 %v584_v29  ;;  %611 = vmatmul.bf16.vlgmr.msrb.gmra.mxu1 %v584_v29 }
 0x18a   :  { %624 = vmatmul.bf16.vlgmr.msrb.gmra.mxu2 %v584_v29  ;;  %637 = vmatmul.bf16.vlgmr.msrb.gmra.mxu3 %v584_v29 }
 0x18b   :  { %750 = vmatpush.bf16.msrb.mxu0 %v3052_v11  ;;  %763 = vmatpush.bf16.msrb.mxu1 %v3066_v18 }
 0x18c   :  { %776 = vmatpush.bf16.msrb.mxu2 %v3075_v27  ;;  %789 = vmatpush.bf16.msrb.mxu3 %v3071_v25 }
 0x18f   :  { %751 = vmatpush.bf16.msrb.mxu0 %v3084_v30  ;;  %764 = vmatpush.bf16.msrb.mxu1 %v3086_v31 }
 0x190   :  { %777 = vmatpush.bf16.msrb.mxu2 %v3114_v39  ;;  %790 = vmatpush.bf16.msrb.mxu3 %v3110_v38 }
 0x193   :  { %752 = vmatpush.bf16.msrb.mxu0 %v3124_v42  ;;  %765 = vmatpush.bf16.msrb.mxu1 %v3126_v43 }
 0x194   :  { %778 = vmatpush.bf16.msrb.mxu2 %v3150_v51  ;;  %791 = vmatpush.bf16.msrb.mxu3 %v3147_v50 }
 0x197   :  { %753 = vmatpush.bf16.msrb.mxu0 %v3160_v54  ;;  %766 = vmatpush.bf16.msrb.mxu1 %v3162_v55 }
 0x198   :  { %779 = vmatpush.bf16.msrb.mxu2 %v3192_v1  ;;  %792 = vmatpush.bf16.msrb.mxu3 %v3189_v0 }
 0x19b   :  { %754 = vmatpush.bf16.msrb.mxu0 %v3202_v4  ;;  %767 = vmatpush.bf16.msrb.mxu1 %v3204_v5 }
 0x19c   :  { %780 = vmatpush.bf16.msrb.mxu2 %v3228_v15  ;;  %793 = vmatpush.bf16.msrb.mxu3 %v3225_v14 }
 0x19f   :  { %755 = vmatpush.bf16.msrb.mxu0 %v3238_v19  ;;  %768 = vmatpush.bf16.msrb.mxu1 %v3240_v20 }
 0x1a0   :  { %781 = vmatpush.bf16.msrb.mxu2 %v3256_v24  ;;  %794 = vmatpush.bf16.msrb.mxu3 %v3252_v23 }
 0x1a3   :  { %756 = vmatpush.bf16.msrb.mxu0 %v3269_v32  ;;  %769 = vmatpush.bf16.msrb.mxu1 %v3280_v36 }
 0x1a4   :  { %782 = vmatpush.bf16.msrb.mxu2 %v3304_v48  ;;  %795 = vmatpush.bf16.msrb.mxu3 %v3292_v44 }
 0x1a7   :  { %757 = vmatpush.bf16.msrb.mxu0 %v3314_v53  ;;  %770 = vmatpush.bf16.msrb.mxu1 %v3316_v56 }
 0x1a8   :  { %783 = vmatpush.bf16.msrb.mxu2 %v3334_v62  ;;  %796 = vmatpush.bf16.msrb.mxu3 %v3331_v61 }
 0x206   :  { %v599_v34 = vpop.f32.mrf.mxu0  ;;  %v612_v10 = vpop.f32.mrf.mxu1 }
 0x207   :  { %v642_v13 = vadd.f32 %v599_v34, %v3438_v33  ;;  %v643_v57 = vadd.f32 %v612_v10, %v3441_v35 }
 0x209   :  { %v646_v6 = vmul.f32 0.5, %v642_v13  ;;  %v647_v16 = vmul.f32 0.5, %v643_v57 }
 0x20b   :  { %2828 = vtanh.f32 %v646_v6 }
 0x20c   :  { %2830 = vtanh.f32 %v647_v16 }
 0x20d   :  { %v625_v12 = vpop.f32.mrf.mxu2  ;;  %v638_v41 = vpop.f32.mrf.mxu3 }
 0x20e   :  { %v644_v46 = vadd.f32 %v625_v12, %v3448_v45  ;;  %v645_v52 = vadd.f32 %v638_v41, %v4634_v7  ;;  %v601_v17 = vpop.f32.mrf.mxu0  ;;  %v614_v47 = vpop.f32.mrf.mxu1  ;;  %v4636_v12 = vld [vmem:[#allocation7_spill] sm:$0xff] }
 0x20f   :  { %v164_v41 = vadd.f32 %v4636_v12, %v3433_v26 }
 0x210   :  { %v648_v22 = vmul.f32 0.5, %v644_v46  ;;  %2832 = vtanh.f32 %v645_v52 }
 0x211   :  { %v2829_v49 = vpop.eup %2828 }
 0x212   :  { %v2831_v2 = vpop.eup %2830  ;;  %v652_v28 = vmul.f32 0.5, %v2829_v49  ;;  %2834 = vtanh.f32 %v648_v22  ;;  %v4637_v49 = vld [vmem:[#allocation8_spill] sm:$0xff] }
 0x213   :  { %v653_v33 = vmul.f32 0.5, %v2831_v2  ;;  %v193_v2 = vadd.f32 %v4637_v49, %v3443_v37 }
 0x214   :  { %v655_v35 = vadd.f32 0.5, %v652_v28  ;;  %v4638_v28 = vld [vmem:[#allocation9_spill] sm:$0xff] }
 0x215   :  { %v656_v8 = vadd.f32 0.5, %v653_v33  ;;  %v627_v9 = vpop.f32.mrf.mxu2  ;;  %v640_v3 = vpop.f32.mrf.mxu3  ;;  %v222_v33 = vadd.f32 %v4638_v28, %v3445_v40 }
 0x216   :  { %v2833_v63 = vpop.eup %2832 }
 0x217   :  { %v659_v60 = vmul.f32 %v656_v8, %v3549_v59  ;;  %v660_v58 = vmul.f32 %v2833_v63, %v655_v35  ;;  %v4635_v59 = vld [vmem:[#allocation5_spill] sm:$0xff] }
 0x218   :  { %v2835_v45 = vpop.eup %2834  ;;  %v135_v16 = vadd.f32 %v4635_v59, %v3429_v21 }
 0x219   :  { %v3589_v29 = vadd.f32 %v660_v58, %v659_v60  ;;  %v654_v34 = vmul.f32 0.5, %v2835_v45 }
 0x21b   :  { %2836 = vtanh.f32 %v3589_v29  ;;  %v657_v10 = vadd.f32 0.5, %v654_v34 }
 0x221   :  { %v2837_v13 = vpop.eup %2836 }
 0x222   :  { %v663_v57 = vmul.f32 %v2837_v13, %v657_v10 }
 0x224   :  { %v664_v6 = vpack.c.bf16 %v663_v57, %v663_v57 }
 0x226   :  { %665 = vst [vmem:[#allocation3 + $0x8] sm:$0xf] %v664_v6  ;;  %678 = vmatmul.bf16.vlgmr.msra.gmra.mxu0 %v664_v6  ;;  %691 = vmatmul.bf16.vlgmr.msra.gmra.mxu1 %v664_v6 }
 0x227   :  { %704 = vmatmul.bf16.vlgmr.msra.gmra.mxu2 %v664_v6  ;;  %717 = vmatmul.bf16.vlgmr.msra.gmra.mxu3 %v664_v6 }
 0x228   :  { %830 = vmatpush.bf16.msra.mxu0 %v3052_v11  ;;  %843 = vmatpush.bf16.msra.mxu1 %v3066_v18 }
 0x229   :  { %856 = vmatpush.bf16.msra.mxu2 %v3075_v27  ;;  %869 = vmatpush.bf16.msra.mxu3 %v3071_v25 }
 0x22c   :  { %831 = vmatpush.bf16.msra.mxu0 %v3084_v30  ;;  %844 = vmatpush.bf16.msra.mxu1 %v3086_v31 }
 0x22d   :  { %857 = vmatpush.bf16.msra.mxu2 %v3114_v39  ;;  %870 = vmatpush.bf16.msra.mxu3 %v3110_v38 }
 0x230   :  { %832 = vmatpush.bf16.msra.mxu0 %v3124_v42  ;;  %845 = vmatpush.bf16.msra.mxu1 %v3126_v43 }
 0x231   :  { %858 = vmatpush.bf16.msra.mxu2 %v3150_v51  ;;  %871 = vmatpush.bf16.msra.mxu3 %v3147_v50 }
 0x234   :  { %833 = vmatpush.bf16.msra.mxu0 %v3160_v54  ;;  %846 = vmatpush.bf16.msra.mxu1 %v3162_v55 }
 0x235   :  { %859 = vmatpush.bf16.msra.mxu2 %v3192_v1  ;;  %872 = vmatpush.bf16.msra.mxu3 %v3189_v0 }
 0x238   :  { %834 = vmatpush.bf16.msra.mxu0 %v3202_v4  ;;  %847 = vmatpush.bf16.msra.mxu1 %v3204_v5 }
 0x239   :  { %860 = vmatpush.bf16.msra.mxu2 %v3228_v15  ;;  %873 = vmatpush.bf16.msra.mxu3 %v3225_v14 }
 0x23c   :  { %835 = vmatpush.bf16.msra.mxu0 %v3238_v19  ;;  %848 = vmatpush.bf16.msra.mxu1 %v3240_v20 }
 0x23d   :  { %861 = vmatpush.bf16.msra.mxu2 %v3256_v24  ;;  %874 = vmatpush.bf16.msra.mxu3 %v3252_v23 }
 0x240   :  { %836 = vmatpush.bf16.msra.mxu0 %v3269_v32  ;;  %849 = vmatpush.bf16.msra.mxu1 %v3280_v36 }
 0x241   :  { %862 = vmatpush.bf16.msra.mxu2 %v3304_v48  ;;  %875 = vmatpush.bf16.msra.mxu3 %v3292_v44 }
 0x244   :  { %837 = vmatpush.bf16.msra.mxu0 %v3314_v53  ;;  %850 = vmatpush.bf16.msra.mxu1 %v3316_v56 }
 0x245   :  { %863 = vmatpush.bf16.msra.mxu2 %v3334_v62  ;;  %876 = vmatpush.bf16.msra.mxu3 %v3331_v61 }
 0x2a3   :  { %v679_v46 = vpop.f32.mrf.mxu0  ;;  %v692_v7 = vpop.f32.mrf.mxu1 }
 0x2a4   :  { %v722_v52 = vadd.f32 %v679_v46, %v135_v16  ;;  %v723_v17 = vadd.f32 %v692_v7, %v164_v41 }
 0x2a6   :  { %v726_v47 = vmul.f32 0.5, %v722_v52  ;;  %v727_v22 = vmul.f32 0.5, %v723_v17 }
 0x2a8   :  { %2838 = vtanh.f32 %v726_v47 }
 0x2a9   :  { %2840 = vtanh.f32 %v727_v22 }
 0x2aa   :  { %v705_v35 = vpop.f32.mrf.mxu2  ;;  %v718_v8 = vpop.f32.mrf.mxu3 }
 0x2ab   :  { %v724_v9 = vadd.f32 %v705_v35, %v193_v2  ;;  %v725_v3 = vadd.f32 %v718_v8, %v222_v33  ;;  %v681_v63 = vpop.f32.mrf.mxu0  ;;  %v694_v60 = vpop.f32.mrf.mxu1  ;;  %v4639_v33 = vld [vmem:[#allocation10_spill] sm:$0xff]  ;;  %v4640_v8 = vld [vmem:[#allocation11_spill] sm:$0xff] }
 0x2ad   :  { %v728_v58 = vmul.f32 0.5, %v724_v9  ;;  %2842 = vtanh.f32 %v725_v3 }
 0x2ae   :  { %v2839_v45 = vpop.eup %2838 }
 0x2af   :  { %v2841_v34 = vpop.eup %2840  ;;  %v732_v10 = vmul.f32 0.5, %v2839_v45  ;;  %2844 = vtanh.f32 %v728_v58  ;;  %v4641_v45 = vld [vmem:[#allocation12_spill] sm:$0xff] }
 0x2b0   :  { %v733_v13 = vmul.f32 0.5, %v2841_v34 }
 0x2b1   :  { %v735_v57 = vadd.f32 0.5, %v732_v10  ;;  %v4642_v10 = vld [vmem:[#allocation14_spill] sm:$0xff] }
 0x2b2   :  { %v736_v6 = vadd.f32 0.5, %v733_v13  ;;  %v707_v59 = vpop.f32.mrf.mxu2  ;;  %v720_v16 = vpop.f32.mrf.mxu3 }
 0x2b3   :  { %v2843_v12 = vpop.eup %2842 }
 0x2b4   :  { %v739_v41 = vmul.f32 %v736_v6, %v3589_v29  ;;  %v740_v46 = vmul.f32 %v2843_v12, %v735_v57 }
 0x2b5   :  { %v2845_v7 = vpop.eup %2844 }
 0x2b6   :  { %v3633_v52 = vadd.f32 %v740_v46, %v739_v41  ;;  %v734_v17 = vmul.f32 0.5, %v2845_v7 }
 0x2b8   :  { %2846 = vtanh.f32 %v3633_v52  ;;  %v737_v47 = vadd.f32 0.5, %v734_v17 }
 0x2be   :  { %v2847_v22 = vpop.eup %2846 }
 0x2bf   :  { %v743_v49 = vmul.f32 %v2847_v22, %v737_v47 }
 0x2c1   :  { %v744_v2 = vpack.c.bf16 %v743_v49, %v743_v49 }
 0x2c3   :  { %745 = vst [vmem:[#allocation3 + $0xc] sm:$0xf] %v744_v2  ;;  %758 = vmatmul.bf16.vlgmr.msrb.gmra.mxu0 %v744_v2  ;;  %771 = vmatmul.bf16.vlgmr.msrb.gmra.mxu1 %v744_v2 }
 0x2c4   :  { %784 = vmatmul.bf16.vlgmr.msrb.gmra.mxu2 %v744_v2  ;;  %797 = vmatmul.bf16.vlgmr.msrb.gmra.mxu3 %v744_v2 }
 0x2c5   :  { %910 = vmatpush.bf16.msrb.mxu0 %v3052_v11  ;;  %923 = vmatpush.bf16.msrb.mxu1 %v3066_v18 }
 0x2c6   :  { %936 = vmatpush.bf16.msrb.mxu2 %v3075_v27  ;;  %949 = vmatpush.bf16.msrb.mxu3 %v3071_v25 }
 0x2c9   :  { %911 = vmatpush.bf16.msrb.mxu0 %v3084_v30  ;;  %924 = vmatpush.bf16.msrb.mxu1 %v3086_v31 }
 0x2ca   :  { %937 = vmatpush.bf16.msrb.mxu2 %v3114_v39  ;;  %950 = vmatpush.bf16.msrb.mxu3 %v3110_v38 }
 0x2cd   :  { %912 = vmatpush.bf16.msrb.mxu0 %v3124_v42  ;;  %925 = vmatpush.bf16.msrb.mxu1 %v3126_v43 }
 0x2ce   :  { %938 = vmatpush.bf16.msrb.mxu2 %v3150_v51  ;;  %951 = vmatpush.bf16.msrb.mxu3 %v3147_v50 }
 0x2d1   :  { %913 = vmatpush.bf16.msrb.mxu0 %v3160_v54  ;;  %926 = vmatpush.bf16.msrb.mxu1 %v3162_v55 }
 0x2d2   :  { %939 = vmatpush.bf16.msrb.mxu2 %v3192_v1  ;;  %952 = vmatpush.bf16.msrb.mxu3 %v3189_v0 }
 0x2d5   :  { %914 = vmatpush.bf16.msrb.mxu0 %v3202_v4  ;;  %927 = vmatpush.bf16.msrb.mxu1 %v3204_v5 }
 0x2d6   :  { %940 = vmatpush.bf16.msrb.mxu2 %v3228_v15  ;;  %953 = vmatpush.bf16.msrb.mxu3 %v3225_v14 }
 0x2d9   :  { %915 = vmatpush.bf16.msrb.mxu0 %v3238_v19  ;;  %928 = vmatpush.bf16.msrb.mxu1 %v3240_v20 }
 0x2da   :  { %941 = vmatpush.bf16.msrb.mxu2 %v3256_v24  ;;  %954 = vmatpush.bf16.msrb.mxu3 %v3252_v23 }
 0x2dd   :  { %916 = vmatpush.bf16.msrb.mxu0 %v3269_v32  ;;  %929 = vmatpush.bf16.msrb.mxu1 %v3280_v36 }
 0x2de   :  { %942 = vmatpush.bf16.msrb.mxu2 %v3304_v48  ;;  %955 = vmatpush.bf16.msrb.mxu3 %v3292_v44 }
 0x2e1   :  { %917 = vmatpush.bf16.msrb.mxu0 %v3314_v53  ;;  %930 = vmatpush.bf16.msrb.mxu1 %v3316_v56 }
 0x2e2   :  { %943 = vmatpush.bf16.msrb.mxu2 %v3334_v62  ;;  %956 = vmatpush.bf16.msrb.mxu3 %v3331_v61 }
 0x340   :  { %v759_v29 = vpop.f32.mrf.mxu0  ;;  %v772_v28 = vpop.f32.mrf.mxu1 }
 0x341   :  { %v802_v35 = vadd.f32 %v759_v29, %v4639_v33  ;;  %v803_v9 = vadd.f32 %v772_v28, %v4640_v8 }
 0x343   :  { %v806_v3 = vmul.f32 0.5, %v802_v35  ;;  %v807_v63 = vmul.f32 0.5, %v803_v9 }
 0x345   :  { %2848 = vtanh.f32 %v806_v3 }
 0x346   :  { %2850 = vtanh.f32 %v807_v63 }
 0x347   :  { %v785_v60 = vpop.f32.mrf.mxu2  ;;  %v798_v58 = vpop.f32.mrf.mxu3 }
 0x348   :  { %v804_v34 = vadd.f32 %v785_v60, %v4641_v45  ;;  %v805_v13 = vadd.f32 %v798_v58, %v4642_v10  ;;  %v761_v57 = vpop.f32.mrf.mxu0  ;;  %v774_v6 = vpop.f32.mrf.mxu1 }
 0x349   :  { %v2563_v57 = vld [vmem:[%s4605_s4 + $0xe0] sm:$0xf]  ;;  %v2767_v6 = vld [vmem:[%s4605_s4 + $0xec] sm:$0xf0] }
 0x34a   :  { %v808_v59 = vmul.f32 0.5, %v804_v34  ;;  %2852 = vtanh.f32 %v805_v13 }
 0x34b   :  { %v2849_v16 = vpop.eup %2848 }
 0x34c   :  { %v2851_v12 = vpop.eup %2850  ;;  %v812_v41 = vmul.f32 0.5, %v2849_v16  ;;  %2854 = vtanh.f32 %v808_v59  ;;  %v2765_v59 = vld [vmem:[%s4605_s4 + $0xe4] sm:$0xf]  ;;  %v2564_v16 = vor.u32 %v2767_v6, %v2563_v57  ;;  %v4648_v57 = vld [vmem:[#allocation19_spill] sm:$0xff] }
 0x34d   :  { %v813_v46 = vmul.f32 0.5, %v2851_v12  ;;  %v2565_v12 = vld [vmem:[%s4605_s4 + $0xf0] sm:$0xf0] }
 0x34e   :  { %v815_v7 = vadd.f32 0.5, %v812_v41  ;;  %v2571_v41 = vld [vmem:[%s4605_s4 + $0xe8] sm:$0xf] }
 0x34f   :  { %v816_v17 = vadd.f32 0.5, %v813_v46  ;;  %v787_v47 = vpop.f32.mrf.mxu2  ;;  %v800_v22 = vpop.f32.mrf.mxu3  ;;  %v2768_v46 = vld [vmem:[%s4605_s4 + $0xf4] sm:$0xf0] }
 0x350   :  { %v2853_v49 = vpop.eup %2852  ;;  %v2766_v47 = vld [vmem:[%s4605_s4 + $0xec] sm:$0xf]  ;;  %v2573_v22 = vld [vmem:[%s4605_s4 + $0xf8] sm:$0xf0] }
 0x351   :  { %v819_v2 = vmul.f32 %v816_v17, %v3633_v52  ;;  %v820_v29 = vmul.f32 %v2853_v49, %v815_v7  ;;  %v2568_v7 = vor.u32 %v2765_v59, %v2565_v12  ;;  %v2572_v17 = vor.u32 %v2768_v46, %v2571_v41  ;;  %v2750_v12 = vld [vmem:[%s4605_s4 + $0x6c] sm:$0xf]  ;;  %v2509_v41 = vld [vmem:[%s4605_s4 + $0x78] sm:$0xf0]  ;;  %v2483_v46 = vld [vmem:[%s4605_s4 + $0x40] sm:$0xf] }
 0x352   :  { %v2855_v28 = vpop.eup %2854  ;;  %v2576_v49 = vor.u32 %v2766_v47, %v2573_v22  ;;  %v2745_v47 = vld [vmem:[%s4605_s4 + $0x44] sm:$0xf]  ;;  %v2485_v22 = vld [vmem:[%s4605_s4 + $0x50] sm:$0xf0] }
 0x353   :  { %v3673_v33 = vadd.f32 %v820_v29, %v819_v2  ;;  %v814_v35 = vmul.f32 0.5, %v2855_v28  ;;  %v2547_v2 = vld [vmem:[%s4605_s4 + $0xc0] sm:$0xf]  ;;  %v2763_v29 = vld [vmem:[%s4605_s4 + $0xcc] sm:$0xf0] }
 0x354   :  { %v2761_v28 = vld [vmem:[%s4605_s4 + $0xc4] sm:$0xf] }
 0x355   :  { %2856 = vtanh.f32 %v3673_v33  ;;  %v817_v8 = vadd.f32 0.5, %v814_v35  ;;  %v2549_v35 = vld [vmem:[%s4605_s4 + $0xd0] sm:$0xf0] }
 0x35b   :  { %v2857_v9 = vpop.eup %2856 }
 0x35c   :  { %v823_v3 = vmul.f32 %v2857_v9, %v817_v8  ;;  %v2555_v8 = vld [vmem:[%s4605_s4 + $0xc8] sm:$0xf]  ;;  %v2764_v9 = vld [vmem:[%s4605_s4 + $0xd4] sm:$0xf0] }
 0x35e   :  { %v824_v63 = vpack.c.bf16 %v823_v3, %v823_v3  ;;  %v2552_v3 = vor.u32 %v2761_v28, %v2549_v35  ;;  %v2488_v28 = vor.u32 %v2745_v47, %v2485_v22  ;;  %v2748_v35 = vld [vmem:[%s4605_s4 + $0x54] sm:$0xf0] }
 0x360   :  { %825 = vst [vmem:[#allocation3 + $0x10] sm:$0xf] %v824_v63  ;;  %838 = vmatmul.bf16.vlgmr.msra.gmra.mxu0 %v824_v63  ;;  %851 = vmatmul.bf16.vlgmr.msra.gmra.mxu1 %v824_v63 }
 0x361   :  { %864 = vmatmul.bf16.vlgmr.msra.gmra.mxu2 %v824_v63  ;;  %877 = vmatmul.bf16.vlgmr.msra.gmra.mxu3 %v824_v63  ;;  %v2556_v63 = vor.u32 %v2764_v9, %v2555_v8  ;;  %v2746_v9 = vld [vmem:[%s4605_s4 + $0x4c] sm:$0xf] }
 0x362   :  { %990 = vmatpush.bf16.msra.mxu0 %v3052_v11  ;;  %1003 = vmatpush.bf16.msra.mxu1 %v3066_v18  ;;  %v4643_v11 = vld [vmem:[#allocation13_spill] sm:$0xff] }
 0x363   :  { %1016 = vmatpush.bf16.msra.mxu2 %v3075_v27  ;;  %1029 = vmatpush.bf16.msra.mxu3 %v3071_v25  ;;  %v140_v18 = vadd.f32 %v4643_v11, %v3429_v21  ;;  %v4644_v25 = vld [vmem:[#allocation15_spill] sm:$0xff]  ;;  %v2762_v11 = vld [vmem:[%s4605_s4 + $0xcc] sm:$0xf] }
 0x364   :  { %v169_v27 = vadd.f32 %v4644_v25, %v3433_v26 }
 0x366   :  { %991 = vmatpush.bf16.msra.mxu0 %v3084_v30  ;;  %1004 = vmatpush.bf16.msra.mxu1 %v3086_v31 }
 0x367   :  { %1017 = vmatpush.bf16.msra.mxu2 %v3114_v39  ;;  %1030 = vmatpush.bf16.msra.mxu3 %v3110_v38 }
 0x36a   :  { %992 = vmatpush.bf16.msra.mxu0 %v3124_v42  ;;  %1005 = vmatpush.bf16.msra.mxu1 %v3126_v43 }
 0x36b   :  { %1018 = vmatpush.bf16.msra.mxu2 %v3150_v51  ;;  %1031 = vmatpush.bf16.msra.mxu3 %v3147_v50  ;;  %v4645_v50 = vld [vmem:[#allocation16_spill] sm:$0xff] }
 0x36c   :  { %v198_v51 = vadd.f32 %v4645_v50, %v3443_v37 }
 0x36e   :  { %993 = vmatpush.bf16.msra.mxu0 %v3160_v54  ;;  %1006 = vmatpush.bf16.msra.mxu1 %v3162_v55  ;;  %v4646_v54 = vld [vmem:[#allocation17_spill] sm:$0xff] }
 0x36f   :  { %1019 = vmatpush.bf16.msra.mxu2 %v3192_v1  ;;  %1032 = vmatpush.bf16.msra.mxu3 %v3189_v0  ;;  %v227_v55 = vadd.f32 %v4646_v54, %v3445_v40  ;;  %v2758_v54 = vld [vmem:[%s4605_s4 + $0xac] sm:$0xf] }
 0x372   :  { %994 = vmatpush.bf16.msra.mxu0 %v3202_v4  ;;  %1007 = vmatpush.bf16.msra.mxu1 %v3204_v5 }
 0x373   :  { %1020 = vmatpush.bf16.msra.mxu2 %v3228_v15  ;;  %1033 = vmatpush.bf16.msra.mxu3 %v3225_v14 }
 0x376   :  { %995 = vmatpush.bf16.msra.mxu0 %v3238_v19  ;;  %1008 = vmatpush.bf16.msra.mxu1 %v3240_v20 }
 0x377   :  { %1021 = vmatpush.bf16.msra.mxu2 %v3256_v24  ;;  %1034 = vmatpush.bf16.msra.mxu3 %v3252_v23 }
 0x37a   :  { %996 = vmatpush.bf16.msra.mxu0 %v3269_v32  ;;  %1009 = vmatpush.bf16.msra.mxu1 %v3280_v36 }
 0x37b   :  { %1022 = vmatpush.bf16.msra.mxu2 %v3304_v48  ;;  %1035 = vmatpush.bf16.msra.mxu3 %v3292_v44 }
 0x37e   :  { %997 = vmatpush.bf16.msra.mxu0 %v3314_v53  ;;  %1010 = vmatpush.bf16.msra.mxu1 %v3316_v56 }
 0x37f   :  { %1023 = vmatpush.bf16.msra.mxu2 %v3334_v62  ;;  %1036 = vmatpush.bf16.msra.mxu3 %v3331_v61 }
 0x3dd   :  { %v839_v30 = vpop.f32.mrf.mxu0  ;;  %v852_v31 = vpop.f32.mrf.mxu1 }
 0x3de   :  { %v882_v38 = vadd.f32 %v839_v30, %v140_v18  ;;  %v883_v39 = vadd.f32 %v852_v31, %v169_v27  ;;  %v2557_v18 = vld [vmem:[%s4605_s4 + $0xd8] sm:$0xf0]  ;;  %v2531_v27 = vld [vmem:[%s4605_s4 + $0xa0] sm:$0xf]  ;;  %v2759_v30 = vld [vmem:[%s4605_s4 + $0xac] sm:$0xf0] }
 0x3df   :  { %v2560_v25 = vor.u32 %v2762_v11, %v2557_v18  ;;  %v2757_v31 = vld [vmem:[%s4605_s4 + $0xa4] sm:$0xf]  ;;  %v2743_v18 = vld [vmem:[%s4605_s4 + $0x2c] sm:$0xf0] }
 0x3e0   :  { %v886_v42 = vmul.f32 0.5, %v882_v38  ;;  %v887_v43 = vmul.f32 0.5, %v883_v39  ;;  %v2532_v38 = vor.u32 %v2759_v30, %v2531_v27  ;;  %v2533_v39 = vld [vmem:[%s4605_s4 + $0xb0] sm:$0xf0] }
 0x3e1   :  { %v2536_v50 = vor.u32 %v2757_v31, %v2533_v39  ;;  %v2469_v27 = vld [vmem:[%s4605_s4 + $0x30] sm:$0xf0]  ;;  %v2475_v31 = vld [vmem:[%s4605_s4 + $0x28] sm:$0xf]  ;;  %v2742_v39 = vld [vmem:[%s4605_s4 + $0x2c] sm:$0xf] }
 0x3e2   :  { %2858 = vtanh.f32 %v886_v42  ;;  %v2539_v42 = vld [vmem:[%s4605_s4 + $0xa8] sm:$0xf] }
 0x3e3   :  { %2860 = vtanh.f32 %v887_v43  ;;  %v2760_v43 = vld [vmem:[%s4605_s4 + $0xb4] sm:$0xf0] }
 0x3e4   :  { %v865_v0 = vpop.f32.mrf.mxu2  ;;  %v878_v1 = vpop.f32.mrf.mxu3 }
 0x3e5   :  { %v884_v4 = vadd.f32 %v865_v0, %v198_v51  ;;  %v885_v5 = vadd.f32 %v878_v1, %v227_v55  ;;  %v841_v14 = vpop.f32.mrf.mxu0  ;;  %v854_v15 = vpop.f32.mrf.mxu1  ;;  %v2540_v51 = vor.u32 %v2760_v43, %v2539_v42  ;;  %v2541_v55 = vld [vmem:[%s4605_s4 + $0xb8] sm:$0xf0]  ;;  %v2515_v0 = vld [vmem:[%s4605_s4 + $0x80] sm:$0xf] }
 0x3e6   :  { %v2544_v1 = vor.u32 %v2758_v54, %v2541_v55  ;;  %v2517_v14 = vld [vmem:[%s4605_s4 + $0x90] sm:$0xf0]  ;;  %v2477_v54 = vld [vmem:[%s4605_s4 + $0x38] sm:$0xf0]  ;;  %v2451_v55 = vld [vmem:[%s4605_s4] sm:$0xf] }
 0x3e7   :  { %v888_v19 = vmul.f32 0.5, %v884_v4  ;;  %2862 = vtanh.f32 %v885_v5  ;;  %v2755_v4 = vld [vmem:[%s4605_s4 + $0x8c] sm:$0xf0]  ;;  %v2753_v5 = vld [vmem:[%s4605_s4 + $0x84] sm:$0xf] }
 0x3e8   :  { %v2859_v20 = vpop.eup %2858  ;;  %v2516_v15 = vor.u32 %v2755_v4, %v2515_v0  ;;  %v2739_v0 = vld [vmem:[%s4605_s4 + $0xc] sm:$0xf0] }
 0x3e9   :  { %v2861_v23 = vpop.eup %2860  ;;  %v892_v24 = vmul.f32 0.5, %v2859_v20  ;;  %2864 = vtanh.f32 %v888_v19  ;;  %v2523_v19 = vld [vmem:[%s4605_s4 + $0x88] sm:$0xf]  ;;  %v2756_v20 = vld [vmem:[%s4605_s4 + $0x94] sm:$0xf0] }
 0x3ea   :  { %v893_v32 = vmul.f32 0.5, %v2861_v23  ;;  %v2754_v23 = vld [vmem:[%s4605_s4 + $0x8c] sm:$0xf] }
 0x3eb   :  { %v895_v36 = vadd.f32 0.5, %v892_v24  ;;  %v2520_v24 = vor.u32 %v2753_v5, %v2517_v14  ;;  %v4650_v5 = vld [vmem:[#allocation22_spill] sm:$0xff] }
 0x3ec   :  { %v896_v44 = vadd.f32 0.5, %v893_v32  ;;  %v867_v48 = vpop.f32.mrf.mxu2  ;;  %v880_v53 = vpop.f32.mrf.mxu3  ;;  %v2524_v32 = vor.u32 %v2756_v20, %v2523_v19  ;;  %v2480_v20 = vor.u32 %v2742_v39, %v2477_v54  ;;  %v2795_v39 = vld [vmem:[%s4606_s5 + $0xcc] sm:$0xf0]  ;;  %v2685_v54 = vld [vmem:[%s4606_s5 + $0xd8] sm:$0xf0] }
 0x3ed   :  { %v2863_v56 = vpop.eup %2862  ;;  %v2499_v48 = vld [vmem:[%s4605_s4 + $0x60] sm:$0xf]  ;;  %v2751_v53 = vld [vmem:[%s4605_s4 + $0x6c] sm:$0xf0] }
 0x3ee   :  { %v899_v61 = vmul.f32 %v896_v44, %v3673_v33  ;;  %v900_v62 = vmul.f32 %v2863_v56, %v895_v36  ;;  %v2548_v33 = vor.u32 %v2763_v29, %v2547_v2  ;;  %v2525_v36 = vld [vmem:[%s4605_s4 + $0x98] sm:$0xf0]  ;;  %v2749_v56 = vld [vmem:[%s4605_s4 + $0x64] sm:$0xf] }
 0x3ef   :  { %v2865_v52 = vpop.eup %2864  ;;  %v2528_v44 = vor.u32 %v2754_v23, %v2525_v36  ;;  %v2737_v23 = vld [vmem:[%s4605_s4 + $0x4] sm:$0xf]  ;;  %v2740_v36 = vld [vmem:[%s4605_s4 + $0x14] sm:$0xf0] }
 0x3f0   :  { %v3717_v60 = vadd.f32 %v900_v62, %v899_v61  ;;  %v894_v58 = vmul.f32 0.5, %v2865_v52  ;;  %v2500_v52 = vor.u32 %v2751_v53, %v2499_v48  ;;  %v2461_v48 = vld [vmem:[%s4605_s4 + $0x18] sm:$0xf0] }
 0x3f2   :  { %2866 = vtanh.f32 %v3717_v60  ;;  %v897_v45 = vadd.f32 0.5, %v894_v58  ;;  %v2501_v58 = vld [vmem:[%s4605_s4 + $0x70] sm:$0xf0] }
 0x3f3   :  { %v2504_v59 = vor.u32 %v2749_v56, %v2501_v58  ;;  %v2452_v56 = vor.u32 %v2739_v0, %v2451_v55 }
 0x3f8   :  { %v2867_v34 = vpop.eup %2866 }
 0x3f9   :  { %v903_v10 = vmul.f32 %v2867_v34, %v897_v45  ;;  %v2507_v45 = vld [vmem:[%s4605_s4 + $0x68] sm:$0xf]  ;;  %v2752_v34 = vld [vmem:[%s4605_s4 + $0x74] sm:$0xf0] }
 0x3fb   :  { %v904_v13 = vpack.c.bf16 %v903_v10, %v903_v10  ;;  %v4647_v10 = vld [vmem:[#allocation18_spill] sm:$0xff] }
 0x3fd   :  { %905 = vst [vmem:[#allocation3 + $0x14] sm:$0xf] %v904_v13  ;;  %918 = vmatmul.bf16.vlgmr.msrb.gmra.mxu0 %v904_v13  ;;  %931 = vmatmul.bf16.vlgmr.msrb.gmra.mxu1 %v904_v13 }
 0x3fe   :  { %944 = vmatmul.bf16.vlgmr.msrb.gmra.mxu2 %v904_v13  ;;  %957 = vmatmul.bf16.vlgmr.msrb.gmra.mxu3 %v904_v13 }
 0x3ff   :  { %1332 = vmatpush.bf16.msrb.mxu0 %v2564_v16  ;;  %1361 = vmatpush.bf16.msrb.mxu1 %v2568_v7  ;;  %v2508_v16 = vor.u32 %v2752_v34, %v2507_v45  ;;  %v2512_v7 = vor.u32 %v2750_v12, %v2509_v41 }
 0x400   :  { %1390 = vmatpush.bf16.msrb.mxu2 %v2572_v17  ;;  %1419 = vmatpush.bf16.msrb.mxu3 %v2576_v49  ;;  %v2747_v17 = vld [vmem:[%s4605_s4 + $0x4c] sm:$0xf0] }
 0x401   :  { %v2484_v29 = vor.u32 %v2747_v17, %v2483_v46 }
 0x403   :  { %1333 = vmatpush.bf16.msrb.mxu0 %v2548_v33  ;;  %1362 = vmatpush.bf16.msrb.mxu1 %v2552_v3  ;;  %v2491_v33 = vld [vmem:[%s4605_s4 + $0x48] sm:$0xf]  ;;  %v2493_v3 = vld [vmem:[%s4605_s4 + $0x58] sm:$0xf0] }
 0x404   :  { %1391 = vmatpush.bf16.msrb.mxu2 %v2556_v63  ;;  %1420 = vmatpush.bf16.msrb.mxu3 %v2560_v25  ;;  %v2492_v8 = vor.u32 %v2748_v35, %v2491_v33  ;;  %v2467_v63 = vld [vmem:[%s4605_s4 + $0x20] sm:$0xf]  ;;  %v2496_v11 = vor.u32 %v2746_v9, %v2493_v3  ;;  %v2741_v25 = vld [vmem:[%s4605_s4 + $0x24] sm:$0xf]  ;;  %v2798_v9 = vld [vmem:[%s4606_s5 + $0xec] sm:$0xf] }
 0x405   :  { %v2468_v30 = vor.u32 %v2743_v18, %v2467_v63  ;;  %v2797_v33 = vld [vmem:[%s4606_s5 + $0xe4] sm:$0xf]  ;;  %v2701_v3 = vld [vmem:[%s4606_s5 + $0xf8] sm:$0xf0]  ;;  %v2699_v18 = vld [vmem:[%s4606_s5 + $0xe8] sm:$0xf] }
 0x407   :  { %1334 = vmatpush.bf16.msrb.mxu0 %v2532_v38  ;;  %1363 = vmatpush.bf16.msrb.mxu1 %v2536_v50  ;;  %v2744_v38 = vld [vmem:[%s4605_s4 + $0x34] sm:$0xf0]  ;;  %v2472_v50 = vor.u32 %v2741_v25, %v2469_v27 }
 0x408   :  { %1392 = vmatpush.bf16.msrb.mxu2 %v2540_v51  ;;  %1421 = vmatpush.bf16.msrb.mxu3 %v2544_v1  ;;  %v2476_v51 = vor.u32 %v2744_v38, %v2475_v31  ;;  %v4649_v1 = vld [vmem:[#allocation20_spill] sm:$0xff]  ;;  %v2800_v25 = vld [vmem:[%s4606_s5 + $0xf4] sm:$0xf0] }
 0x409   :  { %v3951_v27 = vor.u32 %v2800_v25, %v2699_v18  ;;  %v2803_v31 = vld [vmem:[#allocation3 + $0x10] sm:$0xff]  ;;  %v2675_v38 = vld [vmem:[%s4606_s5 + $0xc0] sm:$0xf] }
 0x40b   :  { %1335 = vmatpush.bf16.msrb.mxu0 %v2516_v15  ;;  %1364 = vmatpush.bf16.msrb.mxu1 %v2520_v24  ;;  %v2453_v24 = vld [vmem:[%s4605_s4 + $0x10] sm:$0xf0] }
 0x40c   :  { %1393 = vmatpush.bf16.msrb.mxu2 %v2524_v32  ;;  %1422 = vmatpush.bf16.msrb.mxu3 %v2528_v44  ;;  %v2459_v32 = vld [vmem:[%s4605_s4 + $0x8] sm:$0xf]  ;;  %v2738_v44 = vld [vmem:[%s4605_s4 + $0xc] sm:$0xf] }
 0x40d   :  { %v2464_v34 = vor.u32 %v2738_v44, %v2461_v48 }
 0x40f   :  { %1336 = vmatpush.bf16.msrb.mxu0 %v2500_v52  ;;  %1365 = vmatpush.bf16.msrb.mxu1 %v2504_v59  ;;  %v2460_v52 = vor.u32 %v2740_v36, %v2459_v32  ;;  %v2789_v32 = vld [vmem:[%s4606_s5 + $0xa4] sm:$0xf] }
 0x410   :  { %1394 = vmatpush.bf16.msrb.mxu2 %v2508_v16  ;;  %1423 = vmatpush.bf16.msrb.mxu3 %v2512_v7 }
 0x413   :  { %1337 = vmatpush.bf16.msrb.mxu0 %v2484_v29  ;;  %1366 = vmatpush.bf16.msrb.mxu1 %v2488_v28  ;;  %v2801_v29 = vld [vmem:[#allocation3] sm:$0xff]  ;;  %v2799_v28 = vld [vmem:[%s4606_s5 + $0xec] sm:$0xf0] }
 0x414   :  { %1395 = vmatpush.bf16.msrb.mxu2 %v2492_v8  ;;  %1424 = vmatpush.bf16.msrb.mxu3 %v2496_v11  ;;  %v2693_v8 = vld [vmem:[%s4606_s5 + $0xf0] sm:$0xf0]  ;;  %v3942_v11 = vor.u32 %v2798_v9, %v2701_v3  ;;  %v4654_v3 = vld [vmem:[#allocation25_spill] sm:$0xff] }
 0x415   :  { %v3940_v63 = vor.u32 %v2797_v33, %v2693_v8  ;;  %v2629_v33 = vld [vmem:[%s4606_s5 + $0x70] sm:$0xf0]  ;;  %v4653_v8 = vld [vmem:[#allocation24_spill] sm:$0xff]  ;;  %v232_v18 = vadd.f32 %v4654_v3, %v3445_v40 }
 0x416   :  { %v203_v9 = vadd.f32 %v4653_v8, %v3443_v37  ;;  %v2635_v37 = vld [vmem:[%s4606_s5 + $0x68] sm:$0xf] }
 0x417   :  { %1338 = vmatpush.bf16.msrb.mxu0 %v2468_v30  ;;  %1367 = vmatpush.bf16.msrb.mxu1 %v2472_v50  ;;  %v2802_v30 = vld [vmem:[#allocation3 + $0x8] sm:$0xff]  ;;  %v2603_v3 = vld [vmem:[%s4606_s5 + $0x28] sm:$0xf] }
 0x418   :  { %1396 = vmatpush.bf16.msrb.mxu2 %v2476_v51  ;;  %1425 = vmatpush.bf16.msrb.mxu3 %v2480_v20  ;;  %v2677_v50 = vld [vmem:[%s4606_s5 + $0xd0] sm:$0xf0]  ;;  %v2794_v51 = vld [vmem:[%s4606_s5 + $0xcc] sm:$0xf] }
 0x419   :  { %v3978_v0 = vor.u32 %v2794_v51, %v2685_v54  ;;  %v2611_v51 = vld [vmem:[%s4606_s5 + $0x40] sm:$0xf]  ;;  %v2779_v54 = vld [vmem:[%s4606_s5 + $0x4c] sm:$0xf0] }
 0x41b   :  { %1339 = vmatpush.bf16.msrb.mxu0 %v2452_v56 }
 0x41c   :  { %1397 = vmatpush.bf16.msrb.mxu2 %v2460_v52  ;;  %1426 = vmatpush.bf16.msrb.mxu3 %v2464_v34  ;;  %v2643_v34 = vld [vmem:[%s4606_s5 + $0x80] sm:$0xf] }
 0x47a   :  { %v919_v61 = vpop.f32.mrf.mxu0  ;;  %v932_v62 = vpop.f32.mrf.mxu1 }
 0x47b   :  { %v962_v13 = vadd.f32 %v919_v61, %v4647_v10  ;;  %v963_v6 = vadd.f32 %v932_v62, %v4648_v57  ;;  %v2456_v62 = vor.u32 %v2737_v23, %v2453_v24  ;;  %v2659_v23 = vld [vmem:[%s4606_s5 + $0xa0] sm:$0xf]  ;;  %v2791_v24 = vld [vmem:[%s4606_s5 + $0xac] sm:$0xf0] }
 0x47c   :  { %v4005_v48 = vor.u32 %v2791_v24, %v2659_v23  ;;  %v2613_v23 = vld [vmem:[%s4606_s5 + $0x50] sm:$0xf0]  ;;  %v2778_v24 = vld [vmem:[%s4606_s5 + $0x4c] sm:$0xf] }
 0x47d   :  { %v966_v49 = vmul.f32 0.5, %v962_v13  ;;  %v967_v2 = vmul.f32 0.5, %v963_v6  ;;  %1368 = vmatpush.bf16.msrb.mxu1 %v2456_v62 }
 0x47f   :  { %2868 = vtanh.f32 %v966_v49 }
 0x480   :  { %2870 = vtanh.f32 %v967_v2 }
 0x481   :  { %v945_v42 = vpop.f32.mrf.mxu2  ;;  %v958_v43 = vpop.f32.mrf.mxu3 }
 0x482   :  { %v964_v4 = vadd.f32 %v945_v42, %v4649_v1  ;;  %v965_v14 = vadd.f32 %v958_v43, %v4650_v5  ;;  %v921_v15 = vpop.f32.mrf.mxu0  ;;  %v934_v19 = vpop.f32.mrf.mxu1  ;;  %v2793_v42 = vld [vmem:[%s4606_s5 + $0xc4] sm:$0xf]  ;;  %v3965_v43 = vor.u32 %v2795_v39, %v2675_v38  ;;  %v2683_v1 = vld [vmem:[%s4606_s5 + $0xc8] sm:$0xf] }
 0x483   :  { %v3976_v55 = vor.u32 %v2793_v42, %v2677_v50  ;;  %v4652_v19 = vld [vmem:[#allocation23_spill] sm:$0xff] }
 0x484   :  { %v968_v53 = vmul.f32 0.5, %v964_v4  ;;  %2872 = vtanh.f32 %v965_v14  ;;  %v2796_v4 = vld [vmem:[%s4606_s5 + $0xd4] sm:$0xf0]  ;;  %v4651_v14 = vld [vmem:[#allocation21_spill] sm:$0xff]  ;;  %v174_v20 = vadd.f32 %v4652_v19, %v3433_v26 }
 0x485   :  { %v2869_v61 = vpop.eup %2868  ;;  %v3989_v5 = vor.u32 %v2796_v4, %v2683_v1  ;;  %v145_v15 = vadd.f32 %v4651_v14, %v3429_v21  ;;  %v2661_v21 = vld [vmem:[%s4606_s5 + $0xb0] sm:$0xf0]  ;;  %v2790_v26 = vld [vmem:[%s4606_s5 + $0xac] sm:$0xf]  ;;  %v2784_v50 = vld [vmem:[%s4606_s5 + $0x74] sm:$0xf0] }
 0x486   :  { %v2871_v58 = vpop.eup %2870  ;;  %v972_v45 = vmul.f32 0.5, %v2869_v61  ;;  %2874 = vtanh.f32 %v968_v53  ;;  %v2669_v53 = vld [vmem:[%s4606_s5 + $0xb8] sm:$0xf0]  ;;  %v4016_v62 = vor.u32 %v2789_v32, %v2661_v21  ;;  %v4108_v19 = vor.u32 %v2784_v50, %v2635_v37  ;;  %v2579_v37 = vld [vmem:[%s4606_s5] sm:$0xf] }
 0x487   :  { %v973_v10 = vmul.f32 0.5, %v2871_v58  ;;  %v4018_v52 = vor.u32 %v2790_v26, %v2669_v53  ;;  %v2667_v58 = vld [vmem:[%s4606_s5 + $0xa8] sm:$0xf]  ;;  %v2621_v32 = vld [vmem:[%s4606_s5 + $0x58] sm:$0xf0]  ;;  %v4129_v26 = vor.u32 %v2779_v54, %v2611_v51 }
 0x488   :  { %v975_v13 = vadd.f32 0.5, %v972_v45  ;;  %v2792_v45 = vld [vmem:[%s4606_s5 + $0xb4] sm:$0xf0]  ;;  %v2595_v53 = vld [vmem:[%s4606_s5 + $0x20] sm:$0xf] }
 0x489   :  { %v976_v57 = vadd.f32 0.5, %v973_v10  ;;  %v947_v6 = vpop.f32.mrf.mxu2  ;;  %v960_v59 = vpop.f32.mrf.mxu3  ;;  %v4030_v10 = vor.u32 %v2792_v45, %v2667_v58  ;;  %v4138_v58 = vor.u32 %v2778_v24, %v2621_v32  ;;  %v2775_v45 = vld [vmem:[%s4606_s5 + $0x2c] sm:$0xf0]  ;;  %v2770_v54 = vld [vmem:[%s4606_s5 + $0xc] sm:$0xf] }
 0x48a   :  { %v2873_v16 = vpop.eup %2872  ;;  %v2645_v6 = vld [vmem:[%s4606_s5 + $0x90] sm:$0xf0]  ;;  %v2772_v24 = vld [vmem:[%s4606_s5 + $0x14] sm:$0xf0] }
 0x48b   :  { %v979_v12 = vmul.f32 %v976_v57, %v3717_v60  ;;  %v980_v41 = vmul.f32 %v2873_v16, %v975_v13  ;;  %v2691_v60 = vld [vmem:[%s4606_s5 + $0xe0] sm:$0xf]  ;;  %v2787_v13 = vld [vmem:[%s4606_s5 + $0x8c] sm:$0xf0]  ;;  %v2785_v57 = vld [vmem:[%s4606_s5 + $0x84] sm:$0xf] }
 0x48c   :  { %v2875_v46 = vpop.eup %2874  ;;  %v3929_v35 = vor.u32 %v2799_v28, %v2691_v60  ;;  %v2783_v60 = vld [vmem:[%s4606_s5 + $0x6c] sm:$0xf0]  ;;  %v2781_v28 = vld [vmem:[%s4606_s5 + $0x64] sm:$0xf] }
 0x48d   :  { %v3917_v7 = vadd.f32 %v980_v41, %v979_v12  ;;  %v974_v17 = vmul.f32 0.5, %v2875_v46  ;;  %v4043_v12 = vor.u32 %v2787_v13, %v2643_v34  ;;  %v4045_v41 = vor.u32 %v2785_v57, %v2645_v6  ;;  %v2786_v46 = vld [vmem:[%s4606_s5 + $0x8c] sm:$0xf]  ;;  %v2773_v34 = vld [vmem:[%s4606_s5 + $0x24] sm:$0xf] }
 0x48e   :  { %v4094_v40 = vor.u32 %v2781_v28, %v2629_v33  ;;  %v2597_v13 = vld [vmem:[%s4606_s5 + $0x30] sm:$0xf0] }
 0x48f   :  { %2876 = vtanh.f32 %v3917_v7  ;;  %v977_v47 = vadd.f32 0.5, %v974_v17  ;;  %v2653_v17 = vld [vmem:[%s4606_s5 + $0x98] sm:$0xf0]  ;;  %v4163_v33 = vor.u32 %v2773_v34, %v2597_v13  ;;  %v4655_v34 = vmov 0  }
 0x495   :  { %v2877_v22 = vpop.eup %2876 }
 0x496   :  { %v983_v49 = vmul.f32 %v2877_v22, %v977_v47  ;;  %v4054_v47 = vor.u32 %v2786_v46, %v2653_v17  ;;  %v2651_v22 = vld [vmem:[%s4606_s5 + $0x88] sm:$0xf]  ;;  %v2605_v46 = vld [vmem:[%s4606_s5 + $0x38] sm:$0xf0] }
 0x498   :  { %v984_v2 = vpack.c.bf16 %v983_v49, %v983_v49  ;;  %v2788_v49 = vld [vmem:[%s4606_s5 + $0x94] sm:$0xf0] }
 0x49a   :  { %985 = vst [vmem:[#allocation3 + $0x18] sm:$0xf] %v984_v2  ;;  %998 = vmatmul.bf16.vlgmr.msra.gmra.mxu0 %v984_v2  ;;  %1011 = vmatmul.bf16.vlgmr.msra.gmra.mxu1 %v984_v2 }
 0x49b   :  { %1024 = vmatmul.bf16.vlgmr.msra.gmra.mxu2 %v984_v2  ;;  %1037 = vmatmul.bf16.vlgmr.msra.gmra.mxu3 %v984_v2  ;;  %v2627_v2 = vld [vmem:[%s4606_s5 + $0x60] sm:$0xf] }
 0x49c   :  { %1644 = vmatpush.bf16.msra.mxu0 %v3929_v35  ;;  %1657 = vmatpush.bf16.msra.mxu1 %v3940_v63  ;;  %v4081_v25 = vor.u32 %v2783_v60, %v2627_v2 }
 0x49d   :  { %1683 = vmatpush.bf16.msra.mxu3 %v3942_v11  ;;  %1670 = vmatpush.bf16.msra.mxu2 %v3951_v27 }
 0x4a0   :  { %1645 = vmatpush.bf16.msra.mxu0 %v3965_v43  ;;  %1658 = vmatpush.bf16.msra.mxu1 %v3976_v55 }
 0x4a1   :  { %1684 = vmatpush.bf16.msra.mxu3 %v3978_v0  ;;  %1671 = vmatpush.bf16.msra.mxu2 %v3989_v5 }
 0x4a4   :  { %1646 = vmatpush.bf16.msra.mxu0 %v4005_v48  ;;  %1659 = vmatpush.bf16.msra.mxu1 %v4016_v62 }
 0x4a5   :  { %1685 = vmatpush.bf16.msra.mxu3 %v4018_v52  ;;  %1672 = vmatpush.bf16.msra.mxu2 %v4030_v10 }
 0x4a8   :  { %1647 = vmatpush.bf16.msra.mxu0 %v4043_v12  ;;  %1660 = vmatpush.bf16.msra.mxu1 %v4045_v41 }
 0x4a9   :  { %1686 = vmatpush.bf16.msra.mxu3 %v4054_v47 }
 0x4aa   :  { %1340 = vmatmul.bf16.vlgmr.msrb.gmra.mxu0 %v2801_v29  ;;  %1369 = vmatmul.bf16.vlgmr.msrb.gmra.mxu1 %v2801_v29 }
 0x4ab   :  { %1398 = vmatmul.bf16.vlgmr.msrb.gmra.mxu2 %v2801_v29  ;;  %1427 = vmatmul.bf16.vlgmr.msrb.gmra.mxu3 %v2801_v29  ;;  %v4065_v29 = vor.u32 %v2788_v49, %v2651_v22  ;;  %v4159_v49 = vor.u32 %v2775_v45, %v2595_v53 }
 0x4ac   :  { %1648 = vmatpush.bf16.msra.mxu0 %v4081_v25  ;;  %1661 = vmatpush.bf16.msra.mxu1 %v4094_v40 }
 0x4ad   :  { %1673 = vmatpush.bf16.msra.mxu2 %v4065_v29 }
 0x4b0   :  { %1649 = vmatpush.bf16.msra.mxu0 %v4129_v26 }
 0x4b1   :  { %1674 = vmatpush.bf16.msra.mxu2 %v4108_v19 }
 0x4b4   :  { %1650 = vmatpush.bf16.msra.mxu0 %v4159_v49 }
 0x4ba   :  { %1345 = vmatmul.bf16.gmra.mxu0 %v2802_v30  ;;  %1374 = vmatmul.bf16.gmra.mxu1 %v2802_v30 }
 0x4bb   :  { %1403 = vmatmul.bf16.gmra.mxu2 %v2802_v30  ;;  %1432 = vmatmul.bf16.gmra.mxu3 %v2802_v30  ;;  %v2782_v30 = vld [vmem:[%s4606_s5 + $0x6c] sm:$0xf] }
 0x4ca   :  { %1350 = vmatmul.bf16.gmra.mxu0 %v2803_v31  ;;  %1379 = vmatmul.bf16.gmra.mxu1 %v2803_v31 }
 0x4cb   :  { %1408 = vmatmul.bf16.gmra.mxu2 %v2803_v31  ;;  %1437 = vmatmul.bf16.gmra.mxu3 %v2803_v31  ;;  %v2637_v31 = vld [vmem:[%s4606_s5 + $0x78] sm:$0xf0] }
 0x4cc   :  { %v4096_v42 = vor.u32 %v2782_v30, %v2637_v31 }
 0x4ce   :  { %1687 = vmatpush.bf16.msra.mxu3 %v4096_v42 }
 0x4d2   :  { %1688 = vmatpush.bf16.msra.mxu3 %v4138_v58 }
 0x517   :  { %v999_v36 = vpop.f32.mrf.mxu0  ;;  %v1012_v44 = vpop.f32.mrf.mxu1 }
 0x518   :  { %v1042_v56 = vadd.f32 %v999_v36, %v145_v15  ;;  %v1043_v61 = vadd.f32 %v1012_v44, %v174_v20  ;;  %v2777_v20 = vld [vmem:[%s4606_s5 + $0x44] sm:$0xf]  ;;  %v2619_v36 = vld [vmem:[%s4606_s5 + $0x48] sm:$0xf]  ;;  %v2780_v44 = vld [vmem:[%s4606_s5 + $0x54] sm:$0xf0] }
 0x51a   :  { %v1046_v59 = vmul.f32 0.5, %v1042_v56  ;;  %v1047_v16 = vmul.f32 0.5, %v1043_v61  ;;  %v4136_v61 = vor.u32 %v2777_v20, %v2613_v23  ;;  %v2587_v23 = vld [vmem:[%s4606_s5 + $0x8] sm:$0xf] }
 0x51b   :  { %v4211_v32 = vor.u32 %v2772_v24, %v2587_v23 }
 0x51c   :  { %2878 = vtanh.f32 %v1046_v59  ;;  %v4150_v59 = vor.u32 %v2780_v44, %v2619_v36  ;;  %1662 = vmatpush.bf16.msra.mxu1 %v4136_v61 }
 0x51d   :  { %2880 = vtanh.f32 %v1047_v16  ;;  %v2774_v16 = vld [vmem:[%s4606_s5 + $0x2c] sm:$0xf] }
 0x51e   :  { %v1025_v38 = vpop.f32.mrf.mxu2  ;;  %v1038_v39 = vpop.f32.mrf.mxu3  ;;  %v4165_v8 = vor.u32 %v2774_v16, %v2605_v46  ;;  %1675 = vmatpush.bf16.msra.mxu2 %v4150_v59 }
 0x51f   :  { %v1044_v1 = vadd.f32 %v1025_v38, %v203_v9  ;;  %v1045_v4 = vadd.f32 %v1038_v39, %v232_v18  ;;  %v1001_v14 = vpop.f32.mrf.mxu0  ;;  %v1014_v15 = vpop.f32.mrf.mxu1  ;;  %v2776_v18 = vld [vmem:[%s4606_s5 + $0x34] sm:$0xf0]  ;;  %v2771_v38 = vld [vmem:[%s4606_s5 + $0xc] sm:$0xf0]  ;;  %v2769_v39 = vld [vmem:[%s4606_s5 + $0x4] sm:$0xf] }
 0x520   :  { %v4185_v50 = vor.u32 %v2776_v18, %v2603_v3  ;;  %v4187_v51 = vor.u32 %v2771_v38, %v2579_v37  ;;  %1663 = vmatpush.bf16.msra.mxu1 %v4163_v33  ;;  %1689 = vmatpush.bf16.msra.mxu3 %v4165_v8 }
 0x521   :  { %v1048_v21 = vmul.f32 0.5, %v1044_v1  ;;  %2882 = vtanh.f32 %v1045_v4  ;;  %v2589_v1 = vld [vmem:[%s4606_s5 + $0x18] sm:$0xf0] }
 0x522   :  { %v2879_v56 = vpop.eup %2878  ;;  %v4202_v20 = vor.u32 %v2770_v54, %v2589_v1  ;;  %1676 = vmatpush.bf16.msra.mxu2 %v4185_v50  ;;  %1651 = vmatpush.bf16.msra.mxu0 %v4187_v51 }
 0x523   :  { %v2881_v57 = vpop.eup %2880  ;;  %v1052_v6 = vmul.f32 0.5, %v2879_v56  ;;  %2884 = vtanh.f32 %v1048_v21 }
 0x524   :  { %v1053_v17 = vmul.f32 0.5, %v2881_v57  ;;  %1690 = vmatpush.bf16.msra.mxu3 %v4202_v20 }
 0x525   :  { %v1055_v22 = vadd.f32 0.5, %v1052_v6 }
 0x526   :  { %v1056_v2 = vadd.f32 0.5, %v1053_v17  ;;  %v1027_v60 = vpop.f32.mrf.mxu2  ;;  %v1040_v28 = vpop.f32.mrf.mxu3  ;;  %1677 = vmatpush.bf16.msra.mxu2 %v4211_v32  ;;  %1723 = vmatpush.bf16.msrb.mxu0 %v3929_v35 }
 0x527   :  { %v2883_v9 = vpop.eup %2882  ;;  %v1341_v13 = vpop.f32.mrf.mxu0 }
 0x528   :  { %v1059_v30 = vmul.f32 %v1056_v2, %v3917_v7  ;;  %v1060_v31 = vmul.f32 %v2883_v9, %v1055_v22  ;;  %v2581_v7 = vld [vmem:[%s4606_s5 + $0x10] sm:$0xf0]  ;;  %1762 = vmatpush.bf16.msrb.mxu3 %v3942_v11  ;;  %v1370_v57 = vpop.f32.mrf.mxu1 }
 0x529   :  { %v2885_v4 = vpop.eup %2884  ;;  %v4200_v15 = vor.u32 %v2769_v39, %v2581_v7 }
 0x52a   :  { %v1061_v14 = vadd.f32 %v1060_v31, %v1059_v30  ;;  %v1054_v36 = vmul.f32 0.5, %v2885_v4  ;;  %1749 = vmatpush.bf16.msrb.mxu2 %v3951_v27  ;;  %1724 = vmatpush.bf16.msrb.mxu0 %v3965_v43 }
 0x52b   :  { %1664 = vmatpush.bf16.msra.mxu1 %v4200_v15 }
 0x52c   :  { %2886 = vtanh.f32 %v1061_v14  ;;  %v1057_v44 = vadd.f32 0.5, %v1054_v36  ;;  %1763 = vmatpush.bf16.msrb.mxu3 %v3978_v0 }
 0x52e   :  { %1750 = vmatpush.bf16.msrb.mxu2 %v3989_v5  ;;  %1725 = vmatpush.bf16.msrb.mxu0 %v4005_v48  ;;  %v1399_v6 = vpop.f32.mrf.mxu2  ;;  %v1428_v16 = vpop.f32.mrf.mxu3 }
 0x52f   :  { %1736 = vmatpush.bf16.msrb.mxu1 %v3940_v63  ;;  %v4285_v46 = vpop.f32.mrf.mxu0 }
 0x530   :  { %1764 = vmatpush.bf16.msrb.mxu3 %v4018_v52  ;;  %v4287_v17 = vpop.f32.mrf.mxu1 }
 0x532   :  { %v2887_v21 = vpop.eup %2886  ;;  %1751 = vmatpush.bf16.msrb.mxu2 %v4030_v10  ;;  %1726 = vmatpush.bf16.msrb.mxu0 %v4043_v12 }
 0x533   :  { %v1063_v53 = vmul.f32 %v2887_v21, %v1057_v44  ;;  %1737 = vmatpush.bf16.msrb.mxu1 %v3976_v55 }
 0x534   :  { %1765 = vmatpush.bf16.msrb.mxu3 %v4054_v47 }
 0x535   :  { %v1064_v56 = vpack.c.bf16 %v1063_v53, %v1063_v53  ;;  %v1130_v53 = vld [vmem:[%s4607_s6] sm:$0xf] }
 0x536   :  { %1752 = vmatpush.bf16.msrb.mxu2 %v4065_v29  ;;  %1727 = vmatpush.bf16.msrb.mxu0 %v4081_v25  ;;  %v4289_v22 = vpop.f32.mrf.mxu2  ;;  %v4291_v2 = vpop.f32.mrf.mxu3 }
 0x537   :  { %1065 = vst [vmem:[#allocation3 + $0x1c] sm:$0xf] %v1064_v56  ;;  %1738 = vmatpush.bf16.msrb.mxu1 %v4016_v62  ;;  %v4293_v60 = vpop.f32.mrf.mxu0 }
 0x538   :  { %1766 = vmatpush.bf16.msrb.mxu3 %v4096_v42  ;;  %v4295_v28 = vpop.f32.mrf.mxu1 }
 0x53a   :  { %1753 = vmatpush.bf16.msrb.mxu2 %v4108_v19  ;;  %1728 = vmatpush.bf16.msrb.mxu0 %v4129_v26 }
 0x53b   :  { %1739 = vmatpush.bf16.msrb.mxu1 %v4045_v41 }
 0x53c   :  { %1767 = vmatpush.bf16.msrb.mxu3 %v4138_v58 }
 0x53e   :  { %v2804_v45 = vld [vmem:[#allocation3 + $0x18] sm:$0xff]  ;;  %1754 = vmatpush.bf16.msrb.mxu2 %v4150_v59  ;;  %1729 = vmatpush.bf16.msrb.mxu0 %v4159_v49  ;;  %v4297_v9 = vpop.f32.mrf.mxu2  ;;  %v4299_v3 = vpop.f32.mrf.mxu3 }
 0x53f   :  { %1355 = vmatmul.bf16.gmra.mxu0 %v2804_v45  ;;  %1384 = vmatmul.bf16.gmra.mxu1 %v2804_v45  ;;  %4656 = vst [vmem:[#allocation6_spill] sm:$0xff] %v4297_v9  ;;  %v4301_v18 = vpop.f32.mrf.mxu0 }
 0x540   :  { %1413 = vmatmul.bf16.gmra.mxu2 %v2804_v45  ;;  %1442 = vmatmul.bf16.gmra.mxu3 %v2804_v45  ;;  %4657 = vst [vmem:[#allocation5_spill] sm:$0xff] %v4299_v3  ;;  %v4303_v30 = vpop.f32.mrf.mxu1 }
 0x541   :  { %1740 = vmatpush.bf16.msrb.mxu1 %v4094_v40  ;;  %1768 = vmatpush.bf16.msrb.mxu3 %v4165_v8  ;;  %4658 = vst [vmem:[#allocation7_spill] sm:$0xff] %v4301_v18 }
 0x542   :  { %1755 = vmatpush.bf16.msrb.mxu2 %v4185_v50  ;;  %1730 = vmatpush.bf16.msrb.mxu0 %v4187_v51  ;;  %4659 = vst [vmem:[#allocation8_spill] sm:$0xff] %v4303_v30 }
 0x545   :  { %1741 = vmatpush.bf16.msrb.mxu1 %v4136_v61  ;;  %1769 = vmatpush.bf16.msrb.mxu3 %v4202_v20 }
 0x546   :  { %1756 = vmatpush.bf16.msrb.mxu2 %v4211_v32  ;;  %v4305_v31 = vpop.f32.mrf.mxu2  ;;  %v4307_v37 = vpop.f32.mrf.mxu3 }
 0x547   :  { %4660 = vst [vmem:[#allocation9_spill] sm:$0xff] %v4305_v31  ;;  %v4309_v38 = vpop.f32.mrf.mxu0 }
 0x548   :  { %4661 = vst [vmem:[#allocation10_spill] sm:$0xff] %v4307_v37  ;;  %v4311_v39 = vpop.f32.mrf.mxu1 }
 0x549   :  { %1742 = vmatpush.bf16.msrb.mxu1 %v4163_v33  ;;  %4662 = vst [vmem:[#allocation11_spill] sm:$0xff] %v4309_v38 }
 0x54a   :  { %4663 = vst [vmem:[#allocation12_spill] sm:$0xff] %v4311_v39 }
 0x54d   :  { %1743 = vmatpush.bf16.msrb.mxu1 %v4200_v15 }
 0x54e   :  { %v4313_v7 = vpop.f32.mrf.mxu2  ;;  %v4315_v54 = vpop.f32.mrf.mxu3 }
 0x54f   :  { %1652 = vmatmul.bf16.vlgmr.msra.gmra.mxu0 %v4655_v34  ;;  %1665 = vmatmul.bf16.vlgmr.msra.gmra.mxu1 %v4655_v34  ;;  %4664 = vst [vmem:[#allocation14_spill] sm:$0xff] %v4313_v7  ;;  %v4317_v1 = vpop.f32.mrf.mxu0  ;;  %v4350_v7 = vperm.slane %v1130_v53, 2 }
 0x550   :  { %1678 = vmatmul.bf16.vlgmr.msra.gmra.mxu2 %v4655_v34  ;;  %1691 = vmatmul.bf16.vlgmr.msra.gmra.mxu3 %v4655_v34  ;;  %4665 = vst [vmem:[#allocation13_spill] sm:$0xff] %v4315_v54  ;;  %v4319_v4 = vpop.f32.mrf.mxu1  ;;  %v4340_v34 = vperm.slane %v1130_v53, 0 }
 0x551   :  { %1802 = vmatpush.bf16.msra.mxu0 %v3929_v35  ;;  %1815 = vmatpush.bf16.msra.mxu1 %v3940_v63  ;;  %4666 = vst [vmem:[#allocation15_spill] sm:$0xff] %v4317_v1  ;;  %v1400_v38 = vadd.f32 %v1399_v6, %v4350_v7 }
 0x552   :  { %1828 = vmatpush.bf16.msra.mxu2 %v3951_v27  ;;  %1841 = vmatpush.bf16.msra.mxu3 %v3942_v11  ;;  %4667 = vst [vmem:[#allocation16_spill] sm:$0xff] %v4319_v4 }
 0x555   :  { %1803 = vmatpush.bf16.msra.mxu0 %v3965_v43  ;;  %1816 = vmatpush.bf16.msra.mxu1 %v3976_v55 }
 0x556   :  { %1829 = vmatpush.bf16.msra.mxu2 %v3989_v5  ;;  %1842 = vmatpush.bf16.msra.mxu3 %v3978_v0  ;;  %v4321_v14 = vpop.f32.mrf.mxu2  ;;  %v4323_v23 = vpop.f32.mrf.mxu3 }
 0x557   :  { %4668 = vst [vmem:[#allocation17_spill] sm:$0xff] %v4321_v14  ;;  %v4342_v14 = vperm.slane %v1130_v53, 1 }
 0x558   :  { %4669 = vst [vmem:[#allocation18_spill] sm:$0xff] %v4323_v23 }
 0x559   :  { %1804 = vmatpush.bf16.msra.mxu0 %v4005_v48  ;;  %1817 = vmatpush.bf16.msra.mxu1 %v4016_v62 }
 0x55a   :  { %1830 = vmatpush.bf16.msra.mxu2 %v4030_v10  ;;  %1843 = vmatpush.bf16.msra.mxu3 %v4018_v52 }
 0x55d   :  { %1805 = vmatpush.bf16.msra.mxu0 %v4043_v12  ;;  %1818 = vmatpush.bf16.msra.mxu1 %v4045_v41 }
 0x55e   :  { %1831 = vmatpush.bf16.msra.mxu2 %v4065_v29  ;;  %1844 = vmatpush.bf16.msra.mxu3 %v4054_v47 }
 0x561   :  { %1806 = vmatpush.bf16.msra.mxu0 %v4081_v25  ;;  %1819 = vmatpush.bf16.msra.mxu1 %v4094_v40 }
 0x562   :  { %1832 = vmatpush.bf16.msra.mxu2 %v4108_v19  ;;  %1845 = vmatpush.bf16.msra.mxu3 %v4096_v42 }
 0x565   :  { %1807 = vmatpush.bf16.msra.mxu0 %v4129_v26  ;;  %1820 = vmatpush.bf16.msra.mxu1 %v4136_v61 }
 0x566   :  { %1833 = vmatpush.bf16.msra.mxu2 %v4150_v59  ;;  %1846 = vmatpush.bf16.msra.mxu3 %v4138_v58 }
 0x569   :  { %1808 = vmatpush.bf16.msra.mxu0 %v4159_v49  ;;  %1821 = vmatpush.bf16.msra.mxu1 %v4163_v33 }
 0x56a   :  { %1834 = vmatpush.bf16.msra.mxu2 %v4185_v50  ;;  %1847 = vmatpush.bf16.msra.mxu3 %v4165_v8 }
 0x56d   :  { %1809 = vmatpush.bf16.msra.mxu0 %v4187_v51  ;;  %1822 = vmatpush.bf16.msra.mxu1 %v4200_v15 }
 0x56e   :  { %1835 = vmatpush.bf16.msra.mxu2 %v4211_v32  ;;  %1848 = vmatpush.bf16.msra.mxu3 %v4202_v20 }
 0x5bc   :  { %v4325_v24 = vpop.f32.mrf.mxu0  ;;  %v4327_v36 = vpop.f32.mrf.mxu1 }
 0x5bd   :  { %4670 = vst [vmem:[#allocation19_spill] sm:$0xff] %v4325_v24  ;;  %v1342_v24 = vadd.f32 %v1341_v13, %v4340_v34 }
 0x5be   :  { %4671 = vst [vmem:[#allocation20_spill] sm:$0xff] %v4327_v36  ;;  %v1371_v36 = vadd.f32 %v1370_v57, %v4342_v14 }
 0x5c3   :  { %v4329_v44 = vpop.f32.mrf.mxu2  ;;  %v4331_v21 = vpop.f32.mrf.mxu3 }
 0x5c4   :  { %4672 = vst [vmem:[#allocation22_spill] sm:$0xff] %v4329_v44  ;;  %v4336_v56 = vpop.f32.mrf.mxu0  ;;  %v4338_v45 = vpop.f32.mrf.mxu1 }
 0x5c5   :  { %4673 = vst [vmem:[#allocation21_spill] sm:$0xff] %v4331_v21 }
 0x5c6   :  { %4674 = vst [vmem:[#allocation23_spill] sm:$0xff] %v4336_v56  ;;  %v4352_v56 = vperm.slane %v1130_v53, 3 }
 0x5c7   :  { %4675 = vst [vmem:[#allocation24_spill] sm:$0xff] %v4338_v45 }
 0x5c8   :  { %v1429_v13 = vadd.f32 %v1428_v16, %v4352_v56 }
 0x5cb   :  { %v4346_v23 = vpop.f32.mrf.mxu2  ;;  %v4348_v44 = vpop.f32.mrf.mxu3 }
 0x5cc   :  { %4676 = vst [vmem:[#allocation25_spill] sm:$0xff] %v4346_v23  ;;  %v1653_v21 = vpop.f32.mrf.mxu0  ;;  %v1666_v4 = vpop.f32.mrf.mxu1 }
 0x5cd   :  { %4677 = vst [vmem:[#allocation26_spill] sm:$0xff] %v4348_v44  ;;  %v1696_v1 = vadd.f32 %v1653_v21, %v1342_v24  ;;  %v1697_v54 = vadd.f32 %v1666_v4, %v1371_v36 }
 0x5cf   :  { %v1700_v45 = vmul.f32 0.5, %v1696_v1  ;;  %v1701_v39 = vmul.f32 0.5, %v1697_v54 }
 0x5d1   :  { %2888 = vtanh.f32 %v1700_v45 }
 0x5d2   :  { %2890 = vtanh.f32 %v1701_v39 }
 0x5d3   :  { %v1679_v57 = vpop.f32.mrf.mxu2  ;;  %v1692_v23 = vpop.f32.mrf.mxu3 }
 0x5d4   :  { %v1698_v37 = vadd.f32 %v1679_v57, %v1400_v38  ;;  %v1699_v44 = vadd.f32 %v1692_v23, %v1429_v13  ;;  %v1655_v31 = vpop.f32.mrf.mxu0  ;;  %v1668_v30 = vpop.f32.mrf.mxu1 }
 0x5d6   :  { %v1702_v24 = vmul.f32 0.5, %v1698_v37  ;;  %2892 = vtanh.f32 %v1699_v44 }
 0x5d7   :  { %v2889_v4 = vpop.eup %2888 }
 0x5d8   :  { %v2891_v36 = vpop.eup %2890  ;;  %v1706_v21 = vmul.f32 0.5, %v2889_v4  ;;  %2894 = vtanh.f32 %v1702_v24 }
 0x5d9   :  { %v1707_v53 = vmul.f32 0.5, %v2891_v36 }
 0x5da   :  { %v1709_v54 = vadd.f32 0.5, %v1706_v21  ;;  %v1402_v21 = vadd.f32 %v4289_v22, %v4350_v7 }
 0x5db   :  { %v1710_v1 = vadd.f32 0.5, %v1707_v53  ;;  %v1681_v45 = vpop.f32.mrf.mxu2  ;;  %v1694_v6 = vpop.f32.mrf.mxu3  ;;  %v1431_v53 = vadd.f32 %v4291_v2, %v4352_v56 }
 0x5dc   :  { %v2893_v18 = vpop.eup %2892 }
 0x5dd   :  { %v1713_v16 = vmul.f32 0.0, %v1710_v1  ;;  %v1714_v39 = vmul.f32 %v2893_v18, %v1709_v54  ;;  %v1373_v18 = vadd.f32 %v4287_v17, %v4342_v14 }
 0x5de   :  { %v2895_v3 = vpop.eup %2894 }
 0x5df   :  { %v4356_v9 = vadd.f32 %v1714_v39, %v1713_v16  ;;  %v1708_v30 = vmul.f32 0.5, %v2895_v3  ;;  %v1344_v3 = vadd.f32 %v4285_v46, %v4340_v34 }
 0x5e1   :  { %2896 = vtanh.f32 %v4356_v9  ;;  %v1711_v31 = vadd.f32 0.5, %v1708_v30 }
 0x5e7   :  { %v2897_v37 = vpop.eup %2896 }
 0x5e8   :  { %v1717_v38 = vmul.f32 %v2897_v37, %v1711_v31 }
 0x5ea   :  { %v1722_v23 = vpack.c.bf16 %v1717_v38, %v1717_v38 }
 0x5ec   :  { %1731 = vmatmul.bf16.vlgmr.msrb.gmra.mxu0 %v1722_v23  ;;  %1744 = vmatmul.bf16.vlgmr.msrb.gmra.mxu1 %v1722_v23 }
 0x5ed   :  { %1757 = vmatmul.bf16.vlgmr.msrb.gmra.mxu2 %v1722_v23  ;;  %1770 = vmatmul.bf16.vlgmr.msrb.gmra.mxu3 %v1722_v23 }
 0x5ee   :  { %1881 = vmatpush.bf16.msrb.mxu0 %v3929_v35  ;;  %1894 = vmatpush.bf16.msrb.mxu1 %v3940_v63 }
 0x5ef   :  { %1907 = vmatpush.bf16.msrb.mxu2 %v3951_v27  ;;  %1920 = vmatpush.bf16.msrb.mxu3 %v3942_v11 }
 0x5f2   :  { %1882 = vmatpush.bf16.msrb.mxu0 %v3965_v43  ;;  %1895 = vmatpush.bf16.msrb.mxu1 %v3976_v55 }
 0x5f3   :  { %1908 = vmatpush.bf16.msrb.mxu2 %v3989_v5  ;;  %1921 = vmatpush.bf16.msrb.mxu3 %v3978_v0 }
 0x5f6   :  { %1883 = vmatpush.bf16.msrb.mxu0 %v4005_v48  ;;  %1896 = vmatpush.bf16.msrb.mxu1 %v4016_v62 }
 0x5f7   :  { %1909 = vmatpush.bf16.msrb.mxu2 %v4030_v10  ;;  %1922 = vmatpush.bf16.msrb.mxu3 %v4018_v52 }
 0x5fa   :  { %1884 = vmatpush.bf16.msrb.mxu0 %v4043_v12  ;;  %1897 = vmatpush.bf16.msrb.mxu1 %v4045_v41 }
 0x5fb   :  { %1910 = vmatpush.bf16.msrb.mxu2 %v4065_v29  ;;  %1923 = vmatpush.bf16.msrb.mxu3 %v4054_v47 }
 0x5fe   :  { %1885 = vmatpush.bf16.msrb.mxu0 %v4081_v25  ;;  %1898 = vmatpush.bf16.msrb.mxu1 %v4094_v40 }
 0x5ff   :  { %1911 = vmatpush.bf16.msrb.mxu2 %v4108_v19  ;;  %1924 = vmatpush.bf16.msrb.mxu3 %v4096_v42 }
 0x602   :  { %1886 = vmatpush.bf16.msrb.mxu0 %v4129_v26  ;;  %1899 = vmatpush.bf16.msrb.mxu1 %v4136_v61 }
 0x603   :  { %1912 = vmatpush.bf16.msrb.mxu2 %v4150_v59  ;;  %1925 = vmatpush.bf16.msrb.mxu3 %v4138_v58 }
 0x606   :  { %1887 = vmatpush.bf16.msrb.mxu0 %v4159_v49  ;;  %1900 = vmatpush.bf16.msrb.mxu1 %v4163_v33 }
 0x607   :  { %1913 = vmatpush.bf16.msrb.mxu2 %v4185_v50  ;;  %1926 = vmatpush.bf16.msrb.mxu3 %v4165_v8 }
 0x60a   :  { %1888 = vmatpush.bf16.msrb.mxu0 %v4187_v51  ;;  %1901 = vmatpush.bf16.msrb.mxu1 %v4200_v15 }
 0x60b   :  { %1914 = vmatpush.bf16.msrb.mxu2 %v4211_v32  ;;  %1927 = vmatpush.bf16.msrb.mxu3 %v4202_v20 }
 0x669   :  { %v1732_v44 = vpop.f32.mrf.mxu0  ;;  %v1745_v13 = vpop.f32.mrf.mxu1 }
 0x66a   :  { %v1775_v57 = vadd.f32 %v1732_v44, %v1344_v3  ;;  %v1776_v24 = vadd.f32 %v1745_v13, %v1373_v18 }
 0x66c   :  { %v1779_v4 = vmul.f32 0.5, %v1775_v57  ;;  %v1780_v36 = vmul.f32 0.5, %v1776_v24 }
 0x66e   :  { %2898 = vtanh.f32 %v1779_v4 }
 0x66f   :  { %2900 = vtanh.f32 %v1780_v36 }
 0x670   :  { %v1758_v54 = vpop.f32.mrf.mxu2  ;;  %v1771_v1 = vpop.f32.mrf.mxu3 }
 0x671   :  { %v1777_v46 = vadd.f32 %v1758_v54, %v1402_v21  ;;  %v1778_v45 = vadd.f32 %v1771_v1, %v1431_v53  ;;  %v1734_v6 = vpop.f32.mrf.mxu0  ;;  %v1747_v17 = vpop.f32.mrf.mxu1  ;;  %v1376_v54 = vadd.f32 %v4295_v28, %v4342_v14 }
 0x673   :  { %v1781_v16 = vmul.f32 0.5, %v1777_v46  ;;  %2902 = vtanh.f32 %v1778_v45 }
 0x674   :  { %v2899_v39 = vpop.eup %2898 }
 0x675   :  { %v2901_v30 = vpop.eup %2900  ;;  %v1785_v31 = vmul.f32 0.5, %v2899_v39  ;;  %2904 = vtanh.f32 %v1781_v16  ;;  %v4678_v39 = vld [vmem:[#allocation6_spill] sm:$0xff] }
 0x676   :  { %v1786_v37 = vmul.f32 0.5, %v2901_v30  ;;  %v1405_v30 = vadd.f32 %v4678_v39, %v4350_v7 }
 0x677   :  { %v1788_v38 = vadd.f32 0.5, %v1785_v31  ;;  %v4679_v31 = vld [vmem:[#allocation5_spill] sm:$0xff] }
 0x678   :  { %v1789_v23 = vadd.f32 0.5, %v1786_v37  ;;  %v1760_v22 = vpop.f32.mrf.mxu2  ;;  %v1773_v3 = vpop.f32.mrf.mxu3  ;;  %v1434_v37 = vadd.f32 %v4679_v31, %v4352_v56 }
 0x679   :  { %v2903_v18 = vpop.eup %2902 }
 0x67a   :  { %v1792_v2 = vmul.f32 %v1789_v23, %v4356_v9  ;;  %v1793_v44 = vmul.f32 %v2903_v18, %v1788_v38  ;;  %v1347_v9 = vadd.f32 %v4293_v60, %v4340_v34 }
 0x67b   :  { %v2905_v13 = vpop.eup %2904 }
 0x67c   :  { %v4400_v57 = vadd.f32 %v1793_v44, %v1792_v2  ;;  %v1787_v24 = vmul.f32 0.5, %v2905_v13 }
 0x67e   :  { %2906 = vtanh.f32 %v4400_v57  ;;  %v1790_v4 = vadd.f32 0.5, %v1787_v24 }
 0x684   :  { %v2907_v36 = vpop.eup %2906 }
 0x685   :  { %v1796_v21 = vmul.f32 %v2907_v36, %v1790_v4 }
 0x687   :  { %v1801_v53 = vpack.c.bf16 %v1796_v21, %v1796_v21 }
 0x689   :  { %1810 = vmatmul.bf16.vlgmr.msra.gmra.mxu0 %v1801_v53  ;;  %1823 = vmatmul.bf16.vlgmr.msra.gmra.mxu1 %v1801_v53 }
 0x68a   :  { %1836 = vmatmul.bf16.vlgmr.msra.gmra.mxu2 %v1801_v53  ;;  %1849 = vmatmul.bf16.vlgmr.msra.gmra.mxu3 %v1801_v53 }
 0x68b   :  { %1960 = vmatpush.bf16.msra.mxu0 %v3929_v35  ;;  %1973 = vmatpush.bf16.msra.mxu1 %v3940_v63 }
 0x68c   :  { %1986 = vmatpush.bf16.msra.mxu2 %v3951_v27  ;;  %1999 = vmatpush.bf16.msra.mxu3 %v3942_v11 }
 0x68f   :  { %1961 = vmatpush.bf16.msra.mxu0 %v3965_v43  ;;  %1974 = vmatpush.bf16.msra.mxu1 %v3976_v55 }
 0x690   :  { %1987 = vmatpush.bf16.msra.mxu2 %v3989_v5  ;;  %2000 = vmatpush.bf16.msra.mxu3 %v3978_v0 }
 0x693   :  { %1962 = vmatpush.bf16.msra.mxu0 %v4005_v48  ;;  %1975 = vmatpush.bf16.msra.mxu1 %v4016_v62 }
 0x694   :  { %1988 = vmatpush.bf16.msra.mxu2 %v4030_v10  ;;  %2001 = vmatpush.bf16.msra.mxu3 %v4018_v52 }
 0x697   :  { %1963 = vmatpush.bf16.msra.mxu0 %v4043_v12  ;;  %1976 = vmatpush.bf16.msra.mxu1 %v4045_v41 }
 0x698   :  { %1989 = vmatpush.bf16.msra.mxu2 %v4065_v29  ;;  %2002 = vmatpush.bf16.msra.mxu3 %v4054_v47 }
 0x69b   :  { %1964 = vmatpush.bf16.msra.mxu0 %v4081_v25  ;;  %1977 = vmatpush.bf16.msra.mxu1 %v4094_v40 }
 0x69c   :  { %1990 = vmatpush.bf16.msra.mxu2 %v4108_v19  ;;  %2003 = vmatpush.bf16.msra.mxu3 %v4096_v42 }
 0x69f   :  { %1965 = vmatpush.bf16.msra.mxu0 %v4129_v26  ;;  %1978 = vmatpush.bf16.msra.mxu1 %v4136_v61 }
 0x6a0   :  { %1991 = vmatpush.bf16.msra.mxu2 %v4150_v59  ;;  %2004 = vmatpush.bf16.msra.mxu3 %v4138_v58 }
 0x6a3   :  { %1966 = vmatpush.bf16.msra.mxu0 %v4159_v49  ;;  %1979 = vmatpush.bf16.msra.mxu1 %v4163_v33 }
 0x6a4   :  { %1992 = vmatpush.bf16.msra.mxu2 %v4185_v50  ;;  %2005 = vmatpush.bf16.msra.mxu3 %v4165_v8 }
 0x6a7   :  { %1967 = vmatpush.bf16.msra.mxu0 %v4187_v51  ;;  %1980 = vmatpush.bf16.msra.mxu1 %v4200_v15 }
 0x6a8   :  { %1993 = vmatpush.bf16.msra.mxu2 %v4211_v32  ;;  %2006 = vmatpush.bf16.msra.mxu3 %v4202_v20 }
 0x706   :  { %v1811_v1 = vpop.f32.mrf.mxu0  ;;  %v1824_v46 = vpop.f32.mrf.mxu1 }
 0x707   :  { %v1854_v45 = vadd.f32 %v1811_v1, %v1347_v9  ;;  %v1855_v6 = vadd.f32 %v1824_v46, %v1376_v54 }
 0x709   :  { %v1858_v17 = vmul.f32 0.5, %v1854_v45  ;;  %v1859_v16 = vmul.f32 0.5, %v1855_v6 }
 0x70b   :  { %2908 = vtanh.f32 %v1858_v17 }
 0x70c   :  { %2910 = vtanh.f32 %v1859_v16 }
 0x70d   :  { %v1837_v38 = vpop.f32.mrf.mxu2  ;;  %v1850_v23 = vpop.f32.mrf.mxu3 }
 0x70e   :  { %v1856_v60 = vadd.f32 %v1837_v38, %v1405_v30  ;;  %v1857_v22 = vadd.f32 %v1850_v23, %v1434_v37  ;;  %v1813_v3 = vpop.f32.mrf.mxu0  ;;  %v1826_v28 = vpop.f32.mrf.mxu1  ;;  %v4681_v37 = vld [vmem:[#allocation8_spill] sm:$0xff] }
 0x70f   :  { %v1378_v38 = vadd.f32 %v4681_v37, %v4342_v14 }
 0x710   :  { %v1860_v18 = vmul.f32 0.5, %v1856_v60  ;;  %2912 = vtanh.f32 %v1857_v22 }
 0x711   :  { %v2909_v2 = vpop.eup %2908 }
 0x712   :  { %v2911_v44 = vpop.eup %2910  ;;  %v1864_v13 = vmul.f32 0.5, %v2909_v2  ;;  %2914 = vtanh.f32 %v1860_v18  ;;  %v4682_v2 = vld [vmem:[#allocation9_spill] sm:$0xff] }
 0x713   :  { %v1865_v24 = vmul.f32 0.5, %v2911_v44  ;;  %v1407_v44 = vadd.f32 %v4682_v2, %v4350_v7 }
 0x714   :  { %v1867_v4 = vadd.f32 0.5, %v1864_v13  ;;  %v4683_v13 = vld [vmem:[#allocation10_spill] sm:$0xff] }
 0x715   :  { %v1868_v36 = vadd.f32 0.5, %v1865_v24  ;;  %v1839_v21 = vpop.f32.mrf.mxu2  ;;  %v1852_v53 = vpop.f32.mrf.mxu3  ;;  %v1436_v24 = vadd.f32 %v4683_v13, %v4352_v56 }
 0x716   :  { %v2913_v9 = vpop.eup %2912 }
 0x717   :  { %v1871_v54 = vmul.f32 %v1868_v36, %v4400_v57  ;;  %v1872_v1 = vmul.f32 %v2913_v9, %v1867_v4  ;;  %v4680_v57 = vld [vmem:[#allocation7_spill] sm:$0xff] }
 0x718   :  { %v2915_v46 = vpop.eup %2914  ;;  %v1349_v31 = vadd.f32 %v4680_v57, %v4340_v34 }
 0x719   :  { %v4444_v45 = vadd.f32 %v1872_v1, %v1871_v54  ;;  %v1866_v6 = vmul.f32 0.5, %v2915_v46 }
 0x71b   :  { %2916 = vtanh.f32 %v4444_v45  ;;  %v1869_v17 = vadd.f32 0.5, %v1866_v6 }
 0x721   :  { %v2917_v16 = vpop.eup %2916 }
 0x722   :  { %v1875_v39 = vmul.f32 %v2917_v16, %v1869_v17 }
 0x724   :  { %v1880_v30 = vpack.c.bf16 %v1875_v39, %v1875_v39 }
 0x726   :  { %1889 = vmatmul.bf16.vlgmr.msrb.gmra.mxu0 %v1880_v30  ;;  %1902 = vmatmul.bf16.vlgmr.msrb.gmra.mxu1 %v1880_v30 }
 0x727   :  { %1915 = vmatmul.bf16.vlgmr.msrb.gmra.mxu2 %v1880_v30  ;;  %1928 = vmatmul.bf16.vlgmr.msrb.gmra.mxu3 %v1880_v30 }
 0x728   :  { %2039 = vmatpush.bf16.msrb.mxu0 %v3929_v35  ;;  %2052 = vmatpush.bf16.msrb.mxu1 %v3940_v63 }
 0x729   :  { %2065 = vmatpush.bf16.msrb.mxu2 %v3951_v27  ;;  %2078 = vmatpush.bf16.msrb.mxu3 %v3942_v11 }
 0x72c   :  { %2040 = vmatpush.bf16.msrb.mxu0 %v3965_v43  ;;  %2053 = vmatpush.bf16.msrb.mxu1 %v3976_v55 }
 0x72d   :  { %2066 = vmatpush.bf16.msrb.mxu2 %v3989_v5  ;;  %2079 = vmatpush.bf16.msrb.mxu3 %v3978_v0 }
 0x730   :  { %2041 = vmatpush.bf16.msrb.mxu0 %v4005_v48  ;;  %2054 = vmatpush.bf16.msrb.mxu1 %v4016_v62 }
 0x731   :  { %2067 = vmatpush.bf16.msrb.mxu2 %v4030_v10  ;;  %2080 = vmatpush.bf16.msrb.mxu3 %v4018_v52 }
 0x734   :  { %2042 = vmatpush.bf16.msrb.mxu0 %v4043_v12  ;;  %2055 = vmatpush.bf16.msrb.mxu1 %v4045_v41 }
 0x735   :  { %2068 = vmatpush.bf16.msrb.mxu2 %v4065_v29  ;;  %2081 = vmatpush.bf16.msrb.mxu3 %v4054_v47 }
 0x738   :  { %2043 = vmatpush.bf16.msrb.mxu0 %v4081_v25  ;;  %2056 = vmatpush.bf16.msrb.mxu1 %v4094_v40 }
 0x739   :  { %2069 = vmatpush.bf16.msrb.mxu2 %v4108_v19  ;;  %2082 = vmatpush.bf16.msrb.mxu3 %v4096_v42 }
 0x73c   :  { %2044 = vmatpush.bf16.msrb.mxu0 %v4129_v26  ;;  %2057 = vmatpush.bf16.msrb.mxu1 %v4136_v61 }
 0x73d   :  { %2070 = vmatpush.bf16.msrb.mxu2 %v4150_v59  ;;  %2083 = vmatpush.bf16.msrb.mxu3 %v4138_v58 }
 0x740   :  { %2045 = vmatpush.bf16.msrb.mxu0 %v4159_v49  ;;  %2058 = vmatpush.bf16.msrb.mxu1 %v4163_v33 }
 0x741   :  { %2071 = vmatpush.bf16.msrb.mxu2 %v4185_v50  ;;  %2084 = vmatpush.bf16.msrb.mxu3 %v4165_v8 }
 0x744   :  { %2046 = vmatpush.bf16.msrb.mxu0 %v4187_v51  ;;  %2059 = vmatpush.bf16.msrb.mxu1 %v4200_v15 }
 0x745   :  { %2072 = vmatpush.bf16.msrb.mxu2 %v4211_v32  ;;  %2085 = vmatpush.bf16.msrb.mxu3 %v4202_v20 }
 0x7a3   :  { %v1890_v23 = vpop.f32.mrf.mxu0  ;;  %v1903_v60 = vpop.f32.mrf.mxu1 }
 0x7a4   :  { %v1933_v22 = vadd.f32 %v1890_v23, %v1349_v31  ;;  %v1934_v3 = vadd.f32 %v1903_v60, %v1378_v38 }
 0x7a6   :  { %v1937_v28 = vmul.f32 0.5, %v1933_v22  ;;  %v1938_v18 = vmul.f32 0.5, %v1934_v3 }
 0x7a8   :  { %2918 = vtanh.f32 %v1937_v28 }
 0x7a9   :  { %2920 = vtanh.f32 %v1938_v18 }
 0x7aa   :  { %v1916_v4 = vpop.f32.mrf.mxu2  ;;  %v1929_v36 = vpop.f32.mrf.mxu3 }
 0x7ab   :  { %v1935_v21 = vadd.f32 %v1916_v4, %v1407_v44  ;;  %v1936_v53 = vadd.f32 %v1929_v36, %v1436_v24  ;;  %v1892_v9 = vpop.f32.mrf.mxu0  ;;  %v1905_v54 = vpop.f32.mrf.mxu1  ;;  %v4685_v24 = vld [vmem:[#allocation12_spill] sm:$0xff] }
 0x7ac   :  { %v1381_v4 = vadd.f32 %v4685_v24, %v4342_v14 }
 0x7ad   :  { %v1939_v1 = vmul.f32 0.5, %v1935_v21  ;;  %2922 = vtanh.f32 %v1936_v53 }
 0x7ae   :  { %v2919_v46 = vpop.eup %2918 }
 0x7af   :  { %v2921_v6 = vpop.eup %2920  ;;  %v1943_v17 = vmul.f32 0.5, %v2919_v46  ;;  %2924 = vtanh.f32 %v1939_v1  ;;  %v4686_v46 = vld [vmem:[#allocation14_spill] sm:$0xff] }
 0x7b0   :  { %v1944_v16 = vmul.f32 0.5, %v2921_v6  ;;  %v1410_v6 = vadd.f32 %v4686_v46, %v4350_v7 }
 0x7b1   :  { %v1946_v39 = vadd.f32 0.5, %v1943_v17  ;;  %v4687_v17 = vld [vmem:[#allocation13_spill] sm:$0xff] }
 0x7b2   :  { %v1947_v30 = vadd.f32 0.5, %v1944_v16  ;;  %v1918_v57 = vpop.f32.mrf.mxu2  ;;  %v1931_v31 = vpop.f32.mrf.mxu3  ;;  %v1439_v16 = vadd.f32 %v4687_v17, %v4352_v56 }
 0x7b3   :  { %v2923_v37 = vpop.eup %2922 }
 0x7b4   :  { %v1950_v38 = vmul.f32 %v1947_v30, %v4444_v45  ;;  %v1951_v23 = vmul.f32 %v2923_v37, %v1946_v39  ;;  %v4684_v45 = vld [vmem:[#allocation11_spill] sm:$0xff] }
 0x7b5   :  { %v2925_v60 = vpop.eup %2924  ;;  %v1352_v13 = vadd.f32 %v4684_v45, %v4340_v34 }
 0x7b6   :  { %v4488_v22 = vadd.f32 %v1951_v23, %v1950_v38  ;;  %v1945_v3 = vmul.f32 0.5, %v2925_v60 }
 0x7b8   :  { %2926 = vtanh.f32 %v4488_v22  ;;  %v1948_v28 = vadd.f32 0.5, %v1945_v3 }
 0x7be   :  { %v2927_v18 = vpop.eup %2926 }
 0x7bf   :  { %v1954_v2 = vmul.f32 %v2927_v18, %v1948_v28 }
 0x7c1   :  { %v1959_v44 = vpack.c.bf16 %v1954_v2, %v1954_v2 }
 0x7c3   :  { %1968 = vmatmul.bf16.vlgmr.msra.gmra.mxu0 %v1959_v44  ;;  %1981 = vmatmul.bf16.vlgmr.msra.gmra.mxu1 %v1959_v44 }
 0x7c4   :  { %1994 = vmatmul.bf16.vlgmr.msra.gmra.mxu2 %v1959_v44  ;;  %2007 = vmatmul.bf16.vlgmr.msra.gmra.mxu3 %v1959_v44 }
 0x7c5   :  { %2118 = vmatpush.bf16.msra.mxu0 %v3929_v35  ;;  %2131 = vmatpush.bf16.msra.mxu1 %v3940_v63 }
 0x7c6   :  { %2144 = vmatpush.bf16.msra.mxu2 %v3951_v27  ;;  %2157 = vmatpush.bf16.msra.mxu3 %v3942_v11 }
 0x7c9   :  { %2119 = vmatpush.bf16.msra.mxu0 %v3965_v43  ;;  %2132 = vmatpush.bf16.msra.mxu1 %v3976_v55 }
 0x7ca   :  { %2145 = vmatpush.bf16.msra.mxu2 %v3989_v5  ;;  %2158 = vmatpush.bf16.msra.mxu3 %v3978_v0 }
 0x7cd   :  { %2120 = vmatpush.bf16.msra.mxu0 %v4005_v48  ;;  %2133 = vmatpush.bf16.msra.mxu1 %v4016_v62 }
 0x7ce   :  { %2146 = vmatpush.bf16.msra.mxu2 %v4030_v10  ;;  %2159 = vmatpush.bf16.msra.mxu3 %v4018_v52 }
 0x7d1   :  { %2121 = vmatpush.bf16.msra.mxu0 %v4043_v12  ;;  %2134 = vmatpush.bf16.msra.mxu1 %v4045_v41 }
 0x7d2   :  { %2147 = vmatpush.bf16.msra.mxu2 %v4065_v29  ;;  %2160 = vmatpush.bf16.msra.mxu3 %v4054_v47 }
 0x7d5   :  { %2122 = vmatpush.bf16.msra.mxu0 %v4081_v25  ;;  %2135 = vmatpush.bf16.msra.mxu1 %v4094_v40 }
 0x7d6   :  { %2148 = vmatpush.bf16.msra.mxu2 %v4108_v19  ;;  %2161 = vmatpush.bf16.msra.mxu3 %v4096_v42 }
 0x7d9   :  { %2123 = vmatpush.bf16.msra.mxu0 %v4129_v26  ;;  %2136 = vmatpush.bf16.msra.mxu1 %v4136_v61 }
 0x7da   :  { %2149 = vmatpush.bf16.msra.mxu2 %v4150_v59  ;;  %2162 = vmatpush.bf16.msra.mxu3 %v4138_v58 }
 0x7dd   :  { %2124 = vmatpush.bf16.msra.mxu0 %v4159_v49  ;;  %2137 = vmatpush.bf16.msra.mxu1 %v4163_v33 }
 0x7de   :  { %2150 = vmatpush.bf16.msra.mxu2 %v4185_v50  ;;  %2163 = vmatpush.bf16.msra.mxu3 %v4165_v8 }
 0x7e1   :  { %2125 = vmatpush.bf16.msra.mxu0 %v4187_v51  ;;  %2138 = vmatpush.bf16.msra.mxu1 %v4200_v15 }
 0x7e2   :  { %2151 = vmatpush.bf16.msra.mxu2 %v4211_v32  ;;  %2164 = vmatpush.bf16.msra.mxu3 %v4202_v20 }
 0x840   :  { %v1969_v36 = vpop.f32.mrf.mxu0  ;;  %v1982_v21 = vpop.f32.mrf.mxu1 }
 0x841   :  { %v2012_v53 = vadd.f32 %v1969_v36, %v1352_v13  ;;  %v2013_v9 = vadd.f32 %v1982_v21, %v1381_v4 }
 0x843   :  { %v2016_v54 = vmul.f32 0.5, %v2012_v53  ;;  %v2017_v1 = vmul.f32 0.5, %v2013_v9 }
 0x845   :  { %2928 = vtanh.f32 %v2016_v54 }
 0x846   :  { %2930 = vtanh.f32 %v2017_v1 }
 0x847   :  { %v1995_v39 = vpop.f32.mrf.mxu2  ;;  %v2008_v30 = vpop.f32.mrf.mxu3 }
 0x848   :  { %v2014_v57 = vadd.f32 %v1995_v39, %v1410_v6  ;;  %v2015_v31 = vadd.f32 %v2008_v30, %v1439_v16  ;;  %v1971_v37 = vpop.f32.mrf.mxu0  ;;  %v1984_v38 = vpop.f32.mrf.mxu1 }
 0x849   :  { %v4692_v37 = vld [vmem:[#allocation19_spill] sm:$0xff] }
 0x84a   :  { %v2018_v23 = vmul.f32 0.5, %v2014_v57  ;;  %2932 = vtanh.f32 %v2015_v31  ;;  %v1357_v38 = vadd.f32 %v4692_v37, %v4340_v34 }
 0x84b   :  { %v2929_v60 = vpop.eup %2928 }
 0x84c   :  { %v2931_v3 = vpop.eup %2930  ;;  %v2022_v28 = vmul.f32 0.5, %v2929_v60  ;;  %2934 = vtanh.f32 %v2018_v23  ;;  %v4693_v23 = vld [vmem:[#allocation20_spill] sm:$0xff] }
 0x84d   :  { %v2023_v18 = vmul.f32 0.5, %v2931_v3  ;;  %v1386_v60 = vadd.f32 %v4693_v23, %v4342_v14 }
 0x84e   :  { %v2025_v2 = vadd.f32 0.5, %v2022_v28 }
 0x84f   :  { %v2026_v44 = vadd.f32 0.5, %v2023_v18  ;;  %v1997_v45 = vpop.f32.mrf.mxu2  ;;  %v2010_v13 = vpop.f32.mrf.mxu3 }
 0x850   :  { %v2933_v24 = vpop.eup %2932  ;;  %v4694_v13 = vld [vmem:[#allocation22_spill] sm:$0xff] }
 0x851   :  { %v2029_v4 = vmul.f32 %v2026_v44, %v4488_v22  ;;  %v2030_v36 = vmul.f32 %v2933_v24, %v2025_v2  ;;  %v1415_v24 = vadd.f32 %v4694_v13, %v4350_v7 }
 0x852   :  { %v2935_v21 = vpop.eup %2934 }
 0x853   :  { %v4532_v53 = vadd.f32 %v2030_v36, %v2029_v4  ;;  %v2024_v9 = vmul.f32 0.5, %v2935_v21  ;;  %v4695_v4 = vld [vmem:[#allocation21_spill] sm:$0xff] }
 0x854   :  { %v1444_v36 = vadd.f32 %v4695_v4, %v4352_v56  ;;  %v2806_v4 = vld [vmem:[%s4608_s7] ss:$0 sm:$0xff] }
 0x855   :  { %2936 = vtanh.f32 %v4532_v53  ;;  %v2027_v54 = vadd.f32 0.5, %v2024_v9 }
 0x85b   :  { %v2937_v1 = vpop.eup %2936 }
 0x85c   :  { %v2033_v46 = vmul.f32 %v2937_v1, %v2027_v54 }
 0x85e   :  { %v2038_v6 = vpack.c.bf16 %v2033_v46, %v2033_v46 }
 0x860   :  { %2047 = vmatmul.bf16.vlgmr.msrb.gmra.mxu0 %v2038_v6  ;;  %2060 = vmatmul.bf16.vlgmr.msrb.gmra.mxu1 %v2038_v6 }
 0x861   :  { %2073 = vmatmul.bf16.vlgmr.msrb.gmra.mxu2 %v2038_v6  ;;  %2086 = vmatmul.bf16.vlgmr.msrb.gmra.mxu3 %v2038_v6 }
 0x862   :  { %2197 = vmatpush.bf16.msrb.mxu0 %v3929_v35  ;;  %2210 = vmatpush.bf16.msrb.mxu1 %v3940_v63  ;;  %v4688_v35 = vld [vmem:[#allocation15_spill] sm:$0xff] }
 0x863   :  { %2223 = vmatpush.bf16.msrb.mxu2 %v3951_v27  ;;  %2236 = vmatpush.bf16.msrb.mxu3 %v3942_v11  ;;  %v1354_v63 = vadd.f32 %v4688_v35, %v4340_v34  ;;  %v4689_v11 = vld [vmem:[#allocation16_spill] sm:$0xff] }
 0x864   :  { %v1383_v27 = vadd.f32 %v4689_v11, %v4342_v14 }
 0x866   :  { %2198 = vmatpush.bf16.msrb.mxu0 %v3965_v43  ;;  %2211 = vmatpush.bf16.msrb.mxu1 %v3976_v55 }
 0x867   :  { %2224 = vmatpush.bf16.msrb.mxu2 %v3989_v5  ;;  %2237 = vmatpush.bf16.msrb.mxu3 %v3978_v0 }
 0x86a   :  { %2199 = vmatpush.bf16.msrb.mxu0 %v4005_v48  ;;  %2212 = vmatpush.bf16.msrb.mxu1 %v4016_v62 }
 0x86b   :  { %2225 = vmatpush.bf16.msrb.mxu2 %v4030_v10  ;;  %2238 = vmatpush.bf16.msrb.mxu3 %v4018_v52  ;;  %v4690_v52 = vld [vmem:[#allocation17_spill] sm:$0xff] }
 0x86c   :  { %v1412_v10 = vadd.f32 %v4690_v52, %v4350_v7 }
 0x86e   :  { %2200 = vmatpush.bf16.msrb.mxu0 %v4043_v12  ;;  %2213 = vmatpush.bf16.msrb.mxu1 %v4045_v41  ;;  %v4691_v12 = vld [vmem:[#allocation18_spill] sm:$0xff] }
 0x86f   :  { %2226 = vmatpush.bf16.msrb.mxu2 %v4065_v29  ;;  %2239 = vmatpush.bf16.msrb.mxu3 %v4054_v47  ;;  %v1441_v41 = vadd.f32 %v4691_v12, %v4352_v56 }
 0x872   :  { %2201 = vmatpush.bf16.msrb.mxu0 %v4081_v25  ;;  %2214 = vmatpush.bf16.msrb.mxu1 %v4094_v40 }
 0x873   :  { %2227 = vmatpush.bf16.msrb.mxu2 %v4108_v19  ;;  %2240 = vmatpush.bf16.msrb.mxu3 %v4096_v42 }
 0x876   :  { %2202 = vmatpush.bf16.msrb.mxu0 %v4129_v26  ;;  %2215 = vmatpush.bf16.msrb.mxu1 %v4136_v61 }
 0x877   :  { %2228 = vmatpush.bf16.msrb.mxu2 %v4150_v59  ;;  %2241 = vmatpush.bf16.msrb.mxu3 %v4138_v58 }
 0x87a   :  { %2203 = vmatpush.bf16.msrb.mxu0 %v4159_v49  ;;  %2216 = vmatpush.bf16.msrb.mxu1 %v4163_v33 }
 0x87b   :  { %2229 = vmatpush.bf16.msrb.mxu2 %v4185_v50  ;;  %2242 = vmatpush.bf16.msrb.mxu3 %v4165_v8 }
 0x87e   :  { %2204 = vmatpush.bf16.msrb.mxu0 %v4187_v51  ;;  %2217 = vmatpush.bf16.msrb.mxu1 %v4200_v15 }
 0x87f   :  { %2230 = vmatpush.bf16.msrb.mxu2 %v4211_v32  ;;  %2243 = vmatpush.bf16.msrb.mxu3 %v4202_v20 }
 0x8dd   :  { %v2048_v43 = vpop.f32.mrf.mxu0  ;;  %v2061_v55 = vpop.f32.mrf.mxu1 }
 0x8de   :  { %v2091_v0 = vadd.f32 %v2048_v43, %v1354_v63  ;;  %v2092_v5 = vadd.f32 %v2061_v55, %v1383_v27 }
 0x8e0   :  { %v2095_v48 = vmul.f32 0.5, %v2091_v0  ;;  %v2096_v62 = vmul.f32 0.5, %v2092_v5 }
 0x8e2   :  { %2938 = vtanh.f32 %v2095_v48 }
 0x8e3   :  { %2940 = vtanh.f32 %v2096_v62 }
 0x8e4   :  { %v2074_v47 = vpop.f32.mrf.mxu2  ;;  %v2087_v29 = vpop.f32.mrf.mxu3 }
 0x8e5   :  { %v2093_v25 = vadd.f32 %v2074_v47, %v1412_v10  ;;  %v2094_v40 = vadd.f32 %v2087_v29, %v1441_v41  ;;  %v2050_v42 = vpop.f32.mrf.mxu0  ;;  %v2063_v19 = vpop.f32.mrf.mxu1 }
 0x8e6   :  { %v4696_v42 = vld [vmem:[#allocation23_spill] sm:$0xff] }
 0x8e7   :  { %v2097_v26 = vmul.f32 0.5, %v2093_v25  ;;  %2942 = vtanh.f32 %v2094_v40  ;;  %v1359_v19 = vadd.f32 %v4696_v42, %v4340_v34  ;;  %v4699_v34 = vld [vmem:[#allocation26_spill] sm:$0xff] }
 0x8e8   :  { %v2939_v61 = vpop.eup %2938 }
 0x8e9   :  { %v2941_v58 = vpop.eup %2940  ;;  %v2101_v59 = vmul.f32 0.5, %v2939_v61  ;;  %2944 = vtanh.f32 %v2097_v26  ;;  %v4697_v26 = vld [vmem:[#allocation24_spill] sm:$0xff] }
 0x8ea   :  { %v2102_v49 = vmul.f32 0.5, %v2941_v58  ;;  %v1388_v61 = vadd.f32 %v4697_v26, %v4342_v14 }
 0x8eb   :  { %v2104_v33 = vadd.f32 0.5, %v2101_v59 }
 0x8ec   :  { %v2105_v8 = vadd.f32 0.5, %v2102_v49  ;;  %v2076_v50 = vpop.f32.mrf.mxu2  ;;  %v2089_v51 = vpop.f32.mrf.mxu3  ;;  %v14_v49 = vstv %s4609_s8 }
 0x8ed   :  { %v2943_v15 = vpop.eup %2942  ;;  %15 = vst [vmem:[#allocation4] sm:$0x1] %v14_v49 }
 0x8ee   :  { %v2108_v20 = vmul.f32 %v2105_v8, %v4532_v53  ;;  %v2109_v32 = vmul.f32 %v2943_v15, %v2104_v33  ;;  %v4698_v15 = vld [vmem:[#allocation25_spill] sm:$0xff] }
 0x8ef   :  { %v2945_v22 = vpop.eup %2944 }
 0x8f0   :  { %v2110_v17 = vadd.f32 %v2109_v32, %v2108_v20  ;;  %v2103_v16 = vmul.f32 0.5, %v2945_v22  ;;  %v1417_v20 = vadd.f32 %v4698_v15, %v4350_v7  ;;  %v1446_v32 = vadd.f32 %v4699_v34, %v4352_v56 }
 0x8f2   :  { %2946 = vtanh.f32 %v2110_v17  ;;  %v2106_v39 = vadd.f32 0.5, %v2103_v16 }
 0x8f8   :  { %v2947_v30 = vpop.eup %2946 }
 0x8f9   :  { %v2112_v57 = vmul.f32 %v2947_v30, %v2106_v39 }
 0x8fb   :  { %v2117_v31 = vpack.c.bf16 %v2112_v57, %v2112_v57 }
 0x8fd   :  { %2126 = vmatmul.bf16.vlgmr.msra.gmra.mxu0 %v2117_v31  ;;  %2139 = vmatmul.bf16.vlgmr.msra.gmra.mxu1 %v2117_v31 }
 0x8fe   :  { %2152 = vmatmul.bf16.vlgmr.msra.gmra.mxu2 %v2117_v31  ;;  %2165 = vmatmul.bf16.vlgmr.msra.gmra.mxu3 %v2117_v31 }
 0x97a   :  { %v2127_v3 = vpop.f32.mrf.mxu0  ;;  %v2140_v28 = vpop.f32.mrf.mxu1 }
 0x97b   :  { %v2170_v18 = vadd.f32 %v2127_v3, %v1357_v38  ;;  %v2171_v2 = vadd.f32 %v2140_v28, %v1386_v60 }
 0x97d   :  { %v2174_v44 = vmul.f32 0.5, %v2170_v18  ;;  %v2175_v45 = vmul.f32 0.5, %v2171_v2 }
 0x97f   :  { %2948 = vtanh.f32 %v2174_v44 }
 0x980   :  { %2950 = vtanh.f32 %v2175_v45 }
 0x981   :  { %v2153_v21 = vpop.f32.mrf.mxu2  ;;  %v2166_v53 = vpop.f32.mrf.mxu3 }
 0x982   :  { %v2172_v9 = vadd.f32 %v2153_v21, %v1415_v24  ;;  %v2173_v54 = vadd.f32 %v2166_v53, %v1444_v36  ;;  %v2129_v1 = vpop.f32.mrf.mxu0  ;;  %v2142_v46 = vpop.f32.mrf.mxu1 }
 0x984   :  { %v2176_v6 = vmul.f32 0.5, %v2172_v9  ;;  %2952 = vtanh.f32 %v2173_v54  ;;  %v2807_v9 = vld [vmem:[#allocation4] ss:$0 sm:$0xff] }
 0x985   :  { %v2949_v35 = vpop.eup %2948 }
 0x986   :  { %v2951_v63 = vpop.eup %2950  ;;  %v2180_v11 = vmul.f32 0.5, %v2949_v35  ;;  %2954 = vtanh.f32 %v2176_v6 }
 0x987   :  { %v2181_v27 = vmul.f32 0.5, %v2951_v63 }
 0x988   :  { %v2183_v43 = vadd.f32 0.5, %v2180_v11 }
 0x989   :  { %v2184_v55 = vadd.f32 0.5, %v2181_v27  ;;  %v2155_v0 = vpop.f32.mrf.mxu2  ;;  %v2168_v5 = vpop.f32.mrf.mxu3 }
 0x98a   :  { %v2953_v48 = vpop.eup %2952 }
 0x98b   :  { %v2187_v62 = vmul.f32 %v2184_v55, %v2110_v17  ;;  %v2188_v52 = vmul.f32 %v2953_v48, %v2183_v43 }
 0x98c   :  { %v2955_v10 = vpop.eup %2954 }
 0x98d   :  { %v2189_v12 = vadd.f32 %v2188_v52, %v2187_v62  ;;  %v2182_v41 = vmul.f32 0.5, %v2955_v10 }
 0x98f   :  { %2956 = vtanh.f32 %v2189_v12  ;;  %v2185_v47 = vadd.f32 0.5, %v2182_v41 }
 0x995   :  { %v2957_v29 = vpop.eup %2956 }
 0x996   :  { %v2191_v25 = vmul.f32 %v2957_v29, %v2185_v47 }
 0x998   :  { %v2196_v40 = vpack.c.bf16 %v2191_v25, %v2191_v25 }
 0x99a   :  { %2205 = vmatmul.bf16.vlgmr.msrb.gmra.mxu0 %v2196_v40  ;;  %2218 = vmatmul.bf16.vlgmr.msrb.gmra.mxu1 %v2196_v40 }
 0x99b   :  { %2231 = vmatmul.bf16.vlgmr.msrb.gmra.mxu2 %v2196_v40  ;;  %2244 = vmatmul.bf16.vlgmr.msrb.gmra.mxu3 %v2196_v40 }
 0xa17   :  { %v2206_v58 = vpop.f32.mrf.mxu0  ;;  %v2219_v59 = vpop.f32.mrf.mxu1 }
 0xa18   :  { %v2249_v33 = vadd.f32 %v2206_v58, %v1359_v19  ;;  %v2250_v8 = vadd.f32 %v2219_v59, %v1388_v61 }
 0xa1a   :  { %v2253_v50 = vmul.f32 0.5, %v2249_v33  ;;  %v2254_v51 = vmul.f32 0.5, %v2250_v8 }
 0xa1c   :  { %2958 = vtanh.f32 %v2253_v50 }
 0xa1d   :  { %2960 = vtanh.f32 %v2254_v51 }
 0xa1e   :  { %v2232_v14 = vpop.f32.mrf.mxu2  ;;  %v2245_v22 = vpop.f32.mrf.mxu3 }
 0xa1f   :  { %v2251_v17 = vadd.f32 %v2232_v14, %v1417_v20  ;;  %v2252_v16 = vadd.f32 %v2245_v22, %v1446_v32  ;;  %v2208_v39 = vpop.f32.mrf.mxu0  ;;  %v2221_v30 = vpop.f32.mrf.mxu1 }
 0xa21   :  { %v2255_v57 = vmul.f32 0.5, %v2251_v17  ;;  %2962 = vtanh.f32 %v2252_v16 }
 0xa22   :  { %v2959_v31 = vpop.eup %2958 }
 0xa23   :  { %v2961_v37 = vpop.eup %2960  ;;  %v2259_v38 = vmul.f32 0.5, %v2959_v31  ;;  %2964 = vtanh.f32 %v2255_v57 }
 0xa24   :  { %v2260_v23 = vmul.f32 0.5, %v2961_v37 }
 0xa25   :  { %v2262_v60 = vadd.f32 0.5, %v2259_v38 }
 0xa26   :  { %v2263_v3 = vadd.f32 0.5, %v2260_v23  ;;  %v2234_v7 = vpop.f32.mrf.mxu2  ;;  %v2247_v28 = vpop.f32.mrf.mxu3 }
 0xa27   :  { %v2963_v18 = vpop.eup %2962 }
 0xa28   :  { %v2266_v56 = vmul.f32 %v2263_v3, %v2189_v12  ;;  %v2267_v2 = vmul.f32 %v2963_v18, %v2262_v60 }
 0xa29   :  { %v2965_v44 = vpop.eup %2964 }
 0xa2a   :  { %v2268_v45 = vadd.f32 %v2267_v2, %v2266_v56  ;;  %v2261_v13 = vmul.f32 0.5, %v2965_v44 }
 0xa2c   :  { %2966 = vtanh.f32 %v2268_v45  ;;  %v2264_v24 = vadd.f32 0.5, %v2261_v13 }
 0xa32   :  { %v2967_v36 = vpop.eup %2966 }
 0xa33   :  { %v2270_v21 = vmul.f32 %v2967_v36, %v2264_v24 }
 0xa35   :  { %v2276_v53 = vmul.f32 %v2806_v4, %v2270_v21 }
 0xa37   :  { %2277 = vadd.xlane.f32.xlu0 %v2276_v53 }
 0xaaa   :  { %v2278_v54 = vpop.xlane.xlu0 %2277 }
 0xaab   :  { %v2282_v1 = vadd.f32 %v2807_v9, %v2278_v54 }
 0xaad   :  { %2284 = vst.msk [vmem:[%s4610_s9] sm:$0xff] %vm2283_vm2, %v2282_v1 }

</bundles_post_ra>
